<compile_context>
chip_gen: v6e
topology: v6e:2x2x1
jax: 0.10.0
libtpu: 0.0.40
codegen_flags: <defaults>
</compile_context>

<pallas_src>
import jax
import jax.numpy as jnp
from jax import lax
from jax.experimental import pallas as pl
from jax.experimental.pallas import tpu as pltpu

EPS = 1e-5  # PyTorch InstanceNorm2d default


def _round_up(n, m):
    return ((n + m - 1) // m) * m


def resnet_block_kernel(x_ref, w1_ref, w2_ref, o_ref, pad_ref):
    """One batch image per grid step.

    x_ref  : (1, H, W, C)  f32   input block (conv1 input + residual source)
    w*_ref : (3, 3, C, C)  bf16  HWIO conv weights (biases cancel under IN)
    o_ref  : (1, H, W, C)  f32   output block
    pad_ref: (H+2, Wp, C)  f32   reflect-pad scratch, Wp = round_up(W,16) + 8,
                                 reused by both convs.
    """
    _, H, W, C = x_ref.shape
    Hp, Wp, _ = pad_ref.shape
    Wc = Wp - 8                      # column-band width, multiple of 16
    n_pix = H * W

    # Zero the alignment-tail columns once.  The scratch persists across grid
    # steps, and tail data only ever reaches accumulator columns >= W, which
    # are sliced away below, so stale data on later steps (or on a second
    # megacore, which never sees program_id 0) is harmless.
    if Wp > W + 2:
        @pl.when(pl.program_id(0) == 0)
        def _():
            pad_ref[:, W + 2:, :] = jnp.zeros((Hp, Wp - (W + 2), C), pad_ref.dtype)

    def reflect_pad(v):
        # nn.ReflectionPad2d(1) of v (H, W, C) into pad_ref[:, :W+2, :].
        pad_ref[1:H + 1, 1:W + 1, :] = v                          # centre
        pad_ref[1:H + 1, 0:1, :] = v[:, 1:2, :]                   # left  col (= col 1)
        pad_ref[1:H + 1, W + 1:W + 2, :] = v[:, W - 2:W - 1, :]   # right col (= col W-2)
        # Top / bottom rows (corners included) reflect already-padded rows.
        pad_ref[0:1, :, :] = pad_ref[2:3, :, :]                   # top    (= row 1)
        pad_ref[H + 1:H + 2, :, :] = pad_ref[H - 1:H, :, :]       # bottom (= row H-2)

    def conv3x3(w_ref):
        # 3x3 "valid" conv over pad_ref as 9 bf16 MXU matmuls accumulated into
        # a SINGLE f32 accumulator.  The width (dx) shift is resolved by the
        # column-band load (pad_ref[:, dx:dx+Wc, :], cast to bf16 once); the
        # height (dy) shift is a free leading-dim slice of that band.
        # Accumulator column j only mixes padded columns dx+j, so columns
        # [0, W) are exact and columns >= W (if any) are discarded by the
        # final aligned slice.
        acc = None
        for dx in range(3):
            cb = pad_ref[:, dx:dx + Wc, :].astype(jnp.bfloat16)   # (Hp, Wc, C)
            for dy in range(3):
                lhs = cb[dy:dy + H].reshape(H * Wc, C)            # free slice+reshape
                r = jnp.dot(lhs, w_ref[dy, dx],
                            preferred_element_type=jnp.float32)
                acc = r if acc is None else acc + r
        out = acc.reshape(H, Wc, C)
        return out if Wc == W else out[:, 0:W, :]                 # aligned slice

    def instance_norm(h):
        # Per-sample, per-channel stats (biased variance), two-pass like the
        # reference (mean, then centred variance).
        hf = h.reshape(n_pix, C)
        mean = jnp.mean(hf, axis=0, keepdims=True)                # (1, C)
        cent = hf - mean
        var = jnp.mean(cent * cent, axis=0, keepdims=True)
        inv = lax.rsqrt(var + EPS)
        return (cent * inv).reshape(H, W, C)

    # ---- ReflectPad -> Conv3x3 -> InstanceNorm -> ReLU --------------------
    reflect_pad(x_ref[0])
    h = jnp.maximum(instance_norm(conv3x3(w1_ref)), 0.0)

    # ---- ReflectPad -> Conv3x3 -> InstanceNorm ----------------------------
    reflect_pad(h)
    h2 = instance_norm(conv3x3(w2_ref))

    # ---- skip connection ---------------------------------------------------
    o_ref[0] = (x_ref[0] + h2).astype(o_ref.dtype)


def _vmem_limit(H, W, C, Hp, Wp, Wc):
    Cl = _round_up(C, 128)                 # account for lane padding of small C
    blk = H * W * Cl * 4
    est = (4 * blk                         # in + out blocks, double-buffered
           + 4 * 9 * C * Cl * 2            # two bf16 weight tensors, double-buffered
           + Hp * Wp * Cl * 4              # reflect-pad scratch
           + 2 * H * Wc * Cl * 4           # f32 accumulator + live matmul result
           + Hp * Wc * Cl * 2              # bf16 column band
           + 3 * blk)                      # h / centred temps / headroom
    try:
        cap = int(getattr(pltpu.get_tpu_info(), "vmem_capacity_bytes", 0)) \
              or 64 * 1024 * 1024
    except Exception:
        cap = 64 * 1024 * 1024             # conservative (v7x-sized) fallback
    return int(min(max(int(1.3 * est), 32 * 1024 * 1024), int(0.85 * cap)))


def resnet_block_nhwc(x, w1, w2, *, vmem_limit_bytes=None):
    """Core NHWC entry point (preferred when chaining blocks: avoids the
    per-block NCHW<->NHWC transposes).  x: (B,H,W,C) f32; w1/w2: (3,3,C,C)."""
    B, H, W, C = x.shape
    Wc = _round_up(W, 16)
    Wp = Wc + 8
    Hp = H + 2

    # bf16 weights -> single-pass MXU matmuls (accumulation stays f32).
    w1 = w1.astype(jnp.bfloat16)
    w2 = w2.astype(jnp.bfloat16)

    if vmem_limit_bytes is None:
        vmem_limit_bytes = _vmem_limit(H, W, C, Hp, Wp, Wc)

    return pl.pallas_call(
        resnet_block_kernel,
        out_shape=jax.ShapeDtypeStruct((B, H, W, C), x.dtype),
        grid_spec=pltpu.PrefetchScalarGridSpec(
            num_scalar_prefetch=0,
            grid=(B,),
            in_specs=[
                pl.BlockSpec((1, H, W, C), lambda b: (b, 0, 0, 0)),
                pl.BlockSpec((3, 3, C, C), lambda b: (0, 0, 0, 0)),
                pl.BlockSpec((3, 3, C, C), lambda b: (0, 0, 0, 0)),
            ],
            out_specs=pl.BlockSpec((1, H, W, C), lambda b: (b, 0, 0, 0)),
            scratch_shapes=[pltpu.VMEM((Hp, Wp, C), jnp.float32)],
        ),
        compiler_params=pltpu.CompilerParams(
            dimension_semantics=("parallel",),
            vmem_limit_bytes=vmem_limit_bytes),
    )(x, w1, w2)


def resnet_block(x_nchw, w1, b1, w2, b2, *, vmem_limit_bytes=None):
    """ResnetBlock forward, NCHW interface matching the PyTorch module.

    b1/b2 are accepted for API parity with the PyTorch module but are exactly
    cancelled by the affine-free InstanceNorm, so they are not sent to the
    kernel.  w*: (3,3,C,C) HWIO.
    """
    del b1, b2
    x = jnp.transpose(x_nchw, (0, 2, 3, 1))                 # NHWC: channels on lanes
    out = resnet_block_nhwc(x, w1, w2, vmem_limit_bytes=vmem_limit_bytes)
    return jnp.transpose(out, (0, 3, 1, 2))                 # -> NCHW


def resnet_block_ref(x_nchw, w1, b1, w2, b2):
    """Pure-JAX reference with the same precision policy as the kernel
    (bf16 conv operands, f32 accumulation)."""
    x = jnp.transpose(x_nchw, (0, 2, 3, 1)).astype(jnp.float32)

    def conv(inp, w, b):
        xp = jnp.pad(inp, ((0, 0), (1, 1), (1, 1), (0, 0)), mode="reflect")
        y = lax.conv_general_dilated(
            xp.astype(jnp.bfloat16), w.astype(jnp.bfloat16), (1, 1), "VALID",
            dimension_numbers=("NHWC", "HWIO", "NHWC"),
            preferred_element_type=jnp.float32)
        return y + b

    def inorm(h):
        m = jnp.mean(h, axis=(1, 2), keepdims=True)
        v = jnp.mean((h - m) ** 2, axis=(1, 2), keepdims=True)
        return (h - m) * lax.rsqrt(v + EPS)

    h = jnp.maximum(inorm(conv(x, w1, b1)), 0.0)
    h2 = inorm(conv(h, w2, b2))
    return jnp.transpose(x + h2, (0, 3, 1, 2))


if __name__ == "__main__":
    B, C, H, W = 2, 4, 16, 16
    key = jax.random.PRNGKey(0)
    kx, kw1, kb1, kw2, kb2 = jax.random.split(key, 5)

    x = jax.random.normal(kx, (B, C, H, W), jnp.float32)

    # Conv2d-style init: U(-1/sqrt(fan_in), 1/sqrt(fan_in)), fan_in = C * 9.
    # Weights stored in HWIO layout (kh, kw, Cin, Cout).
    bound = 1.0 / (C * 9) ** 0.5
    w1 = jax.random.uniform(kw1, (3, 3, C, C), jnp.float32, -bound, bound)
    b1 = jax.random.uniform(kb1, (C,), jnp.float32, -bound, bound)
    w2 = jax.random.uniform(kw2, (3, 3, C, C), jnp.float32, -bound, bound)
    b2 = jax.random.uniform(kb2, (C,), jnp.float32, -bound, bound)

    out = jax.block_until_ready(resnet_block(x, w1, b1, w2, b2))
    ref = jax.block_until_ready(resnet_block_ref(x, w1, b1, w2, b2))

    assert out.shape == (B, C, H, W)
    assert bool(jnp.allclose(out, ref, atol=1e-3, rtol=1e-3)), "mismatch vs reference"
    print("KERNEL_OK")
</pallas_src>

<mosaic_0001>
module attributes {stable_mosaic.version = 11 : i64} {
  func.func @resnet_block_kernel(%arg0: i32, %arg1: memref<1x16x16x4xf32, #tpu.memory_space<vmem>>, %arg2: memref<3x3x4x4xbf16, #tpu.memory_space<vmem>>, %arg3: memref<3x3x4x4xbf16, #tpu.memory_space<vmem>>, %arg4: memref<1x16x16x4xf32, #tpu.memory_space<vmem>>, %arg5: memref<18x24x4xf32, #tpu.memory_space<vmem>>) attributes {dimension_semantics = [#tpu.dimension_semantics<parallel>], iteration_bounds = array<i64: 2>, scalar_prefetch = 0 : i64, scratch_operands = 1 : i64, tpu.core_type = #tpu.core_type<tc>, window_params = [{transform_indices = @transform_0, window_bounds = array<i64: 1, 16, 16, 4>}, {pipeline_mode = #tpu.pipeline_mode<synchronous>, transform_indices = @transform_1, window_bounds = array<i64: 3, 3, 4, 4>}, {pipeline_mode = #tpu.pipeline_mode<synchronous>, transform_indices = @transform_2, window_bounds = array<i64: 3, 3, 4, 4>}, {transform_indices = @transform_3, window_bounds = array<i64: 1, 16, 16, 4>}]} {
    %c0_i32 = arith.constant 0 : i32
    %0 = arith.cmpi eq, %arg0, %c0_i32 : i32
    %1 = arith.extui %0 : i1 to i32
    %c0_i32_0 = arith.constant 0 : i32
    %2 = arith.cmpi ne, %1, %c0_i32_0 : i32
    scf.if %2 {
      %cst_168 = arith.constant 0.000000e+00 : f32
      %187 = vector.broadcast %cst_168 : f32 to vector<18x6x4xf32>
      %c0_169 = arith.constant 0 : index
      %c18 = arith.constant 18 : index
      %c0_170 = arith.constant 0 : index
      %188 = vector.load %arg5[%c0_169, %c18, %c0_170] : memref<18x24x4xf32, #tpu.memory_space<vmem>>, vector<18x6x4xf32>
      tpu.vector_store %arg5[%c0_169, %c18, %c0_170], %187 {strides = array<i32>} : memref<18x24x4xf32, #tpu.memory_space<vmem>>, vector<18x6x4xf32>,
    } else {
    }
    %c0 = arith.constant 0 : index
    %c0_1 = arith.constant 0 : index
    %c0_2 = arith.constant 0 : index
    %c0_3 = arith.constant 0 : index
    %3 = vector.load %arg1[%c0, %c0_1, %c0_2, %c0_3] : memref<1x16x16x4xf32, #tpu.memory_space<vmem>>, vector<1x16x16x4xf32>
    %4 = vector.shape_cast %3 : vector<1x16x16x4xf32> to vector<16x16x4xf32>
    %c1 = arith.constant 1 : index
    %c1_4 = arith.constant 1 : index
    %c0_5 = arith.constant 0 : index
    %5 = vector.load %arg5[%c1, %c1_4, %c0_5] : memref<18x24x4xf32, #tpu.memory_space<vmem>>, vector<16x16x4xf32>
    tpu.vector_store %arg5[%c1, %c1_4, %c0_5], %4 {strides = array<i32>} : memref<18x24x4xf32, #tpu.memory_space<vmem>>, vector<16x16x4xf32>,
    %6 = vector.extract_strided_slice %4 {offsets = [0, 1, 0], sizes = [16, 1, 4], strides = [1, 1, 1]} : vector<16x16x4xf32> to vector<16x1x4xf32>
    %c1_6 = arith.constant 1 : index
    %c0_7 = arith.constant 0 : index
    %c0_8 = arith.constant 0 : index
    %7 = vector.load %arg5[%c1_6, %c0_7, %c0_8] : memref<18x24x4xf32, #tpu.memory_space<vmem>>, vector<16x1x4xf32>
    tpu.vector_store %arg5[%c1_6, %c0_7, %c0_8], %6 {strides = array<i32>} : memref<18x24x4xf32, #tpu.memory_space<vmem>>, vector<16x1x4xf32>,
    %8 = vector.extract_strided_slice %4 {offsets = [0, 14, 0], sizes = [16, 1, 4], strides = [1, 1, 1]} : vector<16x16x4xf32> to vector<16x1x4xf32>
    %c1_9 = arith.constant 1 : index
    %c17 = arith.constant 17 : index
    %c0_10 = arith.constant 0 : index
    %9 = vector.load %arg5[%c1_9, %c17, %c0_10] : memref<18x24x4xf32, #tpu.memory_space<vmem>>, vector<16x1x4xf32>
    tpu.vector_store %arg5[%c1_9, %c17, %c0_10], %8 {strides = array<i32>} : memref<18x24x4xf32, #tpu.memory_space<vmem>>, vector<16x1x4xf32>,
    %c2 = arith.constant 2 : index
    %c0_11 = arith.constant 0 : index
    %c0_12 = arith.constant 0 : index
    %10 = vector.load %arg5[%c2, %c0_11, %c0_12] : memref<18x24x4xf32, #tpu.memory_space<vmem>>, vector<1x24x4xf32>
    %c0_13 = arith.constant 0 : index
    %c0_14 = arith.constant 0 : index
    %c0_15 = arith.constant 0 : index
    %11 = vector.load %arg5[%c0_13, %c0_14, %c0_15] : memref<18x24x4xf32, #tpu.memory_space<vmem>>, vector<1x24x4xf32>
    tpu.vector_store %arg5[%c0_13, %c0_14, %c0_15], %10 {strides = array<i32>} : memref<18x24x4xf32, #tpu.memory_space<vmem>>, vector<1x24x4xf32>,
    %c15 = arith.constant 15 : index
    %c0_16 = arith.constant 0 : index
    %c0_17 = arith.constant 0 : index
    %12 = vector.load %arg5[%c15, %c0_16, %c0_17] : memref<18x24x4xf32, #tpu.memory_space<vmem>>, vector<1x24x4xf32>
    %c17_18 = arith.constant 17 : index
    %c0_19 = arith.constant 0 : index
    %c0_20 = arith.constant 0 : index
    %13 = vector.load %arg5[%c17_18, %c0_19, %c0_20] : memref<18x24x4xf32, #tpu.memory_space<vmem>>, vector<1x24x4xf32>
    tpu.vector_store %arg5[%c17_18, %c0_19, %c0_20], %12 {strides = array<i32>} : memref<18x24x4xf32, #tpu.memory_space<vmem>>, vector<1x24x4xf32>,
    %c0_21 = arith.constant 0 : index
    %c0_22 = arith.constant 0 : index
    %c0_23 = arith.constant 0 : index
    %14 = vector.load %arg5[%c0_21, %c0_22, %c0_23] : memref<18x24x4xf32, #tpu.memory_space<vmem>>, vector<18x16x4xf32>
    %15 = arith.truncf %14 : vector<18x16x4xf32> to vector<18x16x4xbf16>
    %16 = vector.extract_strided_slice %15 {offsets = [0, 0, 0], sizes = [16, 16, 4], strides = [1, 1, 1]} : vector<18x16x4xbf16> to vector<16x16x4xbf16>
    %17 = vector.shape_cast %16 : vector<16x16x4xbf16> to vector<256x4xbf16>
    %c0_24 = arith.constant 0 : index
    %c0_25 = arith.constant 0 : index
    %c0_26 = arith.constant 0 : index
    %c0_27 = arith.constant 0 : index
    %18 = vector.load %arg2[%c0_24, %c0_25, %c0_26, %c0_27] : memref<3x3x4x4xbf16, #tpu.memory_space<vmem>>, vector<1x1x4x4xbf16>
    %19 = vector.shape_cast %18 : vector<1x1x4x4xbf16> to vector<4x4xbf16>
    %cst = arith.constant dense<0.000000e+00> : vector<256x4xf32>
    %20 = tpu.matmul %17, %19, %cst {dimension_numbers = #tpu.dot_dimension_numbers<[1], [0], [0], [1], [0, 0, 1, 1], [], []>} : vector<256x4xbf16>, vector<4x4xbf16>, vector<256x4xf32> -> vector<256x4xf32>
    %21 = vector.extract_strided_slice %15 {offsets = [1, 0, 0], sizes = [16, 16, 4], strides = [1, 1, 1]} : vector<18x16x4xbf16> to vector<16x16x4xbf16>
    %22 = vector.shape_cast %21 : vector<16x16x4xbf16> to vector<256x4xbf16>
    %c1_28 = arith.constant 1 : index
    %c0_29 = arith.constant 0 : index
    %c0_30 = arith.constant 0 : index
    %c0_31 = arith.constant 0 : index
    %23 = vector.load %arg2[%c1_28, %c0_29, %c0_30, %c0_31] : memref<3x3x4x4xbf16, #tpu.memory_space<vmem>>, vector<1x1x4x4xbf16>
    %24 = vector.shape_cast %23 : vector<1x1x4x4xbf16> to vector<4x4xbf16>
    %cst_32 = arith.constant dense<0.000000e+00> : vector<256x4xf32>
    %25 = tpu.matmul %22, %24, %cst_32 {dimension_numbers = #tpu.dot_dimension_numbers<[1], [0], [0], [1], [0, 0, 1, 1], [], []>} : vector<256x4xbf16>, vector<4x4xbf16>, vector<256x4xf32> -> vector<256x4xf32>
    %26 = arith.addf %20, %25 : vector<256x4xf32>
    %27 = vector.extract_strided_slice %15 {offsets = [2, 0, 0], sizes = [16, 16, 4], strides = [1, 1, 1]} : vector<18x16x4xbf16> to vector<16x16x4xbf16>
    %28 = vector.shape_cast %27 : vector<16x16x4xbf16> to vector<256x4xbf16>
    %c2_33 = arith.constant 2 : index
    %c0_34 = arith.constant 0 : index
    %c0_35 = arith.constant 0 : index
    %c0_36 = arith.constant 0 : index
    %29 = vector.load %arg2[%c2_33, %c0_34, %c0_35, %c0_36] : memref<3x3x4x4xbf16, #tpu.memory_space<vmem>>, vector<1x1x4x4xbf16>
    %30 = vector.shape_cast %29 : vector<1x1x4x4xbf16> to vector<4x4xbf16>
    %cst_37 = arith.constant dense<0.000000e+00> : vector<256x4xf32>
    %31 = tpu.matmul %28, %30, %cst_37 {dimension_numbers = #tpu.dot_dimension_numbers<[1], [0], [0], [1], [0, 0, 1, 1], [], []>} : vector<256x4xbf16>, vector<4x4xbf16>, vector<256x4xf32> -> vector<256x4xf32>
    %32 = arith.addf %26, %31 : vector<256x4xf32>
    %c0_38 = arith.constant 0 : index
    %c1_39 = arith.constant 1 : index
    %c0_40 = arith.constant 0 : index
    %33 = vector.load %arg5[%c0_38, %c1_39, %c0_40] : memref<18x24x4xf32, #tpu.memory_space<vmem>>, vector<18x16x4xf32>
    %34 = arith.truncf %33 : vector<18x16x4xf32> to vector<18x16x4xbf16>
    %35 = vector.extract_strided_slice %34 {offsets = [0, 0, 0], sizes = [16, 16, 4], strides = [1, 1, 1]} : vector<18x16x4xbf16> to vector<16x16x4xbf16>
    %36 = vector.shape_cast %35 : vector<16x16x4xbf16> to vector<256x4xbf16>
    %c0_41 = arith.constant 0 : index
    %c1_42 = arith.constant 1 : index
    %c0_43 = arith.constant 0 : index
    %c0_44 = arith.constant 0 : index
    %37 = vector.load %arg2[%c0_41, %c1_42, %c0_43, %c0_44] : memref<3x3x4x4xbf16, #tpu.memory_space<vmem>>, vector<1x1x4x4xbf16>
    %38 = vector.shape_cast %37 : vector<1x1x4x4xbf16> to vector<4x4xbf16>
    %cst_45 = arith.constant dense<0.000000e+00> : vector<256x4xf32>
    %39 = tpu.matmul %36, %38, %cst_45 {dimension_numbers = #tpu.dot_dimension_numbers<[1], [0], [0], [1], [0, 0, 1, 1], [], []>} : vector<256x4xbf16>, vector<4x4xbf16>, vector<256x4xf32> -> vector<256x4xf32>
    %40 = arith.addf %32, %39 : vector<256x4xf32>
    %41 = vector.extract_strided_slice %34 {offsets = [1, 0, 0], sizes = [16, 16, 4], strides = [1, 1, 1]} : vector<18x16x4xbf16> to vector<16x16x4xbf16>
    %42 = vector.shape_cast %41 : vector<16x16x4xbf16> to vector<256x4xbf16>
    %c1_46 = arith.constant 1 : index
    %c1_47 = arith.constant 1 : index
    %c0_48 = arith.constant 0 : index
    %c0_49 = arith.constant 0 : index
    %43 = vector.load %arg2[%c1_46, %c1_47, %c0_48, %c0_49] : memref<3x3x4x4xbf16, #tpu.memory_space<vmem>>, vector<1x1x4x4xbf16>
    %44 = vector.shape_cast %43 : vector<1x1x4x4xbf16> to vector<4x4xbf16>
    %cst_50 = arith.constant dense<0.000000e+00> : vector<256x4xf32>
    %45 = tpu.matmul %42, %44, %cst_50 {dimension_numbers = #tpu.dot_dimension_numbers<[1], [0], [0], [1], [0, 0, 1, 1], [], []>} : vector<256x4xbf16>, vector<4x4xbf16>, vector<256x4xf32> -> vector<256x4xf32>
    %46 = arith.addf %40, %45 : vector<256x4xf32>
    %47 = vector.extract_strided_slice %34 {offsets = [2, 0, 0], sizes = [16, 16, 4], strides = [1, 1, 1]} : vector<18x16x4xbf16> to vector<16x16x4xbf16>
    %48 = vector.shape_cast %47 : vector<16x16x4xbf16> to vector<256x4xbf16>
    %c2_51 = arith.constant 2 : index
    %c1_52 = arith.constant 1 : index
    %c0_53 = arith.constant 0 : index
    %c0_54 = arith.constant 0 : index
    %49 = vector.load %arg2[%c2_51, %c1_52, %c0_53, %c0_54] : memref<3x3x4x4xbf16, #tpu.memory_space<vmem>>, vector<1x1x4x4xbf16>
    %50 = vector.shape_cast %49 : vector<1x1x4x4xbf16> to vector<4x4xbf16>
    %cst_55 = arith.constant dense<0.000000e+00> : vector<256x4xf32>
    %51 = tpu.matmul %48, %50, %cst_55 {dimension_numbers = #tpu.dot_dimension_numbers<[1], [0], [0], [1], [0, 0, 1, 1], [], []>} : vector<256x4xbf16>, vector<4x4xbf16>, vector<256x4xf32> -> vector<256x4xf32>
    %52 = arith.addf %46, %51 : vector<256x4xf32>
    %c0_56 = arith.constant 0 : index
    %c2_57 = arith.constant 2 : index
    %c0_58 = arith.constant 0 : index
    %53 = vector.load %arg5[%c0_56, %c2_57, %c0_58] : memref<18x24x4xf32, #tpu.memory_space<vmem>>, vector<18x16x4xf32>
    %54 = arith.truncf %53 : vector<18x16x4xf32> to vector<18x16x4xbf16>
    %55 = vector.extract_strided_slice %54 {offsets = [0, 0, 0], sizes = [16, 16, 4], strides = [1, 1, 1]} : vector<18x16x4xbf16> to vector<16x16x4xbf16>
    %56 = vector.shape_cast %55 : vector<16x16x4xbf16> to vector<256x4xbf16>
    %c0_59 = arith.constant 0 : index
    %c2_60 = arith.constant 2 : index
    %c0_61 = arith.constant 0 : index
    %c0_62 = arith.constant 0 : index
    %57 = vector.load %arg2[%c0_59, %c2_60, %c0_61, %c0_62] : memref<3x3x4x4xbf16, #tpu.memory_space<vmem>>, vector<1x1x4x4xbf16>
    %58 = vector.shape_cast %57 : vector<1x1x4x4xbf16> to vector<4x4xbf16>
    %cst_63 = arith.constant dense<0.000000e+00> : vector<256x4xf32>
    %59 = tpu.matmul %56, %58, %cst_63 {dimension_numbers = #tpu.dot_dimension_numbers<[1], [0], [0], [1], [0, 0, 1, 1], [], []>} : vector<256x4xbf16>, vector<4x4xbf16>, vector<256x4xf32> -> vector<256x4xf32>
    %60 = arith.addf %52, %59 : vector<256x4xf32>
    %61 = vector.extract_strided_slice %54 {offsets = [1, 0, 0], sizes = [16, 16, 4], strides = [1, 1, 1]} : vector<18x16x4xbf16> to vector<16x16x4xbf16>
    %62 = vector.shape_cast %61 : vector<16x16x4xbf16> to vector<256x4xbf16>
    %c1_64 = arith.constant 1 : index
    %c2_65 = arith.constant 2 : index
    %c0_66 = arith.constant 0 : index
    %c0_67 = arith.constant 0 : index
    %63 = vector.load %arg2[%c1_64, %c2_65, %c0_66, %c0_67] : memref<3x3x4x4xbf16, #tpu.memory_space<vmem>>, vector<1x1x4x4xbf16>
    %64 = vector.shape_cast %63 : vector<1x1x4x4xbf16> to vector<4x4xbf16>
    %cst_68 = arith.constant dense<0.000000e+00> : vector<256x4xf32>
    %65 = tpu.matmul %62, %64, %cst_68 {dimension_numbers = #tpu.dot_dimension_numbers<[1], [0], [0], [1], [0, 0, 1, 1], [], []>} : vector<256x4xbf16>, vector<4x4xbf16>, vector<256x4xf32> -> vector<256x4xf32>
    %66 = arith.addf %60, %65 : vector<256x4xf32>
    %67 = vector.extract_strided_slice %54 {offsets = [2, 0, 0], sizes = [16, 16, 4], strides = [1, 1, 1]} : vector<18x16x4xbf16> to vector<16x16x4xbf16>
    %68 = vector.shape_cast %67 : vector<16x16x4xbf16> to vector<256x4xbf16>
    %c2_69 = arith.constant 2 : index
    %c2_70 = arith.constant 2 : index
    %c0_71 = arith.constant 0 : index
    %c0_72 = arith.constant 0 : index
    %69 = vector.load %arg2[%c2_69, %c2_70, %c0_71, %c0_72] : memref<3x3x4x4xbf16, #tpu.memory_space<vmem>>, vector<1x1x4x4xbf16>
    %70 = vector.shape_cast %69 : vector<1x1x4x4xbf16> to vector<4x4xbf16>
    %cst_73 = arith.constant dense<0.000000e+00> : vector<256x4xf32>
    %71 = tpu.matmul %68, %70, %cst_73 {dimension_numbers = #tpu.dot_dimension_numbers<[1], [0], [0], [1], [0, 0, 1, 1], [], []>} : vector<256x4xbf16>, vector<4x4xbf16>, vector<256x4xf32> -> vector<256x4xf32>
    %72 = arith.addf %66, %71 : vector<256x4xf32>
    %73 = vector.shape_cast %72 : vector<256x4xf32> to vector<16x16x4xf32>
    %74 = vector.shape_cast %73 : vector<16x16x4xf32> to vector<256x4xf32>
    %cst_74 = arith.constant dense<0.000000e+00> : vector<4xf32>
    %75 = vector.multi_reduction <add>, %74, %cst_74 [0] : vector<256x4xf32> to vector<4xf32>
    %76 = vector.shape_cast %75 : vector<4xf32> to vector<1x4xf32>
    %cst_75 = arith.constant 2.560000e+02 : f32
    %77 = vector.broadcast %cst_75 : f32 to vector<1x4xf32>
    %78 = arith.divf %76, %77 : vector<1x4xf32>
    %79 = vector.broadcast %78 : vector<1x4xf32> to vector<256x4xf32>
    %80 = arith.subf %74, %79 : vector<256x4xf32>
    %81 = arith.mulf %80, %80 : vector<256x4xf32>
    %cst_76 = arith.constant dense<0.000000e+00> : vector<4xf32>
    %82 = vector.multi_reduction <add>, %81, %cst_76 [0] : vector<256x4xf32> to vector<4xf32>
    %83 = vector.shape_cast %82 : vector<4xf32> to vector<1x4xf32>
    %cst_77 = arith.constant 2.560000e+02 : f32
    %84 = vector.broadcast %cst_77 : f32 to vector<1x4xf32>
    %85 = arith.divf %83, %84 : vector<1x4xf32>
    %cst_78 = arith.constant 9.99999974E-6 : f32
    %86 = vector.broadcast %cst_78 : f32 to vector<1x4xf32>
    %87 = arith.addf %85, %86 : vector<1x4xf32>
    %88 = math.rsqrt %87 : vector<1x4xf32>
    %89 = vector.broadcast %88 : vector<1x4xf32> to vector<256x4xf32>
    %90 = arith.mulf %80, %89 : vector<256x4xf32>
    %91 = vector.shape_cast %90 : vector<256x4xf32> to vector<16x16x4xf32>
    %cst_79 = arith.constant 0.000000e+00 : f32
    %92 = vector.broadcast %cst_79 : f32 to vector<16x16x4xf32>
    %93 = arith.maximumf %91, %92 : vector<16x16x4xf32>
    %c1_80 = arith.constant 1 : index
    %c1_81 = arith.constant 1 : index
    %c0_82 = arith.constant 0 : index
    %94 = vector.load %arg5[%c1_80, %c1_81, %c0_82] : memref<18x24x4xf32, #tpu.memory_space<vmem>>, vector<16x16x4xf32>
    tpu.vector_store %arg5[%c1_80, %c1_81, %c0_82], %93 {strides = array<i32>} : memref<18x24x4xf32, #tpu.memory_space<vmem>>, vector<16x16x4xf32>,
    %95 = vector.extract_strided_slice %93 {offsets = [0, 1, 0], sizes = [16, 1, 4], strides = [1, 1, 1]} : vector<16x16x4xf32> to vector<16x1x4xf32>
    %c1_83 = arith.constant 1 : index
    %c0_84 = arith.constant 0 : index
    %c0_85 = arith.constant 0 : index
    %96 = vector.load %arg5[%c1_83, %c0_84, %c0_85] : memref<18x24x4xf32, #tpu.memory_space<vmem>>, vector<16x1x4xf32>
    tpu.vector_store %arg5[%c1_83, %c0_84, %c0_85], %95 {strides = array<i32>} : memref<18x24x4xf32, #tpu.memory_space<vmem>>, vector<16x1x4xf32>,
    %97 = vector.extract_strided_slice %93 {offsets = [0, 14, 0], sizes = [16, 1, 4], strides = [1, 1, 1]} : vector<16x16x4xf32> to vector<16x1x4xf32>
    %c1_86 = arith.constant 1 : index
    %c17_87 = arith.constant 17 : index
    %c0_88 = arith.constant 0 : index
    %98 = vector.load %arg5[%c1_86, %c17_87, %c0_88] : memref<18x24x4xf32, #tpu.memory_space<vmem>>, vector<16x1x4xf32>
    tpu.vector_store %arg5[%c1_86, %c17_87, %c0_88], %97 {strides = array<i32>} : memref<18x24x4xf32, #tpu.memory_space<vmem>>, vector<16x1x4xf32>,
    %c2_89 = arith.constant 2 : index
    %c0_90 = arith.constant 0 : index
    %c0_91 = arith.constant 0 : index
    %99 = vector.load %arg5[%c2_89, %c0_90, %c0_91] : memref<18x24x4xf32, #tpu.memory_space<vmem>>, vector<1x24x4xf32>
    %c0_92 = arith.constant 0 : index
    %c0_93 = arith.constant 0 : index
    %c0_94 = arith.constant 0 : index
    %100 = vector.load %arg5[%c0_92, %c0_93, %c0_94] : memref<18x24x4xf32, #tpu.memory_space<vmem>>, vector<1x24x4xf32>
    tpu.vector_store %arg5[%c0_92, %c0_93, %c0_94], %99 {strides = array<i32>} : memref<18x24x4xf32, #tpu.memory_space<vmem>>, vector<1x24x4xf32>,
    %c15_95 = arith.constant 15 : index
    %c0_96 = arith.constant 0 : index
    %c0_97 = arith.constant 0 : index
    %101 = vector.load %arg5[%c15_95, %c0_96, %c0_97] : memref<18x24x4xf32, #tpu.memory_space<vmem>>, vector<1x24x4xf32>
    %c17_98 = arith.constant 17 : index
    %c0_99 = arith.constant 0 : index
    %c0_100 = arith.constant 0 : index
    %102 = vector.load %arg5[%c17_98, %c0_99, %c0_100] : memref<18x24x4xf32, #tpu.memory_space<vmem>>, vector<1x24x4xf32>
    tpu.vector_store %arg5[%c17_98, %c0_99, %c0_100], %101 {strides = array<i32>} : memref<18x24x4xf32, #tpu.memory_space<vmem>>, vector<1x24x4xf32>,
    %c0_101 = arith.constant 0 : index
    %c0_102 = arith.constant 0 : index
    %c0_103 = arith.constant 0 : index
    %103 = vector.load %arg5[%c0_101, %c0_102, %c0_103] : memref<18x24x4xf32, #tpu.memory_space<vmem>>, vector<18x16x4xf32>
    %104 = arith.truncf %103 : vector<18x16x4xf32> to vector<18x16x4xbf16>
    %105 = vector.extract_strided_slice %104 {offsets = [0, 0, 0], sizes = [16, 16, 4], strides = [1, 1, 1]} : vector<18x16x4xbf16> to vector<16x16x4xbf16>
    %106 = vector.shape_cast %105 : vector<16x16x4xbf16> to vector<256x4xbf16>
    %c0_104 = arith.constant 0 : index
    %c0_105 = arith.constant 0 : index
    %c0_106 = arith.constant 0 : index
    %c0_107 = arith.constant 0 : index
    %107 = vector.load %arg3[%c0_104, %c0_105, %c0_106, %c0_107] : memref<3x3x4x4xbf16, #tpu.memory_space<vmem>>, vector<1x1x4x4xbf16>
    %108 = vector.shape_cast %107 : vector<1x1x4x4xbf16> to vector<4x4xbf16>
    %cst_108 = arith.constant dense<0.000000e+00> : vector<256x4xf32>
    %109 = tpu.matmul %106, %108, %cst_108 {dimension_numbers = #tpu.dot_dimension_numbers<[1], [0], [0], [1], [0, 0, 1, 1], [], []>} : vector<256x4xbf16>, vector<4x4xbf16>, vector<256x4xf32> -> vector<256x4xf32>
    %110 = vector.extract_strided_slice %104 {offsets = [1, 0, 0], sizes = [16, 16, 4], strides = [1, 1, 1]} : vector<18x16x4xbf16> to vector<16x16x4xbf16>
    %111 = vector.shape_cast %110 : vector<16x16x4xbf16> to vector<256x4xbf16>
    %c1_109 = arith.constant 1 : index
    %c0_110 = arith.constant 0 : index
    %c0_111 = arith.constant 0 : index
    %c0_112 = arith.constant 0 : index
    %112 = vector.load %arg3[%c1_109, %c0_110, %c0_111, %c0_112] : memref<3x3x4x4xbf16, #tpu.memory_space<vmem>>, vector<1x1x4x4xbf16>
    %113 = vector.shape_cast %112 : vector<1x1x4x4xbf16> to vector<4x4xbf16>
    %cst_113 = arith.constant dense<0.000000e+00> : vector<256x4xf32>
    %114 = tpu.matmul %111, %113, %cst_113 {dimension_numbers = #tpu.dot_dimension_numbers<[1], [0], [0], [1], [0, 0, 1, 1], [], []>} : vector<256x4xbf16>, vector<4x4xbf16>, vector<256x4xf32> -> vector<256x4xf32>
    %115 = arith.addf %109, %114 : vector<256x4xf32>
    %116 = vector.extract_strided_slice %104 {offsets = [2, 0, 0], sizes = [16, 16, 4], strides = [1, 1, 1]} : vector<18x16x4xbf16> to vector<16x16x4xbf16>
    %117 = vector.shape_cast %116 : vector<16x16x4xbf16> to vector<256x4xbf16>
    %c2_114 = arith.constant 2 : index
    %c0_115 = arith.constant 0 : index
    %c0_116 = arith.constant 0 : index
    %c0_117 = arith.constant 0 : index
    %118 = vector.load %arg3[%c2_114, %c0_115, %c0_116, %c0_117] : memref<3x3x4x4xbf16, #tpu.memory_space<vmem>>, vector<1x1x4x4xbf16>
    %119 = vector.shape_cast %118 : vector<1x1x4x4xbf16> to vector<4x4xbf16>
    %cst_118 = arith.constant dense<0.000000e+00> : vector<256x4xf32>
    %120 = tpu.matmul %117, %119, %cst_118 {dimension_numbers = #tpu.dot_dimension_numbers<[1], [0], [0], [1], [0, 0, 1, 1], [], []>} : vector<256x4xbf16>, vector<4x4xbf16>, vector<256x4xf32> -> vector<256x4xf32>
    %121 = arith.addf %115, %120 : vector<256x4xf32>
    %c0_119 = arith.constant 0 : index
    %c1_120 = arith.constant 1 : index
    %c0_121 = arith.constant 0 : index
    %122 = vector.load %arg5[%c0_119, %c1_120, %c0_121] : memref<18x24x4xf32, #tpu.memory_space<vmem>>, vector<18x16x4xf32>
    %123 = arith.truncf %122 : vector<18x16x4xf32> to vector<18x16x4xbf16>
    %124 = vector.extract_strided_slice %123 {offsets = [0, 0, 0], sizes = [16, 16, 4], strides = [1, 1, 1]} : vector<18x16x4xbf16> to vector<16x16x4xbf16>
    %125 = vector.shape_cast %124 : vector<16x16x4xbf16> to vector<256x4xbf16>
    %c0_122 = arith.constant 0 : index
    %c1_123 = arith.constant 1 : index
    %c0_124 = arith.constant 0 : index
    %c0_125 = arith.constant 0 : index
    %126 = vector.load %arg3[%c0_122, %c1_123, %c0_124, %c0_125] : memref<3x3x4x4xbf16, #tpu.memory_space<vmem>>, vector<1x1x4x4xbf16>
    %127 = vector.shape_cast %126 : vector<1x1x4x4xbf16> to vector<4x4xbf16>
    %cst_126 = arith.constant dense<0.000000e+00> : vector<256x4xf32>
    %128 = tpu.matmul %125, %127, %cst_126 {dimension_numbers = #tpu.dot_dimension_numbers<[1], [0], [0], [1], [0, 0, 1, 1], [], []>} : vector<256x4xbf16>, vector<4x4xbf16>, vector<256x4xf32> -> vector<256x4xf32>
    %129 = arith.addf %121, %128 : vector<256x4xf32>
    %130 = vector.extract_strided_slice %123 {offsets = [1, 0, 0], sizes = [16, 16, 4], strides = [1, 1, 1]} : vector<18x16x4xbf16> to vector<16x16x4xbf16>
    %131 = vector.shape_cast %130 : vector<16x16x4xbf16> to vector<256x4xbf16>
    %c1_127 = arith.constant 1 : index
    %c1_128 = arith.constant 1 : index
    %c0_129 = arith.constant 0 : index
    %c0_130 = arith.constant 0 : index
    %132 = vector.load %arg3[%c1_127, %c1_128, %c0_129, %c0_130] : memref<3x3x4x4xbf16, #tpu.memory_space<vmem>>, vector<1x1x4x4xbf16>
    %133 = vector.shape_cast %132 : vector<1x1x4x4xbf16> to vector<4x4xbf16>
    %cst_131 = arith.constant dense<0.000000e+00> : vector<256x4xf32>
    %134 = tpu.matmul %131, %133, %cst_131 {dimension_numbers = #tpu.dot_dimension_numbers<[1], [0], [0], [1], [0, 0, 1, 1], [], []>} : vector<256x4xbf16>, vector<4x4xbf16>, vector<256x4xf32> -> vector<256x4xf32>
    %135 = arith.addf %129, %134 : vector<256x4xf32>
    %136 = vector.extract_strided_slice %123 {offsets = [2, 0, 0], sizes = [16, 16, 4], strides = [1, 1, 1]} : vector<18x16x4xbf16> to vector<16x16x4xbf16>
    %137 = vector.shape_cast %136 : vector<16x16x4xbf16> to vector<256x4xbf16>
    %c2_132 = arith.constant 2 : index
    %c1_133 = arith.constant 1 : index
    %c0_134 = arith.constant 0 : index
    %c0_135 = arith.constant 0 : index
    %138 = vector.load %arg3[%c2_132, %c1_133, %c0_134, %c0_135] : memref<3x3x4x4xbf16, #tpu.memory_space<vmem>>, vector<1x1x4x4xbf16>
    %139 = vector.shape_cast %138 : vector<1x1x4x4xbf16> to vector<4x4xbf16>
    %cst_136 = arith.constant dense<0.000000e+00> : vector<256x4xf32>
    %140 = tpu.matmul %137, %139, %cst_136 {dimension_numbers = #tpu.dot_dimension_numbers<[1], [0], [0], [1], [0, 0, 1, 1], [], []>} : vector<256x4xbf16>, vector<4x4xbf16>, vector<256x4xf32> -> vector<256x4xf32>
    %141 = arith.addf %135, %140 : vector<256x4xf32>
    %c0_137 = arith.constant 0 : index
    %c2_138 = arith.constant 2 : index
    %c0_139 = arith.constant 0 : index
    %142 = vector.load %arg5[%c0_137, %c2_138, %c0_139] : memref<18x24x4xf32, #tpu.memory_space<vmem>>, vector<18x16x4xf32>
    %143 = arith.truncf %142 : vector<18x16x4xf32> to vector<18x16x4xbf16>
    %144 = vector.extract_strided_slice %143 {offsets = [0, 0, 0], sizes = [16, 16, 4], strides = [1, 1, 1]} : vector<18x16x4xbf16> to vector<16x16x4xbf16>
    %145 = vector.shape_cast %144 : vector<16x16x4xbf16> to vector<256x4xbf16>
    %c0_140 = arith.constant 0 : index
    %c2_141 = arith.constant 2 : index
    %c0_142 = arith.constant 0 : index
    %c0_143 = arith.constant 0 : index
    %146 = vector.load %arg3[%c0_140, %c2_141, %c0_142, %c0_143] : memref<3x3x4x4xbf16, #tpu.memory_space<vmem>>, vector<1x1x4x4xbf16>
    %147 = vector.shape_cast %146 : vector<1x1x4x4xbf16> to vector<4x4xbf16>
    %cst_144 = arith.constant dense<0.000000e+00> : vector<256x4xf32>
    %148 = tpu.matmul %145, %147, %cst_144 {dimension_numbers = #tpu.dot_dimension_numbers<[1], [0], [0], [1], [0, 0, 1, 1], [], []>} : vector<256x4xbf16>, vector<4x4xbf16>, vector<256x4xf32> -> vector<256x4xf32>
    %149 = arith.addf %141, %148 : vector<256x4xf32>
    %150 = vector.extract_strided_slice %143 {offsets = [1, 0, 0], sizes = [16, 16, 4], strides = [1, 1, 1]} : vector<18x16x4xbf16> to vector<16x16x4xbf16>
    %151 = vector.shape_cast %150 : vector<16x16x4xbf16> to vector<256x4xbf16>
    %c1_145 = arith.constant 1 : index
    %c2_146 = arith.constant 2 : index
    %c0_147 = arith.constant 0 : index
    %c0_148 = arith.constant 0 : index
    %152 = vector.load %arg3[%c1_145, %c2_146, %c0_147, %c0_148] : memref<3x3x4x4xbf16, #tpu.memory_space<vmem>>, vector<1x1x4x4xbf16>
    %153 = vector.shape_cast %152 : vector<1x1x4x4xbf16> to vector<4x4xbf16>
    %cst_149 = arith.constant dense<0.000000e+00> : vector<256x4xf32>
    %154 = tpu.matmul %151, %153, %cst_149 {dimension_numbers = #tpu.dot_dimension_numbers<[1], [0], [0], [1], [0, 0, 1, 1], [], []>} : vector<256x4xbf16>, vector<4x4xbf16>, vector<256x4xf32> -> vector<256x4xf32>
    %155 = arith.addf %149, %154 : vector<256x4xf32>
    %156 = vector.extract_strided_slice %143 {offsets = [2, 0, 0], sizes = [16, 16, 4], strides = [1, 1, 1]} : vector<18x16x4xbf16> to vector<16x16x4xbf16>
    %157 = vector.shape_cast %156 : vector<16x16x4xbf16> to vector<256x4xbf16>
    %c2_150 = arith.constant 2 : index
    %c2_151 = arith.constant 2 : index
    %c0_152 = arith.constant 0 : index
    %c0_153 = arith.constant 0 : index
    %158 = vector.load %arg3[%c2_150, %c2_151, %c0_152, %c0_153] : memref<3x3x4x4xbf16, #tpu.memory_space<vmem>>, vector<1x1x4x4xbf16>
    %159 = vector.shape_cast %158 : vector<1x1x4x4xbf16> to vector<4x4xbf16>
    %cst_154 = arith.constant dense<0.000000e+00> : vector<256x4xf32>
    %160 = tpu.matmul %157, %159, %cst_154 {dimension_numbers = #tpu.dot_dimension_numbers<[1], [0], [0], [1], [0, 0, 1, 1], [], []>} : vector<256x4xbf16>, vector<4x4xbf16>, vector<256x4xf32> -> vector<256x4xf32>
    %161 = arith.addf %155, %160 : vector<256x4xf32>
    %162 = vector.shape_cast %161 : vector<256x4xf32> to vector<16x16x4xf32>
    %163 = vector.shape_cast %162 : vector<16x16x4xf32> to vector<256x4xf32>
    %cst_155 = arith.constant dense<0.000000e+00> : vector<4xf32>
    %164 = vector.multi_reduction <add>, %163, %cst_155 [0] : vector<256x4xf32> to vector<4xf32>
    %165 = vector.shape_cast %164 : vector<4xf32> to vector<1x4xf32>
    %cst_156 = arith.constant 2.560000e+02 : f32
    %166 = vector.broadcast %cst_156 : f32 to vector<1x4xf32>
    %167 = arith.divf %165, %166 : vector<1x4xf32>
    %168 = vector.broadcast %167 : vector<1x4xf32> to vector<256x4xf32>
    %169 = arith.subf %163, %168 : vector<256x4xf32>
    %170 = arith.mulf %169, %169 : vector<256x4xf32>
    %cst_157 = arith.constant dense<0.000000e+00> : vector<4xf32>
    %171 = vector.multi_reduction <add>, %170, %cst_157 [0] : vector<256x4xf32> to vector<4xf32>
    %172 = vector.shape_cast %171 : vector<4xf32> to vector<1x4xf32>
    %cst_158 = arith.constant 2.560000e+02 : f32
    %173 = vector.broadcast %cst_158 : f32 to vector<1x4xf32>
    %174 = arith.divf %172, %173 : vector<1x4xf32>
    %cst_159 = arith.constant 9.99999974E-6 : f32
    %175 = vector.broadcast %cst_159 : f32 to vector<1x4xf32>
    %176 = arith.addf %174, %175 : vector<1x4xf32>
    %177 = math.rsqrt %176 : vector<1x4xf32>
    %178 = vector.broadcast %177 : vector<1x4xf32> to vector<256x4xf32>
    %179 = arith.mulf %169, %178 : vector<256x4xf32>
    %180 = vector.shape_cast %179 : vector<256x4xf32> to vector<16x16x4xf32>
    %c0_160 = arith.constant 0 : index
    %c0_161 = arith.constant 0 : index
    %c0_162 = arith.constant 0 : index
    %c0_163 = arith.constant 0 : index
    %181 = vector.load %arg1[%c0_160, %c0_161, %c0_162, %c0_163] : memref<1x16x16x4xf32, #tpu.memory_space<vmem>>, vector<1x16x16x4xf32>
    %182 = vector.shape_cast %181 : vector<1x16x16x4xf32> to vector<16x16x4xf32>
    %183 = arith.addf %182, %180 : vector<16x16x4xf32>
    %c0_164 = arith.constant 0 : index
    %c0_165 = arith.constant 0 : index
    %c0_166 = arith.constant 0 : index
    %c0_167 = arith.constant 0 : index
    %184 = vector.load %arg4[%c0_164, %c0_165, %c0_166, %c0_167] : memref<1x16x16x4xf32, #tpu.memory_space<vmem>>, vector<1x16x16x4xf32>
    %185 = vector.shape_cast %184 : vector<1x16x16x4xf32> to vector<16x16x4xf32>
    %186 = vector.shape_cast %183 : vector<16x16x4xf32> to vector<1x16x16x4xf32>
    tpu.vector_store %arg4[%c0_164, %c0_165, %c0_166, %c0_167], %186 {strides = array<i32>} : memref<1x16x16x4xf32, #tpu.memory_space<vmem>>, vector<1x16x16x4xf32>,
    return
  }
  func.func @transform_0(%arg0: i32) -> (i32, i32, i32, i32) {
    %c0_i32 = arith.constant 0 : i32
    %c0_i32_0 = arith.constant 0 : i32
    %c0_i32_1 = arith.constant 0 : i32
    %c0_i32_2 = arith.constant 0 : i32
    return %arg0, %c0_i32, %c0_i32_0, %c0_i32_1 : i32, i32, i32, i32
  }
  func.func @transform_1(%arg0: i32) -> (i32, i32, i32, i32) {
    %c0_i32 = arith.constant 0 : i32
    %c0_i32_0 = arith.constant 0 : i32
    %c0_i32_1 = arith.constant 0 : i32
    %c0_i32_2 = arith.constant 0 : i32
    %c0_i32_3 = arith.constant 0 : i32
    return %c0_i32, %c0_i32_0, %c0_i32_1, %c0_i32_2 : i32, i32, i32, i32
  }
  func.func @transform_2(%arg0: i32) -> (i32, i32, i32, i32) {
    %c0_i32 = arith.constant 0 : i32
    %c0_i32_0 = arith.constant 0 : i32
    %c0_i32_1 = arith.constant 0 : i32
    %c0_i32_2 = arith.constant 0 : i32
    %c0_i32_3 = arith.constant 0 : i32
    return %c0_i32, %c0_i32_0, %c0_i32_1, %c0_i32_2 : i32, i32, i32, i32
  }
  func.func @transform_3(%arg0: i32) -> (i32, i32, i32, i32) {
    %c0_i32 = arith.constant 0 : i32
    %c0_i32_0 = arith.constant 0 : i32
    %c0_i32_1 = arith.constant 0 : i32
    %c0_i32_2 = arith.constant 0 : i32
    return %arg0, %c0_i32, %c0_i32_0, %c0_i32_1 : i32, i32, i32, i32
  }
}

</mosaic_0001>

<bundles_post_ra>
// kernel: tpu_custom_call.1
= control target key start
LH: loop header
LB: loop body
LE: loop exit
PB: predicated region body
PF: predicated region fallthrough
CT: control target
= control target key end

     0   :  { %s6425_s12 = smov 0   ;;  %s9328_s0 = inlined_call_operand.vmem [shape: f32[2,16,16,4], index: 0, kind: input, shape index: {}]   ;;  %s9329_s1 = inlined_call_operand.vmem [shape: bf16[3,3,4,4], index: 1, kind: input, shape index: {}]   ;;  %s9330_s2 = inlined_call_operand.vmem [shape: bf16[3,3,4,4], index: 2, kind: input, shape index: {}]   ;;  %s9331_s3 = inlined_call_operand.vmem [shape: f32[2,16,16,4], index: 3, kind: output, shape index: {}]  }
   0x1 LB: > { %s5129_s13 = sadd.s32 4294967295, %s6402_s12   ;;  %p5133_p0 = scmp.ge.s32.totalorder %s6402_s12, 1  ;;  %s6402_s12 = sphi %s6425_s12, %s13_s12  }
   0x2   : > { %p137_p1 = scmp.lt.s32.totalorder %s6402_s12, 3 }
   0x4   : > { %p138_p2 = pnand %p5133_p0, %p137_p1 }
   0x6   : > { %141 = sbr.rel (%p138_p2) target bundleno = 1380 (0x564), region = 32 }
   0xb   : > { %p161_p3 = scmp.lt.s32.totalorder %s5129_s13, 1  ;;  %p5138_p4 = scmp.ne.s32.totalorder %s5129_s13, 0 }
   0xd   : > { %s162_s14 = scalar_select %p161_p3, %s5129_s13, 1 }
   0xe   : > { %175 = sbr.rel (%p5138_p4) target bundleno = 21 (0x15), region = 36 }
   0xf   : > { %s5445_s15 = sshll.u32 %s162_s14, 8 }
  0x10   : > { %s6436_s18 = scalar_lea.vmem %s9328_s0, %s5445_s15  ;;  %s6441_s21 = scalar_lea.vmem %s9331_s3, %s5445_s15 }
  0x13   : > { %vm176_vm0 = vcmask 29696   ;;  %v6404_v0 = vmov 0.0  }
  0x14   : > { %179 = vst.msk [vmem:[#allocation2 + $0x42] sm:$0x3f] %vm176_vm0, %v6404_v0  ;;  %192 = vst.msk [vmem:[#allocation2 + $0x17a] sm:$0x3f] %vm176_vm0, %v6404_v0 }
  0x15 PF: > { %v5139_v1 = vld [vmem:[%s9329_s1 + $0x6] sm:$0x3]  ;;  %vm415_vm1 = vcmask 1041408   ;;  %v196_v3 = vld [vmem:[%s6436_s18 + $0x8] sm:$0xff]  ;;  %vm228_vm2 = vcmask 31744   ;;  %vm261_vm3 = vcmask 25601  }
  0x16   : > { %v195_v2 = vld [vmem:[%s6436_s18] sm:$0xff]  ;;  %6365 = vmatprep.subr.msk.bf16.mxu0 %vm415_vm1, %v5139_v1  ;;  %v417_v4 = vsel %vm415_vm1, %v5139_v1, 0  ;;  %230 = vst.msk [vmem:[#allocation2 + $0x21] sm:$0xff] %vm228_vm2, %v196_v3  ;;  %vm278_vm4 = vcmask 30726   ;;  %v6455_v5 = vld [vmem:[%s9329_s1 + $0xc] sm:$0x3] }
  0x17   : > { %229 = vst.msk [vmem:[#allocation2 + $0x19] sm:$0xff] %vm228_vm2, %v195_v2  ;;  %v197_v6 = vld [vmem:[%s6436_s18 + $0x10] sm:$0xff]  ;;  %5754 = vmatpush3.bf16.msra.mxu0 %v417_v4  ;;  %v198_v7 = vld [vmem:[%s6436_s18 + $0x18] sm:$0xff]  ;;  %v364_v8 = vld [vmem:[%s9329_s1] sm:$0x3]  ;;  %v753_v37 = vsel %vm415_vm1, %v6455_v5, 0 }
  0x18   : > { %262 = vst.msk [vmem:[#allocation2 + $0x17] sm:$0x2] %vm261_vm3, %v195_v2  ;;  %263 = vst.msk [vmem:[#allocation2 + $0x2f] sm:$0x2] %vm261_vm3, %v197_v6  ;;  %v199_v9 = vld [vmem:[%s6436_s18 + $0x20] sm:$0xff]  ;;  %6367 = vmatprep.subr.msk.bf16.mxu0 %vm415_vm1, %v6455_v5  ;;  %6366 = vmatprep.subr.msk.bf16.mxu1 %vm415_vm1, %v364_v8  ;;  %v584_v10 = vsel %vm415_vm1, %v364_v8, 0 }
  0x19   : > { %279 = vst.msk [vmem:[#allocation2 + $0x23] sm:$0x40] %vm278_vm4, %v196_v3  ;;  %280 = vst.msk [vmem:[#allocation2 + $0x3b] sm:$0x40] %vm278_vm4, %v198_v7  ;;  %v200_v11 = vld [vmem:[%s6436_s18 + $0x28] sm:$0xff]  ;;  %v201_v12 = vld [vmem:[%s6436_s18 + $0x30] sm:$0xff]  ;;  %5788 = vmatpush3.bf16.msra.mxu1 %v584_v10 }
  0x1a   : > { %231 = vst.msk [vmem:[#allocation2 + $0x31] sm:$0xff] %vm228_vm2, %v197_v6  ;;  %232 = vst.msk [vmem:[#allocation2 + $0x39] sm:$0xff] %vm228_vm2, %v198_v7  ;;  %v202_v13 = vld [vmem:[%s6436_s18 + $0x38] sm:$0xff]  ;;  %v203_v14 = vld [vmem:[%s6436_s18 + $0x40] sm:$0xff] }
  0x1b   : > { %233 = vst.msk [vmem:[#allocation2 + $0x49] sm:$0xff] %vm228_vm2, %v199_v9  ;;  %234 = vst.msk [vmem:[#allocation2 + $0x51] sm:$0xff] %vm228_vm2, %v200_v11  ;;  %v204_v15 = vld [vmem:[%s6436_s18 + $0x48] sm:$0xff]  ;;  %v205_v16 = vld [vmem:[%s6436_s18 + $0x50] sm:$0xff] }
  0x1c   : > { %264 = vst.msk [vmem:[#allocation2 + $0x47] sm:$0x2] %vm261_vm3, %v199_v9  ;;  %265 = vst.msk [vmem:[#allocation2 + $0x5f] sm:$0x2] %vm261_vm3, %v201_v12  ;;  %v206_v17 = vld [vmem:[%s6436_s18 + $0x58] sm:$0xff]  ;;  %v207_v18 = vld [vmem:[%s6436_s18 + $0x60] sm:$0xff] }
  0x1d   : > { %281 = vst.msk [vmem:[#allocation2 + $0x53] sm:$0x40] %vm278_vm4, %v200_v11  ;;  %282 = vst.msk [vmem:[#allocation2 + $0x6b] sm:$0x40] %vm278_vm4, %v202_v13  ;;  %v208_v19 = vld [vmem:[%s6436_s18 + $0x68] sm:$0xff]  ;;  %v209_v20 = vld [vmem:[%s6436_s18 + $0x70] sm:$0xff] }
  0x1e   : > { %235 = vst.msk [vmem:[#allocation2 + $0x61] sm:$0xff] %vm228_vm2, %v201_v12  ;;  %236 = vst.msk [vmem:[#allocation2 + $0x69] sm:$0xff] %vm228_vm2, %v202_v13  ;;  %v210_v21 = vld [vmem:[%s6436_s18 + $0x78] sm:$0xff]  ;;  %v211_v22 = vld [vmem:[%s6436_s18 + $0x80] sm:$0xff] }
  0x1f   : > { %237 = vst.msk [vmem:[#allocation2 + $0x79] sm:$0xff] %vm228_vm2, %v203_v14  ;;  %238 = vst.msk [vmem:[#allocation2 + $0x81] sm:$0xff] %vm228_vm2, %v204_v15  ;;  %v212_v23 = vld [vmem:[%s6436_s18 + $0x88] sm:$0xff]  ;;  %v213_v24 = vld [vmem:[%s6436_s18 + $0x90] sm:$0xff] }
  0x20   : > { %266 = vst.msk [vmem:[#allocation2 + $0x77] sm:$0x2] %vm261_vm3, %v203_v14  ;;  %267 = vst.msk [vmem:[#allocation2 + $0x8f] sm:$0x2] %vm261_vm3, %v205_v16  ;;  %v214_v25 = vld [vmem:[%s6436_s18 + $0x98] sm:$0xff]  ;;  %v313_v26 = vld [vmem:[#allocation2 + $0x20] sm:$0xff] }
  0x21   : > { %283 = vst.msk [vmem:[#allocation2 + $0x83] sm:$0x40] %vm278_vm4, %v204_v15  ;;  %284 = vst.msk [vmem:[#allocation2 + $0x9b] sm:$0x40] %vm278_vm4, %v206_v17  ;;  %v215_v27 = vld [vmem:[%s6436_s18 + $0xa0] sm:$0xff]  ;;  %v216_v28 = vld [vmem:[%s6436_s18 + $0xa8] sm:$0xff] }
  0x22   : > { %239 = vst.msk [vmem:[#allocation2 + $0x91] sm:$0xff] %vm228_vm2, %v205_v16  ;;  %240 = vst.msk [vmem:[#allocation2 + $0x99] sm:$0xff] %vm228_vm2, %v206_v17  ;;  %v312_v29 = vld [vmem:[#allocation2 + $0x18] sm:$0xff]  ;;  %v314_v30 = vld [vmem:[#allocation2 + $0x30] sm:$0xff] }
  0x23   : > { %241 = vst.msk [vmem:[#allocation2 + $0xa9] sm:$0xff] %vm228_vm2, %v207_v18  ;;  %242 = vst.msk [vmem:[#allocation2 + $0xb1] sm:$0xff] %vm228_vm2, %v208_v19  ;;  %v217_v31 = vld [vmem:[%s6436_s18 + $0xb0] sm:$0xff]  ;;  %v347_v32 = vpack.c.bf16 %v313_v26, %v312_v29  ;;  %v315_v33 = vld [vmem:[#allocation2 + $0x38] sm:$0xff] }
  0x24   : > { %268 = vst.msk [vmem:[#allocation2 + $0xa7] sm:$0x2] %vm261_vm3, %v207_v18  ;;  %269 = vst.msk [vmem:[#allocation2 + $0xbf] sm:$0x2] %vm261_vm3, %v209_v20  ;;  %v316_v34 = vld [vmem:[#allocation2 + $0x48] sm:$0xff]  ;;  %v218_v35 = vld [vmem:[%s6436_s18 + $0xb8] sm:$0xff]  ;;  %v6531_v36 = vpack.c.bf16 %v315_v33, %v314_v30 }
  0x25   : > { %285 = vst.msk [vmem:[#allocation2 + $0xb3] sm:$0x40] %vm278_vm4, %v208_v19  ;;  %286 = vst.msk [vmem:[#allocation2 + $0xcb] sm:$0x40] %vm278_vm4, %v210_v21  ;;  %v317_v38 = vld [vmem:[#allocation2 + $0x50] sm:$0xff]  ;;  %5755 = vmatprep.mubr.msk.bf16.mxu0 %vm228_vm2, %v347_v32  ;;  %v318_v40 = vld [vmem:[#allocation2 + $0x60] sm:$0xff] }
  0x26   : > { %243 = vst.msk [vmem:[#allocation2 + $0xc1] sm:$0xff] %vm228_vm2, %v209_v20  ;;  %244 = vst.msk [vmem:[#allocation2 + $0xc9] sm:$0xff] %vm228_vm2, %v210_v21  ;;  %v6539_v39 = vpack.c.bf16 %v317_v38, %v316_v34  ;;  %5756 = vmatmul.mubr.msk.bf16.vlgmr.msra.gmra.mxu0 %vm228_vm2, %v6531_v36  ;;  %v319_v41 = vld [vmem:[#allocation2 + $0x68] sm:$0xff]  ;;  %v321_v43 = vld [vmem:[#allocation2 + $0x80] sm:$0xff] }
  0x27   : > { %245 = vst.msk [vmem:[#allocation2 + $0xd9] sm:$0xff] %vm228_vm2, %v211_v22  ;;  %246 = vst.msk [vmem:[#allocation2 + $0xe1] sm:$0xff] %vm228_vm2, %v212_v23  ;;  %5822 = vmatpush3.bf16.msra.mxu0 %v753_v37  ;;  %v320_v42 = vld [vmem:[#allocation2 + $0x78] sm:$0xff]  ;;  %v219_v44 = vld [vmem:[%s6436_s18 + $0xc0] sm:$0xff]  ;;  %v6546_v46 = vpack.c.bf16 %v319_v41, %v318_v40 }
  0x28   : > { %270 = vst.msk [vmem:[#allocation2 + $0xd7] sm:$0x2] %vm261_vm3, %v211_v22  ;;  %271 = vst.msk [vmem:[#allocation2 + $0xef] sm:$0x2] %vm261_vm3, %v213_v24  ;;  %5759 = vmatprep.mubr.msk.bf16.mxu0 %vm228_vm2, %v6539_v39  ;;  %v220_v47 = vld [vmem:[%s6436_s18 + $0xc8] sm:$0xff]  ;;  %v6551_v49 = vpack.c.bf16 %v321_v43, %v320_v42  ;;  %v221_v50 = vld [vmem:[%s6436_s18 + $0xd0] sm:$0xff] }
  0x29   : > { %287 = vst.msk [vmem:[#allocation2 + $0xe3] sm:$0x40] %vm278_vm4, %v212_v23  ;;  %288 = vst.msk [vmem:[#allocation2 + $0xfb] sm:$0x40] %vm278_vm4, %v214_v25  ;;  %v222_v52 = vld [vmem:[%s6436_s18 + $0xd8] sm:$0xff]  ;;  %v223_v53 = vld [vmem:[%s6436_s18 + $0xe0] sm:$0xff] }
  0x2a   : > { %247 = vst.msk [vmem:[#allocation2 + $0xf1] sm:$0xff] %vm228_vm2, %v213_v24  ;;  %248 = vst.msk [vmem:[#allocation2 + $0xf9] sm:$0xff] %vm228_vm2, %v214_v25  ;;  %v224_v54 = vld [vmem:[%s6436_s18 + $0xe8] sm:$0xff]  ;;  %v225_v55 = vld [vmem:[%s6436_s18 + $0xf0] sm:$0xff] }
  0x2b   : > { %249 = vst.msk [vmem:[#allocation2 + $0x109] sm:$0xff] %vm228_vm2, %v215_v27  ;;  %250 = vst.msk [vmem:[#allocation2 + $0x111] sm:$0xff] %vm228_vm2, %v216_v28  ;;  %v226_v56 = vld [vmem:[%s6436_s18 + $0xf8] sm:$0xff]  ;;  %v5189_v57 = vld [vmem:[%s9329_s1 + $0x2] sm:$0x3] }
  0x2c   : > { %272 = vst.msk [vmem:[#allocation2 + $0x107] sm:$0x2] %vm261_vm3, %v215_v27  ;;  %273 = vst.msk [vmem:[#allocation2 + $0x11f] sm:$0x2] %vm261_vm3, %v217_v31  ;;  %v1053_v58 = vsel %vm415_vm1, %v5189_v57, 0  ;;  %v298_v60 = vld [vmem:[#allocation2 + $0x40] sm:$0xff]  ;;  %6368 = vmatprep.subr.msk.bf16.mxu1 %vm415_vm1, %v5189_v57 }
  0x2d   : > { %289 = vst.msk [vmem:[#allocation2 + $0x113] sm:$0x40] %vm278_vm4, %v216_v28  ;;  %290 = vst.msk [vmem:[#allocation2 + $0x12b] sm:$0x40] %vm278_vm4, %v218_v35  ;;  %v6583_v59 = vld [vmem:[%s9329_s1 + $0x8] sm:$0x3] }
  0x2e   : > { %299 = vst.msk [vmem:[#allocation2] sm:$0xff] %vm228_vm2, %v314_v30  ;;  %251 = vst.msk [vmem:[#allocation2 + $0x121] sm:$0xff] %vm228_vm2, %v217_v31  ;;  %5760 = vmatmul.mubr.msk.bf16.gmra.mxu0 %vm228_vm2, %v6546_v46  ;;  %v322_v61 = vld [vmem:[#allocation2 + $0x90] sm:$0xff]  ;;  %v323_v62 = vld [vmem:[#allocation2 + $0x98] sm:$0xff]  ;;  %6369 = vmatprep.subr.msk.bf16.mxu0 %vm415_vm1, %v6583_v59  ;;  %v1254_v34 = vsel %vm415_vm1, %v6583_v59, 0 }
  0x2f   : > { %300 = vst.msk [vmem:[#allocation2 + $0x8] sm:$0xff] %vm228_vm2, %v315_v33  ;;  %252 = vst.msk [vmem:[#allocation2 + $0x129] sm:$0xff] %vm228_vm2, %v218_v35  ;;  %5763 = vmatprep.mubr.msk.bf16.mxu0 %vm228_vm2, %v6551_v49  ;;  %v324_v63 = vld [vmem:[#allocation2 + $0xa8] sm:$0xff]  ;;  %v325_v0 = vld [vmem:[#allocation2 + $0xb0] sm:$0xff]  ;;  %v6594_v1 = vpack.c.bf16 %v323_v62, %v322_v61 }
  0x30   : > { %253 = vst.msk [vmem:[#allocation2 + $0x139] sm:$0xff] %vm228_vm2, %v219_v44  ;;  %254 = vst.msk [vmem:[#allocation2 + $0x141] sm:$0xff] %vm228_vm2, %v220_v47  ;;  %v6596_v2 = vpack.c.bf16 %v325_v0, %v324_v63  ;;  %v326_v5 = vld [vmem:[#allocation2 + $0xc0] sm:$0xff]  ;;  %v327_v6 = vld [vmem:[#allocation2 + $0xc8] sm:$0xff] }
  0x31   : > { %274 = vst.msk [vmem:[#allocation2 + $0x137] sm:$0x2] %vm261_vm3, %v219_v44  ;;  %275 = vst.msk [vmem:[#allocation2 + $0x14f] sm:$0x2] %vm261_vm3, %v221_v50  ;;  %v328_v7 = vld [vmem:[#allocation2 + $0xd8] sm:$0xff]  ;;  %v329_v8 = vld [vmem:[#allocation2 + $0xe0] sm:$0xff]  ;;  %v6608_v9 = vpack.c.bf16 %v327_v6, %v326_v5 }
  0x32   : > { %291 = vst.msk [vmem:[#allocation2 + $0x143] sm:$0x40] %vm278_vm4, %v220_v47  ;;  %292 = vst.msk [vmem:[#allocation2 + $0x15b] sm:$0x40] %vm278_vm4, %v222_v52  ;;  %v5223_v10 = vld [vmem:[%s9329_s1 + $0xe] sm:$0x3]  ;;  %v6613_v11 = vpack.c.bf16 %v329_v8, %v328_v7 }
  0x33   : > { %255 = vst.msk [vmem:[#allocation2 + $0x151] sm:$0xff] %vm228_vm2, %v221_v50  ;;  %256 = vst.msk [vmem:[#allocation2 + $0x159] sm:$0xff] %vm228_vm2, %v222_v52  ;;  %v330_v12 = vld [vmem:[#allocation2 + $0xf0] sm:$0xff]  ;;  %v331_v13 = vld [vmem:[#allocation2 + $0xf8] sm:$0xff]  ;;  %v1455_v43 = vsel %vm415_vm1, %v5223_v10, 0 }
  0x34   : > { %257 = vst.msk [vmem:[#allocation2 + $0x169] sm:$0xff] %vm228_vm2, %v223_v53  ;;  %258 = vst.msk [vmem:[#allocation2 + $0x171] sm:$0xff] %vm228_vm2, %v224_v54  ;;  %v332_v14 = vld [vmem:[#allocation2 + $0x108] sm:$0xff]  ;;  %v333_v15 = vld [vmem:[#allocation2 + $0x110] sm:$0xff]  ;;  %v6624_v16 = vpack.c.bf16 %v331_v13, %v330_v12 }
  0x35   : > { %v310_v45 = vld [vmem:[#allocation2] sm:$0xff]  ;;  %276 = vst.msk [vmem:[#allocation2 + $0x167] sm:$0x2] %vm261_vm3, %v223_v53  ;;  %277 = vst.msk [vmem:[#allocation2 + $0x17f] sm:$0x2] %vm261_vm3, %v225_v55  ;;  %v6626_v17 = vpack.c.bf16 %v333_v15, %v332_v14  ;;  %v952_v40 = vld [vmem:[#allocation2 + $0x31] sm:$0xff] }
  0x36   : > { %v311_v48 = vld [vmem:[#allocation2 + $0x8] sm:$0xff]  ;;  %293 = vst.msk [vmem:[#allocation2 + $0x173] sm:$0x40] %vm278_vm4, %v224_v54  ;;  %294 = vst.msk [vmem:[#allocation2 + $0x18b] sm:$0x40] %vm278_vm4, %v226_v56  ;;  %5764 = vmatmul.mubr.msk.bf16.gmra.mxu0 %vm228_vm2, %v6594_v1  ;;  %v334_v18 = vld [vmem:[#allocation2 + $0x120] sm:$0xff] }
  0x37   : > { %v346_v51 = vpack.c.bf16 %v311_v48, %v310_v45  ;;  %259 = vst.msk [vmem:[#allocation2 + $0x181] sm:$0xff] %vm228_vm2, %v225_v55  ;;  %260 = vst.msk [vmem:[#allocation2 + $0x189] sm:$0xff] %vm228_vm2, %v226_v56  ;;  %5767 = vmatprep.mubr.msk.bf16.mxu0 %vm228_vm2, %v6596_v2  ;;  %v335_v19 = vld [vmem:[#allocation2 + $0x128] sm:$0xff]  ;;  %v337_v21 = vld [vmem:[#allocation2 + $0x140] sm:$0xff] }
  0x38   : > { %301 = vst.msk [vmem:[#allocation2 + $0x10] sm:$0xff] %vm228_vm2, %v298_v60  ;;  %v336_v20 = vld [vmem:[#allocation2 + $0x138] sm:$0xff]  ;;  %v6636_v22 = vpack.c.bf16 %v335_v19, %v334_v18  ;;  %v6678_v37 = vld [vmem:[%s9329_s1 + $0x4] sm:$0x3]  ;;  %v6697_v44 = vld [vmem:[%s9329_s1 + $0xa] sm:$0x3] }
  0x39   : > { %5789 = vmatprep.mubr.msk.bf16.mxu1 %vm228_vm2, %v346_v51  ;;  %v6638_v23 = vpack.c.bf16 %v337_v21, %v336_v20  ;;  %v951_v38 = vld [vmem:[#allocation2 + $0x21] sm:$0xff]  ;;  %v953_v41 = vld [vmem:[#allocation2 + $0x39] sm:$0xff]  ;;  %v954_v45 = vld [vmem:[#allocation2 + $0x49] sm:$0xff] }
  0x3a   : > { %5790 = vmatmul.mubr.msk.bf16.vlgmr.msra.gmra.mxu1 %vm228_vm2, %v347_v32  ;;  %v338_v24 = vld [vmem:[#allocation2 + $0x150] sm:$0xff]  ;;  %v339_v25 = vld [vmem:[#allocation2 + $0x158] sm:$0xff]  ;;  %v948_v32 = vld [vmem:[#allocation2 + $0x1] sm:$0xff]  ;;  %v6689_v42 = vpack.c.bf16 %v953_v41, %v952_v40 }
  0x3b   : > { %5793 = vmatprep.mubr.msk.bf16.mxu1 %vm228_vm2, %v6531_v36  ;;  %5856 = vmatpush3.bf16.msra.mxu1 %v1053_v58  ;;  %v341_v4 = vld [vmem:[#allocation2 + $0x170] sm:$0xff]  ;;  %v6648_v26 = vpack.c.bf16 %v339_v25, %v338_v24  ;;  %v956_v47 = vld [vmem:[#allocation2 + $0x61] sm:$0xff]  ;;  %v958_v51 = vld [vmem:[#allocation2 + $0x79] sm:$0xff]  ;;  %v1956_v25 = vsel %vm415_vm1, %v6697_v44, 0 }
  0x3c   : > { %v340_v3 = vld [vmem:[#allocation2 + $0x168] sm:$0xff]  ;;  %308 = vst.msk [vmem:[#allocation2 + $0x1a0] sm:$0xff] %vm228_vm2, %v341_v4  ;;  %6370 = vmatprep.subr.msk.bf16.mxu1 %vm415_vm1, %v5223_v10  ;;  %v960_v53 = vld [vmem:[#allocation2 + $0x91] sm:$0xff]  ;;  %v961_v54 = vld [vmem:[#allocation2 + $0x99] sm:$0xff] }
  0x3d   : > { %307 = vst.msk [vmem:[#allocation2 + $0x198] sm:$0xff] %vm228_vm2, %v340_v3  ;;  %v6650_v27 = vpack.c.bf16 %v341_v4, %v340_v3  ;;  %v305_v31 = vld [vmem:[#allocation2 + $0x178] sm:$0xff]  ;;  %v957_v48 = vld [vmem:[#allocation2 + $0x69] sm:$0xff]  ;;  %v959_v52 = vld [vmem:[#allocation2 + $0x81] sm:$0xff]  ;;  %v6721_v56 = vpack.c.bf16 %v961_v54, %v960_v53 }
  0x3e   : > { %5768 = vmatmul.mubr.msk.bf16.gmra.mxu0 %vm228_vm2, %v6608_v9  ;;  %v342_v28 = vld [vmem:[#allocation2 + $0x180] sm:$0xff]  ;;  %v343_v29 = vld [vmem:[#allocation2 + $0x188] sm:$0xff]  ;;  %309 = vst.msk [vmem:[#allocation2 + $0x1a8] sm:$0xff] %vm228_vm2, %v305_v31  ;;  %v6709_v50 = vpack.c.bf16 %v957_v48, %v956_v47  ;;  %v6719_v55 = vpack.c.bf16 %v959_v52, %v958_v51  ;;  %v963_v58 = vld [vmem:[#allocation2 + $0xb1] sm:$0xff] }
  0x3f   : > { %5771 = vmatprep.mubr.msk.bf16.mxu0 %vm228_vm2, %v6613_v11  ;;  %v6660_v30 = vpack.c.bf16 %v343_v29, %v342_v28  ;;  %v949_v33 = vld [vmem:[#allocation2 + $0x9] sm:$0xff]  ;;  %v964_v59 = vld [vmem:[#allocation2 + $0xc1] sm:$0xff]  ;;  %v966_v63 = vld [vmem:[#allocation2 + $0xd9] sm:$0xff] }
  0x40   : > { %v984_v35 = vpack.c.bf16 %v949_v33, %v948_v32  ;;  %v962_v57 = vld [vmem:[#allocation2 + $0xa9] sm:$0xff]  ;;  %v967_v0 = vld [vmem:[#allocation2 + $0xe1] sm:$0xff]  ;;  %v971_v6 = vld [vmem:[#allocation2 + $0x111] sm:$0xff] }
  0x41   : > { %v965_v60 = vld [vmem:[#allocation2 + $0xc9] sm:$0xff]  ;;  %v991_v61 = vpack.c.bf16 %v963_v58, %v962_v57  ;;  %v993_v3 = vpack.c.bf16 %v967_v0, %v966_v63  ;;  %v972_v7 = vld [vmem:[#allocation2 + $0x121] sm:$0xff]  ;;  %v974_v13 = vld [vmem:[#allocation2 + $0x139] sm:$0xff] }
  0x42   : > { %5794 = vmatmul.mubr.msk.bf16.gmra.mxu1 %vm228_vm2, %v6539_v39  ;;  %v992_v62 = vpack.c.bf16 %v965_v60, %v964_v59  ;;  %v970_v5 = vld [vmem:[#allocation2 + $0x109] sm:$0xff]  ;;  %v975_v14 = vld [vmem:[#allocation2 + $0x141] sm:$0xff]  ;;  %v976_v15 = vld [vmem:[#allocation2 + $0x151] sm:$0xff] }
  0x43   : > { %5797 = vmatprep.mubr.msk.bf16.mxu1 %vm228_vm2, %v6546_v46  ;;  %v973_v8 = vld [vmem:[#allocation2 + $0x129] sm:$0xff]  ;;  %v345_v12 = vld [vmem:[#allocation2 + $0x1a0] sm:$0xff]  ;;  %v997_v18 = vpack.c.bf16 %v975_v14, %v974_v13  ;;  %v979_v21 = vld [vmem:[#allocation2 + $0x171] sm:$0xff] }
  0x44   : > { %v996_v10 = vpack.c.bf16 %v973_v8, %v972_v7  ;;  %v978_v20 = vld [vmem:[#allocation2 + $0x169] sm:$0xff]  ;;  %v1652_v32 = vld [vmem:[#allocation2 + $0x1a] sm:$0xff]  ;;  %v1662_v58 = vld [vmem:[#allocation2 + $0x92] sm:$0xff] }
  0x45   : > { %v5274_v24 = vld [vmem:[%s9329_s1 + $0x10] sm:$0x3]  ;;  %v1650_v28 = vld [vmem:[#allocation2 + $0x2] sm:$0xff]  ;;  %v1660_v54 = vld [vmem:[#allocation2 + $0x7a] sm:$0xff] }
  0x46   : > { %5772 = vmatmul.mubr.msk.bf16.gmra.mxu0 %vm228_vm2, %v6624_v16  ;;  %v1651_v29 = vld [vmem:[#allocation2 + $0xa] sm:$0xff]  ;;  %v1653_v33 = vld [vmem:[#allocation2 + $0x22] sm:$0xff]  ;;  %v2157_v41 = vsel %vm415_vm1, %v5274_v24, 0  ;;  %v1663_v59 = vld [vmem:[#allocation2 + $0x9a] sm:$0xff] }
  0x47   : > { %5775 = vmatprep.mubr.msk.bf16.mxu0 %vm228_vm2, %v6626_v17  ;;  %v1686_v31 = vpack.c.bf16 %v1651_v29, %v1650_v28  ;;  %v1659_v47 = vld [vmem:[#allocation2 + $0x6a] sm:$0xff] }
  0x48   : > { %v1664_v8 = vld [vmem:[#allocation2 + $0xaa] sm:$0xff] }
  0x49   : > { %v1667_v13 = vld [vmem:[#allocation2 + $0xca] sm:$0xff] }
  0x4a   : > { %5798 = vmatmul.mubr.msk.bf16.gmra.mxu1 %vm228_vm2, %v6551_v49 }
  0x4b   : > { %5801 = vmatprep.mubr.msk.bf16.mxu1 %vm228_vm2, %v6594_v1 }
  0x4e   : > { %5776 = vmatmul.mubr.msk.bf16.gmra.mxu0 %vm228_vm2, %v6636_v22 }
  0x4f   : > { %5779 = vmatprep.mubr.msk.bf16.mxu0 %vm228_vm2, %v6638_v23 }
  0x52   : > { %5802 = vmatmul.mubr.msk.bf16.gmra.mxu1 %vm228_vm2, %v6596_v2 }
  0x53   : > { %5805 = vmatprep.mubr.msk.bf16.mxu1 %vm228_vm2, %v6608_v9 }
  0x56   : > { %5780 = vmatmul.mubr.msk.bf16.gmra.mxu0 %vm228_vm2, %v6648_v26 }
  0x57   : > { %5783 = vmatprep.mubr.msk.bf16.mxu0 %vm228_vm2, %v6650_v27 }
  0x5a   : > { %5806 = vmatmul.mubr.msk.bf16.gmra.mxu1 %vm228_vm2, %v6613_v11 }
  0x5b   : > { %5809 = vmatprep.mubr.msk.bf16.mxu1 %vm228_vm2, %v6624_v16 }
  0x5e   : > { %5784 = vmatmul.mubr.msk.bf16.gmra.mxu0 %vm228_vm2, %v6660_v30 }
  0x5f   : > { %5823 = vmatprep.mubr.msk.bf16.mxu0 %vm228_vm2, %v6531_v36  ;;  %v950_v36 = vld [vmem:[#allocation2 + $0x19] sm:$0xff] }
  0x62   : > { %5810 = vmatmul.mubr.msk.bf16.gmra.mxu1 %vm228_vm2, %v6626_v17 }
  0x63   : > { %5813 = vmatprep.mubr.msk.bf16.mxu1 %vm228_vm2, %v6636_v22 }
  0x66   : > { %5824 = vmatmul.mubr.msk.bf16.vlgmr.msra.gmra.mxu0 %vm228_vm2, %v6539_v39  ;;  %v6687_v39 = vpack.c.bf16 %v951_v38, %v950_v36  ;;  %v1655_v36 = vld [vmem:[#allocation2 + $0x3a] sm:$0xff]  ;;  %v1687_v38 = vpack.c.bf16 %v1653_v33, %v1652_v32 }
  0x67   : > { %5890 = vmatpush3.bf16.msra.mxu0 %v1254_v34  ;;  %5827 = vmatprep.mubr.msk.bf16.mxu0 %vm228_vm2, %v6546_v46  ;;  %v955_v46 = vld [vmem:[#allocation2 + $0x51] sm:$0xff]  ;;  %v982_v34 = vld [vmem:[#allocation2 + $0x199] sm:$0xff] }
  0x68   : > { %6371 = vmatprep.subr.msk.bf16.mxu0 %vm415_vm1, %v6678_v37 }
  0x6a   : > { %5814 = vmatmul.mubr.msk.bf16.gmra.mxu1 %vm228_vm2, %v6638_v23 }
  0x6b   : > { %5817 = vmatprep.mubr.msk.bf16.mxu1 %vm228_vm2, %v6648_v26 }
  0x6e   : > { %5828 = vmatmul.mubr.msk.bf16.gmra.mxu0 %vm228_vm2, %v6551_v49  ;;  %v6707_v49 = vpack.c.bf16 %v955_v46, %v954_v45  ;;  %v1658_v46 = vld [vmem:[#allocation2 + $0x62] sm:$0xff] }
  0x6f   : > { %5831 = vmatprep.mubr.msk.bf16.mxu0 %vm228_vm2, %v6594_v1  ;;  %v968_v1 = vld [vmem:[#allocation2 + $0xf1] sm:$0xff] }
  0x72   : > { %5818 = vmatmul.mubr.msk.bf16.gmra.mxu1 %vm228_vm2, %v6650_v27 }
  0x73   : > { %5857 = vmatprep.mubr.msk.bf16.mxu1 %vm228_vm2, %v984_v35  ;;  %v983_v35 = vld [vmem:[#allocation2 + $0x1a1] sm:$0xff] }
  0x74   : > { %v1001_v40 = vpack.c.bf16 %v983_v35, %v982_v34 }
  0x76   : > { %5832 = vmatmul.mubr.msk.bf16.gmra.mxu0 %vm228_vm2, %v6596_v2  ;;  %v969_v2 = vld [vmem:[#allocation2 + $0xf9] sm:$0xff] }
  0x77   : > { %5835 = vmatprep.mubr.msk.bf16.mxu0 %vm228_vm2, %v6608_v9  ;;  %v994_v4 = vpack.c.bf16 %v969_v2, %v968_v1  ;;  %v995_v9 = vpack.c.bf16 %v971_v6, %v970_v5  ;;  %v6830_v1 = vpack.c.bf16 %v1663_v59, %v1662_v58 }
  0x7a   : > { %5858 = vmatmul.mubr.msk.bf16.vlgmr.msra.gmra.mxu1 %vm228_vm2, %v6687_v39 }
  0x7b   : > { %5861 = vmatprep.mubr.msk.bf16.mxu1 %vm228_vm2, %v6689_v42  ;;  %5924 = vmatpush3.bf16.msra.mxu1 %v1455_v43  ;;  %v1656_v43 = vld [vmem:[#allocation2 + $0x4a] sm:$0xff] }
  0x7c   : > { %6372 = vmatprep.subr.msk.bf16.mxu1 %vm415_vm1, %v6697_v44  ;;  %v1657_v44 = vld [vmem:[#allocation2 + $0x52] sm:$0xff] }
  0x7e   : > { %5836 = vmatmul.mubr.msk.bf16.gmra.mxu0 %vm228_vm2, %v6613_v11  ;;  %v344_v11 = vld [vmem:[#allocation2 + $0x198] sm:$0xff] }
  0x7f   : > { %5839 = vmatprep.mubr.msk.bf16.mxu0 %vm228_vm2, %v6624_v16  ;;  %v977_v16 = vld [vmem:[#allocation2 + $0x159] sm:$0xff] }
  0x80   : > { %v998_v19 = vpack.c.bf16 %v977_v16, %v976_v15 }
  0x82   : > { %5862 = vmatmul.mubr.msk.bf16.gmra.mxu1 %vm228_vm2, %v6707_v49 }
  0x83   : > { %5865 = vmatprep.mubr.msk.bf16.mxu1 %vm228_vm2, %v6709_v50 }
  0x86   : > { %5840 = vmatmul.mubr.msk.bf16.gmra.mxu0 %vm228_vm2, %v6626_v17  ;;  %v363_v17 = vpack.c.bf16 %v345_v12, %v344_v11  ;;  %v1666_v12 = vld [vmem:[#allocation2 + $0xc2] sm:$0xff] }
  0x87   : > { %5843 = vmatprep.mubr.msk.bf16.mxu0 %vm228_vm2, %v6636_v22  ;;  %v999_v22 = vpack.c.bf16 %v979_v21, %v978_v20 }
  0x8a   : > { %5866 = vmatmul.mubr.msk.bf16.gmra.mxu1 %vm228_vm2, %v6719_v55 }
  0x8b   : > { %5869 = vmatprep.mubr.msk.bf16.mxu1 %vm228_vm2, %v6721_v56 }
  0x8e   : > { %5844 = vmatmul.mubr.msk.bf16.gmra.mxu0 %vm228_vm2, %v6638_v23  ;;  %v1755_v23 = vsel %vm415_vm1, %v6678_v37, 0  ;;  %v1654_v37 = vld [vmem:[#allocation2 + $0x32] sm:$0xff] }
  0x8f   : > { %5847 = vmatprep.mubr.msk.bf16.mxu0 %vm228_vm2, %v6648_v26  ;;  %v980_v26 = vld [vmem:[#allocation2 + $0x181] sm:$0xff] }
  0x92   : > { %5870 = vmatmul.mubr.msk.bf16.gmra.mxu1 %vm228_vm2, %v991_v61 }
  0x93   : > { %5873 = vmatprep.mubr.msk.bf16.mxu1 %vm228_vm2, %v992_v62 }
  0x96   : > { %5848 = vmatmul.mubr.msk.bf16.gmra.mxu0 %vm228_vm2, %v6650_v27  ;;  %v981_v27 = vld [vmem:[#allocation2 + $0x189] sm:$0xff] }
  0x97   : > { %5851 = vmatprep.mubr.msk.bf16.mxu0 %vm228_vm2, %v6660_v30  ;;  %v1000_v30 = vpack.c.bf16 %v981_v27, %v980_v26  ;;  %v1668_v26 = vld [vmem:[#allocation2 + $0xda] sm:$0xff]  ;;  %v1669_v27 = vld [vmem:[#allocation2 + $0xe2] sm:$0xff] }
  0x98   : > { %v6868_v35 = vpack.c.bf16 %v1669_v27, %v1668_v26 }
  0x9a   : > { %5874 = vmatmul.mubr.msk.bf16.gmra.mxu1 %vm228_vm2, %v993_v3 }
  0x9b   : > { %5877 = vmatprep.mubr.msk.bf16.mxu1 %vm228_vm2, %v994_v4 }
  0x9e   : > { %5852 = vmatmul.mubr.msk.bf16.gmra.mxu0 %vm228_vm2, %v363_v17 }
  0x9f   : > { %5891 = vmatprep.mubr.msk.bf16.mxu0 %vm228_vm2, %v6687_v39  ;;  %v6805_v39 = vpack.c.bf16 %v1655_v36, %v1654_v37 }
  0xa2   : > { %5878 = vmatmul.mubr.msk.bf16.gmra.mxu1 %vm228_vm2, %v995_v9 }
  0xa3   : > { %5881 = vmatprep.mubr.msk.bf16.mxu1 %vm228_vm2, %v996_v10 }
  0xa6   : > { %5892 = vmatmul.mubr.msk.bf16.vlgmr.msra.gmra.mxu0 %vm228_vm2, %v6689_v42 }
  0xa7   : > { %5958 = vmatpush3.bf16.msra.mxu0 %v1755_v23  ;;  %5895 = vmatprep.mubr.msk.bf16.mxu0 %vm228_vm2, %v6707_v49 }
  0xa8   : > { %6373 = vmatprep.subr.msk.bf16.mxu0 %vm415_vm1, %v5274_v24 }
  0xaa   : > { %5882 = vmatmul.mubr.msk.bf16.gmra.mxu1 %vm228_vm2, %v997_v18 }
  0xab   : > { %5885 = vmatprep.mubr.msk.bf16.mxu1 %vm228_vm2, %v998_v19 }
  0xae   : > { %5896 = vmatmul.mubr.msk.bf16.gmra.mxu0 %vm228_vm2, %v6709_v50 }
  0xaf   : > { %5899 = vmatprep.mubr.msk.bf16.mxu0 %vm228_vm2, %v6719_v55 }
  0xb2   : > { %5886 = vmatmul.mubr.msk.bf16.gmra.mxu1 %vm228_vm2, %v999_v22 }
  0xb3   : > { %5925 = vmatprep.mubr.msk.bf16.mxu1 %vm228_vm2, %v6689_v42 }
  0xb6   : > { %5900 = vmatmul.mubr.msk.bf16.gmra.mxu0 %vm228_vm2, %v6721_v56 }
  0xb7   : > { %5903 = vmatprep.mubr.msk.bf16.mxu0 %vm228_vm2, %v991_v61 }
  0xba   : > { %5926 = vmatmul.mubr.msk.bf16.vlgmr.msra.gmra.mxu1 %vm228_vm2, %v6707_v49  ;;  %v6812_v49 = vpack.c.bf16 %v1657_v44, %v1656_v43 }
  0xbb   : > { %5929 = vmatprep.mubr.msk.bf16.mxu1 %vm228_vm2, %v6709_v50  ;;  %5992 = vmatpush3.bf16.msra.mxu1 %v1956_v25  ;;  %v6814_v50 = vpack.c.bf16 %v1659_v47, %v1658_v46  ;;  %v1673_v46 = vld [vmem:[#allocation2 + $0x112] sm:$0xff] }
  0xbe   : > { %5904 = vmatmul.mubr.msk.bf16.gmra.mxu0 %vm228_vm2, %v992_v62 }
  0xbf   : > { %5907 = vmatprep.mubr.msk.bf16.mxu0 %vm228_vm2, %v993_v3 }
  0xc2   : > { %5930 = vmatmul.mubr.msk.bf16.gmra.mxu1 %vm228_vm2, %v6719_v55  ;;  %v1661_v55 = vld [vmem:[#allocation2 + $0x82] sm:$0xff] }
  0xc3   : > { %5933 = vmatprep.mubr.msk.bf16.mxu1 %vm228_vm2, %v6721_v56  ;;  %v6828_v63 = vpack.c.bf16 %v1661_v55, %v1660_v54 }
  0xc6   : > { %5908 = vmatmul.mubr.msk.bf16.gmra.mxu0 %vm228_vm2, %v994_v4 }
  0xc7   : > { %5911 = vmatprep.mubr.msk.bf16.mxu0 %vm228_vm2, %v995_v9 }
  0xca   : > { %5934 = vmatmul.mubr.msk.bf16.gmra.mxu1 %vm228_vm2, %v991_v61 }
  0xcb   : > { %5937 = vmatprep.mubr.msk.bf16.mxu1 %vm228_vm2, %v992_v62 }
  0xce   : > { %5912 = vmatmul.mubr.msk.bf16.gmra.mxu0 %vm228_vm2, %v996_v10 }
  0xcf   : > { %5915 = vmatprep.mubr.msk.bf16.mxu0 %vm228_vm2, %v997_v18 }
  0xd2   : > { %5938 = vmatmul.mubr.msk.bf16.gmra.mxu1 %vm228_vm2, %v993_v3 }
  0xd3   : > { %5941 = vmatprep.mubr.msk.bf16.mxu1 %vm228_vm2, %v994_v4 }
  0xd6   : > { %5916 = vmatmul.mubr.msk.bf16.gmra.mxu0 %vm228_vm2, %v998_v19 }
  0xd7   : > { %5919 = vmatprep.mubr.msk.bf16.mxu0 %vm228_vm2, %v999_v22 }
  0xda   : > { %5942 = vmatmul.mubr.msk.bf16.gmra.mxu1 %vm228_vm2, %v995_v9  ;;  %v1665_v9 = vld [vmem:[#allocation2 + $0xb2] sm:$0xff] }
  0xdb   : > { %5945 = vmatprep.mubr.msk.bf16.mxu1 %vm228_vm2, %v996_v10  ;;  %v6848_v17 = vpack.c.bf16 %v1665_v9, %v1664_v8  ;;  %v1677_v8 = vld [vmem:[#allocation2 + $0x142] sm:$0xff] }
  0xde   : > { %5920 = vmatmul.mubr.msk.bf16.gmra.mxu0 %vm228_vm2, %v1000_v30 }
  0xdf   : > { %5959 = vmatprep.mubr.msk.bf16.mxu0 %vm228_vm2, %v1686_v31  ;;  %v1671_v31 = vld [vmem:[#allocation2 + $0xfa] sm:$0xff] }
  0xe2   : > { %5946 = vmatmul.mubr.msk.bf16.gmra.mxu1 %vm228_vm2, %v997_v18 }
  0xe3   : > { %5949 = vmatprep.mubr.msk.bf16.mxu1 %vm228_vm2, %v998_v19  ;;  %v6850_v19 = vpack.c.bf16 %v1667_v13, %v1666_v12  ;;  %v1678_v12 = vld [vmem:[#allocation2 + $0x152] sm:$0xff]  ;;  %v1679_v13 = vld [vmem:[#allocation2 + $0x15a] sm:$0xff] }
  0xe6   : > { %v5757_v42 = vpop.f32.mrf.mxu0  ;;  %5960 = vmatmul.mubr.msk.bf16.vlgmr.msra.gmra.mxu0 %vm228_vm2, %v1687_v38 }
  0xe7   : > { %6026 = vmatpush3.bf16.msra.mxu0 %v2157_v41  ;;  %5963 = vmatprep.mubr.msk.bf16.mxu0 %vm228_vm2, %v6805_v39 }
  0xe8   : > { %v453_v45 = vpop.f32.mrf.mxu0 }
  0xea   : > { %5950 = vmatmul.mubr.msk.bf16.gmra.mxu1 %vm228_vm2, %v999_v22  ;;  %v5758_v48 = vpop.f32.mrf.mxu0 }
  0xeb   : > { %5953 = vmatprep.mubr.msk.bf16.mxu1 %vm228_vm2, %v1000_v30  ;;  %v1670_v30 = vld [vmem:[#allocation2 + $0xf2] sm:$0xff] }
  0xec   : > { %v456_v51 = vpop.f32.mrf.mxu0  ;;  %v6870_v36 = vpack.c.bf16 %v1671_v31, %v1670_v30  ;;  %v1680_v31 = vld [vmem:[#allocation2 + $0x16a] sm:$0xff] }
  0xee   : > { %v5761_v52 = vpop.f32.mrf.mxu0  ;;  %5964 = vmatmul.mubr.msk.bf16.gmra.mxu0 %vm228_vm2, %v6812_v49 }
  0xef   : > { %5967 = vmatprep.mubr.msk.bf16.mxu0 %vm228_vm2, %v6814_v50 }
  0xf0   : > { %v469_v57 = vpop.f32.mrf.mxu0 }
  0xf2   : > { %5954 = vmatmul.mubr.msk.bf16.gmra.mxu1 %vm228_vm2, %v1001_v40  ;;  %v5762_v62 = vpop.f32.mrf.mxu0 }
  0xf3   : > { %5993 = vmatprep.mubr.msk.bf16.mxu1 %vm228_vm2, %v1687_v38 }
  0xf4   : > { %v472_v3 = vpop.f32.mrf.mxu0 }
  0xf6   : > { %v5765_v6 = vpop.f32.mrf.mxu0  ;;  %5968 = vmatmul.mubr.msk.bf16.gmra.mxu0 %vm228_vm2, %v6828_v63 }
  0xf7   : > { %5971 = vmatprep.mubr.msk.bf16.mxu0 %vm228_vm2, %v6830_v1 }
  0xf8   : > { %v485_v11 = vpop.f32.mrf.mxu0 }
  0xfa   : > { %v5791_v53 = vpop.f32.mrf.mxu1  ;;  %5994 = vmatmul.mubr.msk.bf16.vlgmr.msra.gmra.mxu1 %vm228_vm2, %v6805_v39  ;;  %v5766_v16 = vpop.f32.mrf.mxu0 }
  0xfb   : > { %v6822_v56 = vadd.f32 %v5791_v53, %v5757_v42  ;;  %5997 = vmatprep.mubr.msk.bf16.mxu1 %vm228_vm2, %v6812_v49 }
  0xfc   : > { %v620_v60 = vpop.f32.mrf.mxu1  ;;  %v488_v21 = vpop.f32.mrf.mxu0 }
  0xfd   : > { %v6826_v61 = vadd.f32 %v620_v60, %v453_v45  ;;  %v1672_v45 = vld [vmem:[#allocation2 + $0x10a] sm:$0xff] }
  0xfe   : > { %v5792_v0 = vpop.f32.mrf.mxu1  ;;  %v5769_v24 = vpop.f32.mrf.mxu0  ;;  %5972 = vmatmul.mubr.msk.bf16.gmra.mxu0 %vm228_vm2, %v6848_v17 }
  0xff   : > { %v6832_v2 = vadd.f32 %v5792_v0, %v5758_v48  ;;  %5975 = vmatprep.mubr.msk.bf16.mxu0 %vm228_vm2, %v6850_v19 }
 0x100   : > { %v623_v4 = vpop.f32.mrf.mxu1  ;;  %v501_v29 = vpop.f32.mrf.mxu0 }
 0x101   : > { %v6834_v5 = vadd.f32 %v623_v4, %v456_v51  ;;  %v1674_v51 = vld [vmem:[#allocation2 + $0x122] sm:$0xff] }
 0x102   : > { %v5795_v7 = vpop.f32.mrf.mxu1  ;;  %5998 = vmatmul.mubr.msk.bf16.gmra.mxu1 %vm228_vm2, %v6814_v50  ;;  %v5770_v34 = vpop.f32.mrf.mxu0 }
 0x103   : > { %v6842_v10 = vadd.f32 %v5795_v7, %v5761_v52  ;;  %6001 = vmatprep.mubr.msk.bf16.mxu1 %vm228_vm2, %v6828_v63  ;;  %v1675_v52 = vld [vmem:[#allocation2 + $0x12a] sm:$0xff]  ;;  %v1676_v7 = vld [vmem:[#allocation2 + $0x13a] sm:$0xff] }
 0x104   : > { %v636_v14 = vpop.f32.mrf.mxu1  ;;  %v504_v40 = vpop.f32.mrf.mxu0  ;;  %v6890_v59 = vpack.c.bf16 %v1675_v52, %v1674_v51 }
 0x105   : > { %v6846_v15 = vadd.f32 %v636_v14, %v469_v57  ;;  %v6888_v57 = vpack.c.bf16 %v1673_v46, %v1672_v45 }
 0x106   : > { %v5796_v18 = vpop.f32.mrf.mxu1  ;;  %v5773_v43 = vpop.f32.mrf.mxu0  ;;  %5976 = vmatmul.mubr.msk.bf16.gmra.mxu0 %vm228_vm2, %v6868_v35 }
 0x107   : > { %v6852_v20 = vadd.f32 %v5796_v18, %v5762_v62  ;;  %5979 = vmatprep.mubr.msk.bf16.mxu0 %vm228_vm2, %v6870_v36 }
 0x108   : > { %v639_v22 = vpop.f32.mrf.mxu1  ;;  %v517_v48 = vpop.f32.mrf.mxu0 }
 0x109   : > { %v6854_v23 = vadd.f32 %v639_v22, %v472_v3 }
 0x10a   : > { %v5799_v25 = vpop.f32.mrf.mxu1  ;;  %6002 = vmatmul.mubr.msk.bf16.gmra.mxu1 %vm228_vm2, %v6830_v1  ;;  %v5774_v55 = vpop.f32.mrf.mxu0 }
 0x10b   : > { %v6862_v28 = vadd.f32 %v5799_v25, %v5765_v6  ;;  %6005 = vmatprep.mubr.msk.bf16.mxu1 %vm228_vm2, %v6848_v17 }
 0x10c   : > { %v652_v32 = vpop.f32.mrf.mxu1  ;;  %v6894_v62 = vpop.f32.mrf.mxu0 }
 0x10d   : > { %v6866_v33 = vadd.f32 %v652_v32, %v485_v11  ;;  %v1681_v32 = vld [vmem:[#allocation2 + $0x172] sm:$0xff] }
 0x10e   : > { %v5800_v37 = vpop.f32.mrf.mxu1  ;;  %v5777_v4 = vpop.f32.mrf.mxu0  ;;  %5980 = vmatmul.mubr.msk.bf16.gmra.mxu0 %vm228_vm2, %v6888_v57 }
 0x10f   : > { %v6872_v38 = vadd.f32 %v5800_v37, %v5766_v16  ;;  %5983 = vmatprep.mubr.msk.bf16.mxu0 %vm228_vm2, %v6890_v59 }
 0x110   : > { %v655_v41 = vpop.f32.mrf.mxu1  ;;  %v533_v11 = vpop.f32.mrf.mxu0 }
 0x111   : > { %v6874_v42 = vadd.f32 %v655_v41, %v488_v21  ;;  %v6910_v21 = vpack.c.bf16 %v1677_v8, %v1676_v7 }
 0x112   : > { %v5803_v44 = vpop.f32.mrf.mxu1  ;;  %6006 = vmatmul.mubr.msk.bf16.gmra.mxu1 %vm228_vm2, %v6850_v19  ;;  %v5778_v18 = vpop.f32.mrf.mxu0 }
 0x113   : > { %v6882_v47 = vadd.f32 %v5803_v44, %v5769_v24  ;;  %6009 = vmatprep.mubr.msk.bf16.mxu1 %vm228_vm2, %v6868_v35  ;;  %v6912_v24 = vpack.c.bf16 %v1679_v13, %v1678_v12  ;;  %v6932_v44 = vpack.c.bf16 %v1681_v32, %v1680_v31 }
 0x114   : > { %v668_v53 = vpop.f32.mrf.mxu1  ;;  %v6916_v26 = vpop.f32.mrf.mxu0 }
 0x115   : > { %v6886_v54 = vadd.f32 %v668_v53, %v501_v29  ;;  %9332 = vst [vmem:[#allocation3_spill] sm:$0xff] %v6916_v26 }
 0x116   : > { %v5804_v58 = vpop.f32.mrf.mxu1  ;;  %v5781_v29 = vpop.f32.mrf.mxu0  ;;  %5984 = vmatmul.mubr.msk.bf16.gmra.mxu0 %vm228_vm2, %v6910_v21 }
 0x117   : > { %v6892_v60 = vadd.f32 %v5804_v58, %v5770_v34  ;;  %5987 = vmatprep.mubr.msk.bf16.mxu0 %vm228_vm2, %v6912_v24 }
 0x118   : > { %v671_v0 = vpop.f32.mrf.mxu1  ;;  %v549_v37 = vpop.f32.mrf.mxu0 }
 0x119   : > { %v6896_v3 = vadd.f32 %v671_v0, %v504_v40  ;;  %v1682_v0 = vld [vmem:[#allocation2 + $0x182] sm:$0xff] }
 0x11a   : > { %v5807_v6 = vpop.f32.mrf.mxu1  ;;  %6010 = vmatmul.mubr.msk.bf16.gmra.mxu1 %vm228_vm2, %v6870_v36 }
 0x11b   : > { %v6904_v9 = vadd.f32 %v5807_v6, %v5773_v43  ;;  %6013 = vmatprep.mubr.msk.bf16.mxu1 %vm228_vm2, %v6888_v57  ;;  %v5782_v43 = vpop.f32.mrf.mxu0 }
 0x11c   : > { %v684_v14 = vpop.f32.mrf.mxu1 }
 0x11d   : > { %v6908_v16 = vadd.f32 %v684_v14, %v517_v48  ;;  %v6936_v48 = vpop.f32.mrf.mxu0 }
 0x11e   : > { %v5808_v22 = vpop.f32.mrf.mxu1  ;;  %9333 = vst [vmem:[#allocation4_spill] sm:$0xff] %v6936_v48  ;;  %5988 = vmatmul.mubr.msk.bf16.gmra.mxu0 %vm228_vm2, %v6932_v44 }
 0x11f   : > { %v6914_v25 = vadd.f32 %v5808_v22, %v5774_v55  ;;  %v5785_v52 = vpop.f32.mrf.mxu0  ;;  %6027 = vmatprep.mubr.msk.bf16.mxu0 %vm228_vm2, %v6805_v39 }
 0x120   : > { %v6918_v27 = vpop.f32.mrf.mxu1 }
 0x121   : > { %v565_v58 = vpop.f32.mrf.mxu0 }
 0x122   : > { %v5811_v30 = vpop.f32.mrf.mxu1  ;;  %6014 = vmatmul.mubr.msk.bf16.gmra.mxu1 %vm228_vm2, %v6890_v59 }
 0x123   : > { %v6926_v34 = vadd.f32 %v5811_v30, %v5777_v4  ;;  %6017 = vmatprep.mubr.msk.bf16.mxu1 %vm228_vm2, %v6910_v21  ;;  %v1683_v4 = vld [vmem:[#allocation2 + $0x18a] sm:$0xff]  ;;  %v5786_v8 = vpop.f32.mrf.mxu0 }
 0x124   : > { %v700_v40 = vpop.f32.mrf.mxu1  ;;  %v6952_v12 = vpack.c.bf16 %v1683_v4, %v1682_v0 }
 0x125   : > { %v6930_v41 = vadd.f32 %v700_v40, %v533_v11  ;;  %v6956_v14 = vpop.f32.mrf.mxu0 }
 0x126   : > { %v5812_v45 = vpop.f32.mrf.mxu1  ;;  %9335 = vst [vmem:[#allocation6_spill] sm:$0xff] %v6956_v14  ;;  %6028 = vmatmul.mubr.msk.bf16.vlgmr.msra.gmra.mxu0 %vm228_vm2, %v6812_v49 }
 0x127   : > { %v6934_v46 = vadd.f32 %v5812_v45, %v5778_v18  ;;  %v5825_v18 = vpop.f32.mrf.mxu0  ;;  %6031 = vmatprep.mubr.msk.bf16.mxu0 %vm228_vm2, %v6814_v50 }
 0x128   : > { %v6938_v51 = vpop.f32.mrf.mxu1 }
 0x129   : > { %9334 = vst [vmem:[#allocation5_spill] sm:$0xff] %v6938_v51  ;;  %v789_v31 = vpop.f32.mrf.mxu0 }
 0x12a   : > { %v5815_v53 = vpop.f32.mrf.mxu1  ;;  %6018 = vmatmul.mubr.msk.bf16.gmra.mxu1 %vm228_vm2, %v6912_v24 }
 0x12b   : > { %v6946_v55 = vadd.f32 %v5815_v53, %v5781_v29  ;;  %6021 = vmatprep.mubr.msk.bf16.mxu1 %vm228_vm2, %v6932_v44  ;;  %v918_v29 = vadd.f32 %v5825_v18, %v6822_v56 }
 0x12c   : > { %v716_v6 = vpop.f32.mrf.mxu1 }
 0x12d   : > { %v6950_v7 = vadd.f32 %v716_v6, %v549_v37  ;;  %v916_v37 = vadd.f32 %v789_v31, %v6826_v61 }
 0x12e   : > { %v5816_v11 = vpop.f32.mrf.mxu1  ;;  %6032 = vmatmul.mubr.msk.bf16.gmra.mxu0 %vm228_vm2, %v6828_v63 }
 0x12f   : > { %v6954_v13 = vadd.f32 %v5816_v11, %v5782_v43  ;;  %v5826_v43 = vpop.f32.mrf.mxu0  ;;  %6035 = vmatprep.mubr.msk.bf16.mxu0 %vm228_vm2, %v6830_v1 }
 0x130   : > { %v6958_v39 = vpop.f32.mrf.mxu1  ;;  %v919_v49 = vadd.f32 %v5826_v43, %v6832_v2 }
 0x131   : > { %9336 = vst [vmem:[#allocation7_spill] sm:$0xff] %v6958_v39  ;;  %v792_v56 = vpop.f32.mrf.mxu0 }
 0x132   : > { %v5819_v22 = vpop.f32.mrf.mxu1  ;;  %6022 = vmatmul.mubr.msk.bf16.gmra.mxu1 %vm228_vm2, %v6952_v12  ;;  %v6978_v4 = vadd.f32 %v792_v56, %v6834_v5 }
 0x133   : > { %v6967_v30 = vadd.f32 %v5819_v22, %v5785_v52  ;;  %v5829_v50 = vpop.f32.mrf.mxu0 }
 0x134   : > { %v732_v32 = vpop.f32.mrf.mxu1  ;;  %v922_v61 = vadd.f32 %v5829_v50, %v6842_v10 }
 0x135   : > { %v6970_v40 = vadd.f32 %v732_v32, %v565_v58  ;;  %v805_v2 = vpop.f32.mrf.mxu0 }
 0x136   : > { %v5820_v45 = vpop.f32.mrf.mxu1  ;;  %v920_v6 = vadd.f32 %v805_v2, %v6846_v15  ;;  %6036 = vmatmul.mubr.msk.bf16.gmra.mxu0 %vm228_vm2, %v6848_v17 }
 0x137   : > { %v6973_v53 = vadd.f32 %v5820_v45, %v5786_v8  ;;  %v5830_v5 = vpop.f32.mrf.mxu0  ;;  %6039 = vmatprep.mubr.msk.bf16.mxu0 %vm228_vm2, %v6850_v19 }
 0x138   : > { %v6975_v0 = vpop.f32.mrf.mxu1  ;;  %v923_v18 = vadd.f32 %v5830_v5, %v6852_v20 }
 0x139   : > { %9337 = vst [vmem:[#allocation8_spill] sm:$0xff] %v6975_v0  ;;  %v808_v63 = vpop.f32.mrf.mxu0 }
 0x13a   : > { %v5859_v52 = vpop.f32.mrf.mxu1  ;;  %v6994_v10 = vadd.f32 %v808_v63, %v6854_v23 }
 0x13b   : > { %v6985_v58 = vadd.f32 %v5859_v52, %v918_v29  ;;  %v5833_v1 = vpop.f32.mrf.mxu0 }
 0x13c   : > { %v1089_v8 = vpop.f32.mrf.mxu1  ;;  %v926_v15 = vadd.f32 %v5833_v1, %v6862_v28 }
 0x13d   : > { %v6988_v11 = vadd.f32 %v1089_v8, %v916_v37  ;;  %v821_v37 = vpop.f32.mrf.mxu0 }
 0x13e   : > { %v5860_v22 = vpop.f32.mrf.mxu1  ;;  %v924_v43 = vadd.f32 %v821_v37, %v6866_v33  ;;  %6040 = vmatmul.mubr.msk.bf16.gmra.mxu0 %vm228_vm2, %v6868_v35 }
 0x13f   : > { %v6991_v31 = vadd.f32 %v5860_v22, %v919_v49  ;;  %v5834_v49 = vpop.f32.mrf.mxu0  ;;  %6043 = vmatprep.mubr.msk.bf16.mxu0 %vm228_vm2, %v6870_v36 }
 0x140   : > { %v6996_v32 = vpop.f32.mrf.mxu1  ;;  %v927_v56 = vadd.f32 %v5834_v49, %v6872_v38 }
 0x141   : > { %v824_v17 = vpop.f32.mrf.mxu0 }
 0x142   : > { %v5863_v29 = vpop.f32.mrf.mxu1  ;;  %v7012_v28 = vadd.f32 %v824_v17, %v6874_v42 }
 0x143   : > { %v7003_v20 = vadd.f32 %v5863_v29, %v922_v61  ;;  %v5837_v19 = vpop.f32.mrf.mxu0 }
 0x144   : > { %v1105_v45 = vpop.f32.mrf.mxu1  ;;  %v930_v33 = vadd.f32 %v5837_v19, %v6882_v47 }
 0x145   : > { %v7006_v23 = vadd.f32 %v1105_v45, %v920_v6  ;;  %v837_v6 = vpop.f32.mrf.mxu0 }
 0x146   : > { %v5864_v50 = vpop.f32.mrf.mxu1  ;;  %v928_v8 = vadd.f32 %v837_v6, %v6886_v54  ;;  %6044 = vmatmul.mubr.msk.bf16.gmra.mxu0 %vm228_vm2, %v6888_v57 }
 0x147   : > { %v7009_v52 = vadd.f32 %v5864_v50, %v923_v18  ;;  %v5838_v18 = vpop.f32.mrf.mxu0  ;;  %6047 = vmatprep.mubr.msk.bf16.mxu0 %vm228_vm2, %v6890_v59 }
 0x148   : > { %v7014_v2 = vpop.f32.mrf.mxu1  ;;  %v931_v22 = vadd.f32 %v5838_v18, %v6892_v60 }
 0x149   : > { %v840_v35 = vpop.f32.mrf.mxu0 }
 0x14a   : > { %v5867_v61 = vpop.f32.mrf.mxu1  ;;  %v7030_v47 = vadd.f32 %v840_v35, %v6896_v3 }
 0x14b   : > { %v7021_v38 = vadd.f32 %v5867_v61, %v926_v15  ;;  %v5841_v36 = vpop.f32.mrf.mxu0 }
 0x14c   : > { %v1121_v5 = vpop.f32.mrf.mxu1  ;;  %v934_v54 = vadd.f32 %v5841_v36, %v6904_v9  ;;  %v1684_v36 = vld [vmem:[#allocation2 + $0x19a] sm:$0xff] }
 0x14d   : > { %v7024_v42 = vadd.f32 %v1121_v5, %v924_v43  ;;  %v853_v37 = vpop.f32.mrf.mxu0 }
 0x14e   : > { %v5868_v63 = vpop.f32.mrf.mxu1  ;;  %v932_v43 = vadd.f32 %v853_v37, %v6908_v16  ;;  %6048 = vmatmul.mubr.msk.bf16.gmra.mxu0 %vm228_vm2, %v6910_v21 }
 0x14f   : > { %v7027_v1 = vadd.f32 %v5868_v63, %v927_v56  ;;  %v5842_v49 = vpop.f32.mrf.mxu0  ;;  %6051 = vmatprep.mubr.msk.bf16.mxu0 %vm228_vm2, %v6912_v24 }
 0x150   : > { %v7032_v29 = vpop.f32.mrf.mxu1  ;;  %v935_v56 = vadd.f32 %v5842_v49, %v6914_v25 }
 0x151   : > { %v7047_v57 = vpop.f32.mrf.mxu0 }
 0x152   : > { %v5871_v15 = vpop.f32.mrf.mxu1  ;;  %9338 = vst [vmem:[#allocation9_spill] sm:$0xff] %v7047_v57 }
 0x153   : > { %v7039_v60 = vadd.f32 %v5871_v15, %v930_v33  ;;  %v5845_v19 = vpop.f32.mrf.mxu0 }
 0x154   : > { %v1137_v45 = vpop.f32.mrf.mxu1  ;;  %v938_v59 = vadd.f32 %v5845_v19, %v6926_v34 }
 0x155   : > { %v7042_v3 = vadd.f32 %v1137_v45, %v928_v8  ;;  %v869_v25 = vpop.f32.mrf.mxu0 }
 0x156   : > { %v5872_v50 = vpop.f32.mrf.mxu1  ;;  %v936_v61 = vadd.f32 %v869_v25, %v6930_v41  ;;  %6052 = vmatmul.mubr.msk.bf16.gmra.mxu0 %vm228_vm2, %v6932_v44 }
 0x157   : > { %v7045_v17 = vadd.f32 %v5872_v50, %v931_v22  ;;  %v5846_v5 = vpop.f32.mrf.mxu0  ;;  %6055 = vmatprep.mubr.msk.bf16.mxu0 %vm228_vm2, %v6952_v12 }
 0x158   : > { %v7049_v9 = vpop.f32.mrf.mxu1  ;;  %v939_v18 = vadd.f32 %v5846_v5, %v6934_v46 }
 0x159   : > { %v7064_v21 = vpop.f32.mrf.mxu0 }
 0x15a   : > { %v5875_v16 = vpop.f32.mrf.mxu1  ;;  %9339 = vst [vmem:[#allocation10_spill] sm:$0xff] %v7064_v21 }
 0x15b   : > { %v7056_v33 = vadd.f32 %v5875_v16, %v934_v54  ;;  %v5849_v35 = vpop.f32.mrf.mxu0  ;;  %v1685_v54 = vld [vmem:[#allocation2 + $0x1a2] sm:$0xff] }
 0x15c   : > { %v1153_v6 = vpop.f32.mrf.mxu1  ;;  %v942_v24 = vadd.f32 %v5849_v35, %v6946_v55 }
 0x15d   : > { %v7059_v8 = vadd.f32 %v1153_v6, %v932_v43  ;;  %v885_v15 = vpop.f32.mrf.mxu0 }
 0x15e   : > { %v5876_v22 = vpop.f32.mrf.mxu1  ;;  %v940_v37 = vadd.f32 %v885_v15, %v6950_v7 }
 0x15f   : > { %v7062_v63 = vadd.f32 %v5876_v22, %v935_v56  ;;  %v5850_v49 = vpop.f32.mrf.mxu0  ;;  %v1703_v56 = vpack.c.bf16 %v1685_v54, %v1684_v36 }
 0x160   : > { %v7066_v34 = vpop.f32.mrf.mxu1  ;;  %v943_v44 = vadd.f32 %v5850_v49, %v6954_v13 }
 0x161   : > { %9340 = vst [vmem:[#allocation11_spill] sm:$0xff] %v7066_v34  ;;  %v7081_v19 = vpop.f32.mrf.mxu0  ;;  %6056 = vmatmul.mubr.msk.bf16.gmra.mxu0 %vm228_vm2, %v1703_v56 }
 0x162   : > { %v5879_v41 = vpop.f32.mrf.mxu1  ;;  %9341 = vst [vmem:[#allocation12_spill] sm:$0xff] %v7081_v19 }
 0x163   : > { %v7073_v46 = vadd.f32 %v5879_v41, %v938_v59  ;;  %v5853_v16 = vpop.f32.mrf.mxu0 }
 0x164   : > { %v1169_v43 = vpop.f32.mrf.mxu1  ;;  %v946_v59 = vadd.f32 %v5853_v16, %v6967_v30 }
 0x165   : > { %v7076_v45 = vadd.f32 %v1169_v43, %v936_v61  ;;  %v901_v61 = vpop.f32.mrf.mxu0 }
 0x166   : > { %v5880_v50 = vpop.f32.mrf.mxu1  ;;  %v944_v6 = vadd.f32 %v901_v61, %v6970_v40 }
 0x167   : > { %v7079_v55 = vadd.f32 %v5880_v50, %v939_v18  ;;  %v5854_v18 = vpop.f32.mrf.mxu0 }
 0x168   : > { %v7083_v12 = vpop.f32.mrf.mxu1  ;;  %v947_v22 = vadd.f32 %v5854_v18, %v6973_v53 }
 0x169   : > { %9342 = vst [vmem:[#allocation13_spill] sm:$0xff] %v7083_v12  ;;  %v7095_v36 = vpop.f32.mrf.mxu0 }
 0x16a   : > { %v5883_v7 = vpop.f32.mrf.mxu1  ;;  %9343 = vst [vmem:[#allocation14_spill] sm:$0xff] %v7095_v36 }
 0x16b   : > { %v7087_v25 = vadd.f32 %v5883_v7, %v942_v24  ;;  %v5893_v30 = vpop.f32.mrf.mxu0 }
 0x16c   : > { %v1185_v5 = vpop.f32.mrf.mxu1  ;;  %v1419_v24 = vadd.f32 %v5893_v30, %v6985_v58 }
 0x16d   : > { %v7090_v13 = vadd.f32 %v1185_v5, %v940_v37  ;;  %v1290_v40 = vpop.f32.mrf.mxu0 }
 0x16e   : > { %v5884_v35 = vpop.f32.mrf.mxu1  ;;  %v1417_v37 = vadd.f32 %v1290_v40, %v6988_v11 }
 0x16f   : > { %v7093_v41 = vadd.f32 %v5884_v35, %v943_v44  ;;  %v5894_v53 = vpop.f32.mrf.mxu0 }
 0x170   : > { %v7097_v54 = vpop.f32.mrf.mxu1  ;;  %v1420_v44 = vadd.f32 %v5894_v53, %v6991_v31 }
 0x171   : > { %9344 = vst [vmem:[#allocation15_spill] sm:$0xff] %v7097_v54  ;;  %v7108_v7 = vpop.f32.mrf.mxu0 }
 0x172   : > { %v5887_v15 = vpop.f32.mrf.mxu1 }
 0x173   : > { %v7100_v43 = vadd.f32 %v5887_v15, %v946_v59  ;;  %v5897_v5 = vpop.f32.mrf.mxu0 }
 0x174   : > { %v1201_v49 = vpop.f32.mrf.mxu1  ;;  %v1423_v58 = vadd.f32 %v5897_v5, %v7003_v20 }
 0x175   : > { %v7103_v56 = vadd.f32 %v1201_v49, %v944_v6  ;;  %v1306_v35 = vpop.f32.mrf.mxu0 }
 0x176   : > { %v5888_v50 = vpop.f32.mrf.mxu1  ;;  %v7116_v11 = vadd.f32 %v1306_v35, %v7006_v23 }
 0x177   : > { %v7106_v16 = vadd.f32 %v5888_v50, %v947_v22  ;;  %v5898_v31 = vpop.f32.mrf.mxu0 }
 0x178   : > { %v7110_v61 = vpop.f32.mrf.mxu1  ;;  %v1424_v22 = vadd.f32 %v5898_v31, %v7009_v52 }
 0x179   : > { %9345 = vst [vmem:[#allocation16_spill] sm:$0xff] %v7110_v61  ;;  %v7123_v49 = vpop.f32.mrf.mxu0 }
 0x17a   : > { %v5927_v59 = vpop.f32.mrf.mxu1 }
 0x17b   : > { %v7113_v18 = vadd.f32 %v5927_v59, %v1419_v24  ;;  %v5901_v20 = vpop.f32.mrf.mxu0 }
 0x17c   : > { %v1491_v6 = vpop.f32.mrf.mxu1  ;;  %v1427_v24 = vadd.f32 %v5901_v20, %v7021_v38 }
 0x17d   : > { %v7118_v30 = vadd.f32 %v1491_v6, %v1417_v37  ;;  %v1322_v23 = vpop.f32.mrf.mxu0 }
 0x17e   : > { %v5928_v15 = vpop.f32.mrf.mxu1  ;;  %v7131_v37 = vadd.f32 %v1322_v23, %v7024_v42 }
 0x17f   : > { %v7121_v40 = vadd.f32 %v5928_v15, %v1420_v44  ;;  %v5902_v52 = vpop.f32.mrf.mxu0 }
 0x180   : > { %v7125_v53 = vpop.f32.mrf.mxu1  ;;  %v1428_v44 = vadd.f32 %v5902_v52, %v7027_v1 }
 0x181   : > { %v7138_v31 = vpop.f32.mrf.mxu0 }
 0x182   : > { %v5931_v50 = vpop.f32.mrf.mxu1 }
 0x183   : > { %v7128_v5 = vadd.f32 %v5931_v50, %v1423_v58  ;;  %v5905_v38 = vpop.f32.mrf.mxu0 }
 0x184   : > { %v7133_v59 = vpop.f32.mrf.mxu1  ;;  %v1431_v58 = vadd.f32 %v5905_v38, %v7039_v60 }
 0x185   : > { %v1338_v42 = vpop.f32.mrf.mxu0 }
 0x186   : > { %v5932_v35 = vpop.f32.mrf.mxu1  ;;  %v7146_v23 = vadd.f32 %v1338_v42, %v7042_v3 }
 0x187   : > { %v7136_v6 = vadd.f32 %v5932_v35, %v1424_v22  ;;  %v5906_v1 = vpop.f32.mrf.mxu0 }
 0x188   : > { %v7140_v15 = vpop.f32.mrf.mxu1  ;;  %v1432_v22 = vadd.f32 %v5906_v1, %v7045_v17 }
 0x189   : > { %v7153_v36 = vpop.f32.mrf.mxu0 }
 0x18a   : > { %v5935_v20 = vpop.f32.mrf.mxu1 }
 0x18b   : > { %v7143_v50 = vadd.f32 %v5935_v20, %v1427_v24  ;;  %v5909_v60 = vpop.f32.mrf.mxu0 }
 0x18c   : > { %v7148_v61 = vpop.f32.mrf.mxu1  ;;  %v1435_v24 = vadd.f32 %v5909_v60, %v7056_v33 }
 0x18d   : > { %v1354_v3 = vpop.f32.mrf.mxu0 }
 0x18e   : > { %v5936_v52 = vpop.f32.mrf.mxu1  ;;  %v7161_v42 = vadd.f32 %v1354_v3, %v7059_v8 }
 0x18f   : > { %v7151_v35 = vadd.f32 %v5936_v52, %v1428_v44  ;;  %v5910_v17 = vpop.f32.mrf.mxu0 }
 0x190   : > { %v7155_v0 = vpop.f32.mrf.mxu1  ;;  %9346 = vst [vmem:[#allocation17_spill] sm:$0xff] %v7161_v42  ;;  %v1436_v44 = vadd.f32 %v5910_v17, %v7062_v63 }
 0x191   : > { %v7168_v54 = vpop.f32.mrf.mxu0 }
 0x192   : > { %v5939_v38 = vpop.f32.mrf.mxu1  ;;  %9347 = vst [vmem:[#allocation18_spill] sm:$0xff] %v7168_v54 }
 0x193   : > { %v7158_v20 = vadd.f32 %v5939_v38, %v1431_v58  ;;  %v5913_v33 = vpop.f32.mrf.mxu0 }
 0x194   : > { %v7163_v14 = vpop.f32.mrf.mxu1  ;;  %v1439_v58 = vadd.f32 %v5913_v33, %v7073_v46 }
 0x195   : > { %v1370_v8 = vpop.f32.mrf.mxu0 }
 0x196   : > { %v5940_v1 = vpop.f32.mrf.mxu1  ;;  %v7176_v3 = vadd.f32 %v1370_v8, %v7076_v45 }
 0x197   : > { %v7166_v52 = vadd.f32 %v5940_v1, %v1432_v22  ;;  %v5914_v63 = vpop.f32.mrf.mxu0 }
 0x198   : > { %v7170_v19 = vpop.f32.mrf.mxu1  ;;  %9349 = vst [vmem:[#allocation20_spill] sm:$0xff] %v7176_v3  ;;  %v1440_v22 = vadd.f32 %v5914_v63, %v7079_v55 }
 0x199   : > { %9348 = vst [vmem:[#allocation19_spill] sm:$0xff] %v7170_v19  ;;  %v7183_v48 = vpop.f32.mrf.mxu0 }
 0x19a   : > { %v5943_v60 = vpop.f32.mrf.mxu1  ;;  %9351 = vst [vmem:[#allocation22_spill] sm:$0xff] %v7183_v48 }
 0x19b   : > { %v7173_v38 = vadd.f32 %v5943_v60, %v1435_v24  ;;  %v5917_v46 = vpop.f32.mrf.mxu0 }
 0x19c   : > { %v7178_v39 = vpop.f32.mrf.mxu1  ;;  %v1443_v24 = vadd.f32 %v5917_v46, %v7087_v25 }
 0x19d   : > { %9350 = vst [vmem:[#allocation21_spill] sm:$0xff] %v7178_v39  ;;  %v1386_v45 = vpop.f32.mrf.mxu0 }
 0x19e   : > { %v5944_v17 = vpop.f32.mrf.mxu1  ;;  %v7191_v8 = vadd.f32 %v1386_v45, %v7090_v13 }
 0x19f   : > { %v7181_v1 = vadd.f32 %v5944_v17, %v1436_v44  ;;  %v5918_v55 = vpop.f32.mrf.mxu0 }
 0x1a0   : > { %v7185_v12 = vpop.f32.mrf.mxu1  ;;  %9353 = vst [vmem:[#allocation24_spill] sm:$0xff] %v7191_v8  ;;  %v1444_v44 = vadd.f32 %v5918_v55, %v7093_v41 }
 0x1a1   : > { %9352 = vst [vmem:[#allocation23_spill] sm:$0xff] %v7185_v12  ;;  %v7198_v48 = vpop.f32.mrf.mxu0 }
 0x1a2   : > { %v5947_v33 = vpop.f32.mrf.mxu1  ;;  %9355 = vst [vmem:[#allocation26_spill] sm:$0xff] %v7198_v48 }
 0x1a3   : > { %v7188_v60 = vadd.f32 %v5947_v33, %v1439_v58  ;;  %v5921_v25 = vpop.f32.mrf.mxu0 }
 0x1a4   : > { %v7193_v3 = vpop.f32.mrf.mxu1  ;;  %v1447_v58 = vadd.f32 %v5921_v25, %v7100_v43 }
 0x1a5   : > { %9354 = vst [vmem:[#allocation25_spill] sm:$0xff] %v7193_v3  ;;  %v1402_v13 = vpop.f32.mrf.mxu0 }
 0x1a6   : > { %v5948_v63 = vpop.f32.mrf.mxu1  ;;  %v7206_v45 = vadd.f32 %v1402_v13, %v7103_v56 }
 0x1a7   : > { %v7196_v17 = vadd.f32 %v5948_v63, %v1440_v22  ;;  %v5922_v41 = vpop.f32.mrf.mxu0 }
 0x1a8   : > { %v7200_v21 = vpop.f32.mrf.mxu1  ;;  %9357 = vst [vmem:[#allocation28_spill] sm:$0xff] %v7206_v45  ;;  %v1448_v22 = vadd.f32 %v5922_v41, %v7106_v16 }
 0x1a9   : > { %9356 = vst [vmem:[#allocation27_spill] sm:$0xff] %v7200_v21  ;;  %v7213_v48 = vpop.f32.mrf.mxu0 }
 0x1aa   : > { %v5951_v46 = vpop.f32.mrf.mxu1  ;;  %9359 = vst [vmem:[#allocation30_spill] sm:$0xff] %v7213_v48 }
 0x1ab   : > { %v7203_v33 = vadd.f32 %v5951_v46, %v1443_v24  ;;  %v5961_v43 = vpop.f32.mrf.mxu0 }
 0x1ac   : > { %v7208_v8 = vpop.f32.mrf.mxu1  ;;  %v7218_v24 = vadd.f32 %v5961_v43, %v7113_v18 }
 0x1ad   : > { %9358 = vst [vmem:[#allocation29_spill] sm:$0xff] %v7208_v8  ;;  %v1791_v56 = vpop.f32.mrf.mxu0 }
 0x1ae   : > { %v5952_v55 = vpop.f32.mrf.mxu1  ;;  %v7223_v45 = vadd.f32 %v1791_v56, %v7118_v30 }
 0x1af   : > { %v7211_v63 = vadd.f32 %v5952_v55, %v1444_v44  ;;  %v5962_v16 = vpop.f32.mrf.mxu0 }
 0x1b0   : > { %v7215_v21 = vpop.f32.mrf.mxu1  ;;  %v7226_v44 = vadd.f32 %v5962_v16, %v7121_v40 }
 0x1b1   : > { %9360 = vst [vmem:[#allocation31_spill] sm:$0xff] %v7215_v21  ;;  %v7228_v48 = vpop.f32.mrf.mxu0 }
 0x1b2   : > { %v5955_v25 = vpop.f32.mrf.mxu1 }
 0x1b3   : > { %v1648_v46 = vadd.f32 %v5955_v25, %v1447_v58  ;;  %v5965_v8 = vpop.f32.mrf.mxu0 }
 0x1b4   : > { %v7220_v13 = vpop.f32.mrf.mxu1  ;;  %v7233_v18 = vadd.f32 %v5965_v8, %v7128_v5 }
 0x1b5   : > { %9361 = vst [vmem:[#allocation32_spill] sm:$0xff] %v7220_v13  ;;  %v7237_v43 = vpop.f32.mrf.mxu0 }
 0x1b6   : > { %v5956_v41 = vpop.f32.mrf.mxu1 }
 0x1b7   : > { %v1649_v55 = vadd.f32 %v5956_v41, %v1448_v22  ;;  %v5966_v25 = vpop.f32.mrf.mxu0 }
 0x1b8   : > { %v7230_v21 = vpop.f32.mrf.mxu1  ;;  %v7240_v56 = vadd.f32 %v5966_v25, %v7136_v6 }
 0x1b9   : > { %9362 = vst [vmem:[#allocation33_spill] sm:$0xff] %v7230_v21  ;;  %v7244_v22 = vpop.f32.mrf.mxu0 }
 0x1ba   : > { %v7235_v58 = vpop.f32.mrf.mxu1 }
 0x1bb   : > { %v5969_v41 = vpop.f32.mrf.mxu0 }
 0x1bc   : > { %v1992_v30 = vpop.f32.mrf.mxu1  ;;  %v7247_v21 = vadd.f32 %v5969_v41, %v7143_v50 }
 0x1bd   : > { %v7251_v8 = vpop.f32.mrf.mxu0 }
 0x1be   : > { %v7242_v40 = vpop.f32.mrf.mxu1 }
 0x1bf   : > { %v5970_v3 = vpop.f32.mrf.mxu0 }
 0x1c0   : > { %v1995_v16 = vpop.f32.mrf.mxu1  ;;  %v7256_v12 = vadd.f32 %v5970_v3, %v7151_v35 }
 0x1c1   : > { %v7260_v25 = vpop.f32.mrf.mxu0 }
 0x1c2   : > { %v7249_v5 = vpop.f32.mrf.mxu1 }
 0x1c3   : > { %v5973_v51 = vpop.f32.mrf.mxu0 }
 0x1c4   : > { %v7253_v13 = vpop.f32.mrf.mxu1  ;;  %v7263_v26 = vadd.f32 %v5973_v51, %v7158_v20 }
 0x1c5   : > { %v7267_v41 = vpop.f32.mrf.mxu0 }
 0x1c6   : > { %v7258_v6 = vpop.f32.mrf.mxu1  ;;  %9363 = vst [vmem:[#allocation34_spill] sm:$0xff] %v7263_v26 }
 0x1c7   : > { %v5974_v54 = vpop.f32.mrf.mxu0 }
 0x1c8   : > { %v7265_v50 = vpop.f32.mrf.mxu1  ;;  %v7270_v39 = vadd.f32 %v5974_v54, %v7166_v52 }
 0x1c9   : > { %v7274_v35 = vpop.f32.mrf.mxu0 }
 0x1ca   : > { %9364 = vst [vmem:[#allocation35_spill] sm:$0xff] %v7270_v39  ;;  %v7272_v42 = vpop.f32.mrf.mxu1  ;;  %9365 = vst [vmem:[#allocation36_spill] sm:$0xff] %v7274_v35 }
 0x1cb   : > { %v5977_v3 = vpop.f32.mrf.mxu0 }
 0x1cc   : > { %v7277_v34 = vadd.f32 %v5977_v3, %v7173_v38  ;;  %v7279_v57 = vpop.f32.mrf.mxu1 }
 0x1cd   : > { %v7281_v51 = vpop.f32.mrf.mxu0 }
 0x1ce   : > { %9366 = vst [vmem:[#allocation37_spill] sm:$0xff] %v7277_v34  ;;  %9367 = vst [vmem:[#allocation38_spill] sm:$0xff] %v7281_v51  ;;  %v7286_v19 = vpop.f32.mrf.mxu1 }
 0x1cf   : > { %v5978_v20 = vpop.f32.mrf.mxu0 }
 0x1d0   : > { %v7284_v26 = vadd.f32 %v5978_v20, %v7181_v1  ;;  %v7293_v35 = vpop.f32.mrf.mxu1 }
 0x1d1   : > { %v7288_v54 = vpop.f32.mrf.mxu0 }
 0x1d2   : > { %9368 = vst [vmem:[#allocation39_spill] sm:$0xff] %v7284_v26  ;;  %9369 = vst [vmem:[#allocation40_spill] sm:$0xff] %v7288_v54  ;;  %v7300_v51 = vpop.f32.mrf.mxu1 }
 0x1d3   : > { %v5981_v52 = vpop.f32.mrf.mxu0  ;;  %9373 = vst [vmem:[#allocation44_spill] sm:$0xff] %v7300_v51 }
 0x1d4   : > { %v7291_v39 = vadd.f32 %v5981_v52, %v7188_v60  ;;  %v7307_v54 = vpop.f32.mrf.mxu1 }
 0x1d5   : > { %v7295_v38 = vpop.f32.mrf.mxu0 }
 0x1d6   : > { %9370 = vst [vmem:[#allocation41_spill] sm:$0xff] %v7291_v39  ;;  %9371 = vst [vmem:[#allocation42_spill] sm:$0xff] %v7295_v38  ;;  %v7314_v38 = vpop.f32.mrf.mxu1 }
 0x1d7   : > { %v5982_v3 = vpop.f32.mrf.mxu0 }
 0x1d8   : > { %v7298_v34 = vadd.f32 %v5982_v3, %v7196_v17 }
 0x1d9   : > { %v7302_v1 = vpop.f32.mrf.mxu0 }
 0x1da   : > { %9372 = vst [vmem:[#allocation43_spill] sm:$0xff] %v7298_v34  ;;  %9374 = vst [vmem:[#allocation45_spill] sm:$0xff] %v7302_v1  ;;  %v7320_v1 = vpop.f32.mrf.mxu1 }
 0x1db   : > { %v5985_v20 = vpop.f32.mrf.mxu0 }
 0x1dc   : > { %v7305_v26 = vadd.f32 %v5985_v20, %v7203_v33  ;;  %v1217_v20 = vadd.f32 %v6996_v32, %v6978_v4  ;;  %v1221_v4 = vadd.f32 %v7014_v2, %v6994_v10  ;;  %v2122_v10 = vadd.f32 %v7242_v40, %v7226_v44 }
 0x1dd   : > { %v7309_v60 = vpop.f32.mrf.mxu0 }
 0x1de   : > { %9375 = vst [vmem:[#allocation46_spill] sm:$0xff] %v7305_v26  ;;  %9376 = vst [vmem:[#allocation47_spill] sm:$0xff] %v7309_v60  ;;  %v7328_v60 = vpop.f32.mrf.mxu1 }
 0x1df   : > { %v5986_v52 = vpop.f32.mrf.mxu0 }
 0x1e0   : > { %v7312_v39 = vadd.f32 %v5986_v52, %v7211_v63  ;;  %v1418_v52 = vadd.f32 %v7108_v7, %v1217_v20  ;;  %v2121_v7 = vadd.f32 %v7235_v58, %v7218_v24 }
 0x1e1   : > { %v7316_v17 = vpop.f32.mrf.mxu0 }
 0x1e2   : > { %9377 = vst [vmem:[#allocation48_spill] sm:$0xff] %v7312_v39  ;;  %9378 = vst [vmem:[#allocation49_spill] sm:$0xff] %v7316_v17  ;;  %v2119_v17 = vadd.f32 %v1992_v30, %v7223_v45 }
 0x1e3   : > { %v5989_v3 = vpop.f32.mrf.mxu0 }
 0x1e4   : > { %v7318_v34 = vadd.f32 %v5989_v3, %v1648_v46  ;;  %v1619_v46 = vadd.f32 %v7125_v53, %v1418_v52  ;;  %v7334_v3 = vpop.f32.mrf.mxu1  ;;  %v1422_v53 = vadd.f32 %v7123_v49, %v1221_v4  ;;  %v2125_v4 = vadd.f32 %v7249_v5, %v7233_v18 }
 0x1e5   : > { %v7322_v51 = vpop.f32.mrf.mxu0 }
 0x1e6   : > { %9379 = vst [vmem:[#allocation50_spill] sm:$0xff] %v7318_v34  ;;  %9380 = vst [vmem:[#allocation51_spill] sm:$0xff] %v7322_v51  ;;  %v1919_v51 = vadd.f32 %v7228_v48, %v1619_v46  ;;  %v7347_v52 = vpop.f32.mrf.mxu1 }
 0x1e7   : > { %v5990_v33 = vpop.f32.mrf.mxu0 }
 0x1e8   : > { %v7326_v26 = vadd.f32 %v5990_v33, %v1649_v55  ;;  %v1622_v55 = vadd.f32 %v7133_v59, %v7116_v11  ;;  %v2120_v33 = vadd.f32 %v1995_v16, %v1919_v51  ;;  %v1623_v11 = vadd.f32 %v7140_v15, %v1422_v53 }
 0x1e9   : > { %v7330_v63 = vpop.f32.mrf.mxu0  ;;  %v1626_v51 = vadd.f32 %v7148_v61, %v7131_v37  ;;  %v2126_v61 = vadd.f32 %v7258_v6, %v7240_v56 }
 0x1ea   : > { %v1922_v45 = vadd.f32 %v7237_v43, %v1622_v55  ;;  %v7364_v43 = vpop.f32.mrf.mxu1  ;;  %v1923_v40 = vadd.f32 %v7244_v22, %v1623_v11 }
 0x1eb   : > { %v6029_v39 = vpop.f32.mrf.mxu0 }
 0x1ec   : > { %v7352_v2 = vadd.f32 %v6029_v39, %v2121_v7  ;;  %v1926_v7 = vadd.f32 %v7251_v8, %v1626_v51 }
 0x1ed   : > { %v2193_v34 = vpop.f32.mrf.mxu0 }
 0x1ee   : > { %v7344_v20 = vadd.f32 %v2193_v34, %v2119_v17  ;;  %v2123_v34 = vadd.f32 %v7253_v13, %v1922_v45  ;;  %v2355_v15 = vsel %vm228_vm2, %v7352_v2, 0.0  ;;  %v1225_v13 = vadd.f32 %v7032_v29, %v7012_v28 }
 0x1ef   : > { %v6030_v32 = vpop.f32.mrf.mxu0  ;;  %v2127_v8 = vadd.f32 %v7279_v57, %v1926_v7  ;;  %v1630_v57 = vadd.f32 %v7163_v14, %v7146_v23  ;;  %v2130_v14 = vadd.f32 %v7286_v19, %v7256_v12  ;;  %v9382_v12 = vld [vmem:[#allocation9_spill] sm:$0xff] }
 0x1f0   : > { %v2352_v49 = vsel %vm228_vm2, %v7344_v20, 0.0  ;;  %v7360_v24 = vadd.f32 %v6030_v32, %v2122_v10  ;;  %v2124_v32 = vadd.f32 %v7265_v50, %v1923_v40  ;;  %v1426_v55 = vadd.f32 %v7138_v31, %v1225_v13 }
 0x1f1   : > { %v2196_v48 = vpop.f32.mrf.mxu0 }
 0x1f2   : > { %v7354_v30 = vadd.f32 %v2196_v48, %v2120_v33  ;;  %v2357_v22 = vsel %vm228_vm2, %v7360_v24, 0.0  ;;  %v7382_v33 = vpop.f32.mrf.mxu1  ;;  %v1627_v31 = vadd.f32 %v7155_v0, %v1426_v55  ;;  %v1229_v0 = vadd.f32 %v7049_v9, %v7030_v47 }
 0x1f3   : > { %v6033_v59 = vpop.f32.mrf.mxu0 }
 0x1f4   : > { %v2353_v58 = vsel %vm228_vm2, %v7354_v30, 0.0  ;;  %v7386_v37 = vadd.f32 %v6033_v59, %v2125_v4  ;;  %v7398_v10 = vpop.f32.mrf.mxu1  ;;  %v1927_v11 = vadd.f32 %v7260_v25, %v1627_v31  ;;  %v1430_v40 = vadd.f32 %v7153_v36, %v1229_v0  ;;  %v9389_v0 = vld [vmem:[#allocation18_spill] sm:$0xff] }
 0x1f5   : > { %v2354_v44 = vadd.f32 %v2353_v58, %v2352_v49  ;;  %v2209_v39 = vpop.f32.mrf.mxu0 }
 0x1f6   : > { %v7369_v16 = vadd.f32 %v2209_v39, %v2123_v34  ;;  %v2363_v59 = vsel %vm228_vm2, %v7386_v37, 0.0  ;;  %v2128_v39 = vadd.f32 %v7293_v35, %v1927_v11  ;;  %v7416_v13 = vpop.f32.mrf.mxu1  ;;  %v688_v35 = vadd.f32 %v6918_v27, %v6894_v62 }
 0x1f7   : > { %v2356_v17 = vadd.f32 %v2355_v15, %v2354_v44  ;;  %v6034_v46 = vpop.f32.mrf.mxu0  ;;  %v2129_v44 = vadd.f32 %v7272_v42, %v7247_v21  ;;  %v1930_v15 = vadd.f32 %v7267_v41, %v1630_v57  ;;  %v9381_v41 = vld [vmem:[#allocation19_spill] sm:$0xff] }
 0x1f8   : > { %v2359_v18 = vsel %vm228_vm2, %v7369_v16, 0.0  ;;  %v7394_v48 = vadd.f32 %v6034_v46, %v2126_v61  ;;  %v9384_v61 = vld [vmem:[#allocation11_spill] sm:$0xff] }
 0x1f9   : > { %v2358_v28 = vadd.f32 %v2357_v22, %v2356_v17  ;;  %v2212_v29 = vpop.f32.mrf.mxu0  ;;  %v1631_v17 = vadd.f32 %v9381_v41, %v1430_v40  ;;  %v2131_v46 = vadd.f32 %v7307_v54, %v1930_v15  ;;  %v7435_v22 = vpop.f32.mrf.mxu1  ;;  %v9391_v40 = vld [vmem:[#allocation35_spill] sm:$0xff] }
 0x1fa   : > { %v7390_v5 = vadd.f32 %v2212_v29, %v2124_v32  ;;  %v2365_v25 = vsel %vm228_vm2, %v7394_v48, 0.0  ;;  %v933_v32 = vadd.f32 %v9382_v12, %v688_v35  ;;  %v2134_v15 = vadd.f32 %v7314_v38, %v9391_v40 }
 0x1fb   : > { %v2360_v50 = vadd.f32 %v2359_v18, %v2358_v28  ;;  %v6037_v53 = vpop.f32.mrf.mxu0  ;;  %v9383_v28 = vld [vmem:[#allocation36_spill] sm:$0xff]  ;;  %v9385_v18 = vld [vmem:[#allocation17_spill] sm:$0xff] }
 0x1fc   : > { %v2361_v45 = vsel %vm228_vm2, %v7390_v5, 0.0  ;;  %v7420_v23 = vadd.f32 %v6037_v53, %v2129_v44  ;;  %v1931_v29 = vadd.f32 %v9383_v28, %v1631_v17  ;;  %v1233_v54 = vadd.f32 %v9384_v61, %v933_v32  ;;  %v7452_v44 = vpop.f32.mrf.mxu1  ;;  %v9394_v17 = vld [vmem:[#allocation23_spill] sm:$0xff] }
 0x1fd   : > { %v2362_v56 = vadd.f32 %v2361_v45, %v2360_v50  ;;  %v2225_v6 = vpop.f32.mrf.mxu0  ;;  %v9386_v50 = vld [vmem:[#allocation21_spill] sm:$0xff]  ;;  %v9387_v45 = vld [vmem:[#allocation34_spill] sm:$0xff] }
 0x1fe   : > { %v7403_v34 = vadd.f32 %v2225_v6, %v2127_v8  ;;  %v2371_v62 = vsel %vm228_vm2, %v7420_v23, 0.0  ;;  %v1634_v53 = vadd.f32 %v9386_v50, %v9385_v18  ;;  %v2132_v11 = vadd.f32 %v7320_v1, %v1931_v29  ;;  %v9396_v29 = vld [vmem:[#allocation40_spill] sm:$0xff]  ;;  %v9397_v18 = vld [vmem:[#allocation13_spill] sm:$0xff] }
 0x1ff   : > { %v2364_v49 = vadd.f32 %v2363_v59, %v2362_v56  ;;  %v6038_v58 = vpop.f32.mrf.mxu0  ;;  %v9388_v56 = vld [vmem:[#allocation44_spill] sm:$0xff]  ;;  %v1434_v57 = vadd.f32 %v9389_v0, %v1233_v54  ;;  %v9401_v0 = vld [vmem:[#allocation22_spill] sm:$0xff] }
 0x200   : > { %v2367_v21 = vsel %vm228_vm2, %v7403_v34, 0.0  ;;  %v7430_v4 = vadd.f32 %v6038_v58, %v2130_v14  ;;  %v2133_v6 = vadd.f32 %v9388_v56, %v9387_v45  ;;  %v9392_v14 = vld [vmem:[#allocation3_spill] sm:$0xff]  ;;  %v9400_v56 = vld [vmem:[#allocation37_spill] sm:$0xff] }
 0x201   : > { %v2366_v47 = vadd.f32 %v2365_v25, %v2364_v49  ;;  %v2228_v9 = vpop.f32.mrf.mxu0  ;;  %v9390_v49 = vld [vmem:[#allocation38_spill] sm:$0xff] }
 0x202   : > { %v7424_v42 = vadd.f32 %v2228_v9, %v2128_v39  ;;  %v2373_v59 = vsel %vm228_vm2, %v7430_v4, 0.0  ;;  %v1934_v58 = vadd.f32 %v9390_v49, %v1634_v53  ;;  %v9399_v53 = vld [vmem:[#allocation25_spill] sm:$0xff]  ;;  %v9402_v49 = vld [vmem:[#allocation42_spill] sm:$0xff] }
 0x203   : > { %v2368_v36 = vadd.f32 %v2367_v21, %v2366_v47  ;;  %v6041_v51 = vpop.f32.mrf.mxu0  ;;  %v9393_v21 = vld [vmem:[#allocation5_spill] sm:$0xff] }
 0x204   : > { %v2369_v19 = vsel %vm228_vm2, %v7424_v42, 0.0  ;;  %v7456_v47 = vadd.f32 %v6041_v51, %v2133_v6  ;;  %v704_v35 = vadd.f32 %v9393_v21, %v9392_v14  ;;  %v9395_v51 = vld [vmem:[#allocation10_spill] sm:$0xff]  ;;  %v2137_v6 = vadd.f32 %v7328_v60, %v9400_v56  ;;  %v9404_v21 = vld [vmem:[#allocation4_spill] sm:$0xff] }
 0x205   : > { %v2370_v55 = vadd.f32 %v2369_v19, %v2368_v36  ;;  %v2241_v7 = vpop.f32.mrf.mxu0  ;;  %v2135_v19 = vadd.f32 %v7334_v3, %v1934_v58  ;;  %v9398_v3 = vld [vmem:[#allocation20_spill] sm:$0xff] }
 0x206   : > { %v7440_v27 = vadd.f32 %v2241_v7, %v2131_v46  ;;  %v1635_v46 = vadd.f32 %v9394_v17, %v1434_v57  ;;  %v937_v32 = vadd.f32 %v9395_v51, %v704_v35  ;;  %v2379_v61 = vsel %vm228_vm2, %v7456_v47, 0.0  ;;  %v9405_v35 = vld [vmem:[#allocation7_spill] sm:$0xff] }
 0x207   : > { %v2372_v31 = vadd.f32 %v2371_v62, %v2370_v55  ;;  %v6042_v8 = vpop.f32.mrf.mxu0  ;;  %v2088_v55 = vpop.f32.mrf.mxu1 }
 0x208   : > { %v2375_v9 = vsel %vm228_vm2, %v7440_v27, 0.0  ;;  %v7466_v12 = vadd.f32 %v6042_v8, %v2134_v15  ;;  %v1935_v62 = vadd.f32 %v9396_v29, %v1635_v46  ;;  %v1237_v50 = vadd.f32 %v9397_v18, %v937_v32  ;;  %v9403_v15 = vld [vmem:[#allocation39_spill] sm:$0xff] }
 0x209   : > { %v2374_v39 = vadd.f32 %v2373_v59, %v2372_v31  ;;  %v2244_v25 = vpop.f32.mrf.mxu0  ;;  %v1638_v31 = vadd.f32 %v9399_v53, %v9398_v3  ;;  %v9409_v53 = vld [vmem:[#allocation15_spill] sm:$0xff] }
 0x20a   : > { %v7460_v1 = vadd.f32 %v2244_v25, %v2132_v11  ;;  %v2136_v11 = vadd.f32 %v7364_v43, %v1935_v62  ;;  %v2381_v59 = vsel %vm228_vm2, %v7466_v12, 0.0  ;;  %v1438_v57 = vadd.f32 %v9401_v0, %v1237_v50 }
 0x20b   : > { %v2376_v36 = vadd.f32 %v2375_v9, %v2374_v39  ;;  %v6045_v41 = vpop.f32.mrf.mxu0  ;;  %v1938_v58 = vadd.f32 %v9402_v49, %v1638_v31  ;;  %v7486_v39 = vpop.f32.mrf.mxu1  ;;  %v2138_v9 = vadd.f32 %v7347_v52, %v9403_v15  ;;  %v9413_v49 = vld [vmem:[#allocation26_spill] sm:$0xff] }
 0x20c   : > { %v2377_v38 = vsel %vm228_vm2, %v7460_v1, 0.0  ;;  %v7490_v14 = vadd.f32 %v6045_v41, %v2137_v6  ;;  %v9407_v41 = vld [vmem:[#allocation12_spill] sm:$0xff] }
 0x20d   : > { %v2378_v7 = vadd.f32 %v2377_v38, %v2376_v36  ;;  %v2257_v28 = vpop.f32.mrf.mxu0  ;;  %v720_v36 = vadd.f32 %v9405_v35, %v9404_v21  ;;  %v2139_v51 = vadd.f32 %v7398_v10, %v1938_v58  ;;  %v9410_v10 = vld [vmem:[#allocation24_spill] sm:$0xff]  ;;  %v9415_v21 = vld [vmem:[#allocation43_spill] sm:$0xff] }
 0x20e   : > { %v7474_v54 = vadd.f32 %v2257_v28, %v2135_v19  ;;  %v9406_v19 = vld [vmem:[#allocation27_spill] sm:$0xff]  ;;  %v2091_v28 = vpop.f32.mrf.mxu1  ;;  %v2387_v50 = vsel %vm228_vm2, %v7490_v14, 0.0  ;;  %v2142_v35 = vadd.f32 %v7416_v13, %v9415_v21 }
 0x20f   : > { %v2380_v8 = vadd.f32 %v2379_v61, %v2378_v7  ;;  %v6046_v45 = vpop.f32.mrf.mxu0  ;;  %v1639_v38 = vadd.f32 %v9406_v19, %v1438_v57  ;;  %v941_v7 = vadd.f32 %v9407_v41, %v720_v36  ;;  %v9408_v61 = vld [vmem:[#allocation45_spill] sm:$0xff]  ;;  %v9417_v19 = vld [vmem:[#allocation8_spill] sm:$0xff]  ;;  %v9418_v41 = vld [vmem:[#allocation31_spill] sm:$0xff] }
 0x210   : > { %v2383_v60 = vsel %vm228_vm2, %v7474_v54, 0.0  ;;  %v7500_v32 = vadd.f32 %v6046_v45, %v2138_v9  ;;  %v6023_v15 = vpop.f32.mrf.mxu1  ;;  %v9426_v21 = vld [vmem:[#allocation51_spill] sm:$0xff] }
 0x211   : > { %v2382_v25 = vadd.f32 %v2381_v59, %v2380_v8  ;;  %v2260_v40 = vpop.f32.mrf.mxu0  ;;  %v1939_v18 = vadd.f32 %v9408_v61, %v1639_v38  ;;  %v1241_v31 = vadd.f32 %v9409_v53, %v941_v7  ;;  %v9411_v8 = vld [vmem:[#allocation29_spill] sm:$0xff] }
 0x212   : > { %v7494_v43 = vadd.f32 %v2260_v40, %v2136_v11  ;;  %v1642_v45 = vadd.f32 %v9411_v8, %v9410_v10  ;;  %v9412_v11 = vld [vmem:[#allocation41_spill] sm:$0xff]  ;;  %v2389_v57 = vsel %vm228_vm2, %v7500_v32, 0.0 }
 0x213   : > { %v2384_v17 = vadd.f32 %v2383_v60, %v2382_v25  ;;  %v6049_v46 = vpop.f32.mrf.mxu0  ;;  %v2141_v59 = vadd.f32 %v7382_v33, %v9412_v11  ;;  %v2140_v0 = vadd.f32 %v7435_v22, %v1939_v18  ;;  %v1442_v58 = vadd.f32 %v9413_v49, %v1241_v31  ;;  %v9414_v25 = vld [vmem:[#allocation47_spill] sm:$0xff]  ;;  %v9416_v22 = vld [vmem:[#allocation6_spill] sm:$0xff]  ;;  %v2104_v18 = vpop.f32.mrf.mxu1  ;;  %v9420_v31 = vld [vmem:[#allocation49_spill] sm:$0xff] }
 0x214   : > { %v2385_v52 = vsel %vm228_vm2, %v7494_v43, 0.0  ;;  %v1942_v40 = vadd.f32 %v9414_v25, %v1642_v45  ;;  %v736_v38 = vadd.f32 %v9417_v19, %v9416_v22  ;;  %v9424_v49 = vld [vmem:[#allocation46_spill] sm:$0xff] }
 0x215   : > { %v2386_v29 = vadd.f32 %v2385_v52, %v2384_v17  ;;  %v2273_v62 = vpop.f32.mrf.mxu0  ;;  %v7522_v36 = vadd.f32 %v6049_v46, %v2141_v59  ;;  %v1643_v7 = vadd.f32 %v9418_v41, %v1442_v58  ;;  %v9419_v46 = vld [vmem:[#allocation14_spill] sm:$0xff]  ;;  %v2145_v58 = vadd.f32 %v7452_v44, %v9424_v49 }
 0x216   : > { %v7508_v3 = vadd.f32 %v2273_v62, %v2139_v51  ;;  %v945_v61 = vadd.f32 %v9419_v46, %v736_v38  ;;  %v9427_v38 = vld [vmem:[#allocation48_spill] sm:$0xff] }
 0x217   : > { %v2388_v56 = vadd.f32 %v2387_v50, %v2386_v29  ;;  %v6050_v6 = vpop.f32.mrf.mxu0  ;;  %v2143_v29 = vadd.f32 %v2088_v55, %v1942_v40  ;;  %v1943_v10 = vadd.f32 %v9420_v31, %v1643_v7  ;;  %v2395_v8 = vsel %vm228_vm2, %v7522_v36, 0.0  ;;  %v9422_v55 = vld [vmem:[#allocation28_spill] sm:$0xff] }
 0x218   : > { %v2391_v33 = vsel %vm228_vm2, %v7508_v3, 0.0  ;;  %v7531_v62 = vadd.f32 %v6050_v6, %v2142_v35  ;;  %v9423_v6 = vld [vmem:[#allocation32_spill] sm:$0xff] }
 0x219   : > { %v2390_v9 = vadd.f32 %v2389_v57, %v2388_v56  ;;  %v2276_v60 = vpop.f32.mrf.mxu0  ;;  %v9421_v56 = vld [vmem:[#allocation16_spill] sm:$0xff]  ;;  %v1646_v59 = vadd.f32 %v9423_v6, %v9422_v55  ;;  %v2144_v25 = vadd.f32 %v2091_v28, %v1943_v10  ;;  %v9429_v6 = vld [vmem:[#allocation50_spill] sm:$0xff] }
 0x21a   : > { %v7526_v17 = vadd.f32 %v2276_v60, %v2140_v0  ;;  %v1245_v11 = vadd.f32 %v9421_v56, %v945_v61  ;;  %v2397_v40 = vsel %vm228_vm2, %v7531_v62, 0.0 }
 0x21b   : > { %v2392_v51 = vadd.f32 %v2391_v33, %v2390_v9  ;;  %v6053_v52 = vpop.f32.mrf.mxu0  ;;  %v9425_v9 = vld [vmem:[#allocation30_spill] sm:$0xff]  ;;  %v1946_v35 = vadd.f32 %v9426_v21, %v1646_v59  ;;  %v6024_v33 = vpop.f32.mrf.mxu1  ;;  %v2149_v59 = vadd.f32 %v6023_v15, %v9429_v6 }
 0x21c   : > { %v2393_v13 = vsel %vm228_vm2, %v7526_v17, 0.0  ;;  %v1446_v60 = vadd.f32 %v9425_v9, %v1245_v11  ;;  %v7552_v41 = vadd.f32 %v6053_v52, %v2145_v58  ;;  %v2150_v58 = vadd.f32 %v6024_v33, %v7326_v26 }
 0x21d   : > { %v2394_v50 = vadd.f32 %v2393_v13, %v2392_v51  ;;  %v2289_v53 = vpop.f32.mrf.mxu0  ;;  %v2146_v51 = vadd.f32 %v7486_v39, %v9427_v38  ;;  %v9428_v13 = vld [vmem:[#allocation33_spill] sm:$0xff]  ;;  %v2147_v61 = vadd.f32 %v2104_v18, %v1946_v35  ;;  %v2107_v31 = vpop.f32.mrf.mxu1 }
 0x21e   : > { %v7539_v45 = vadd.f32 %v2289_v53, %v2143_v29  ;;  %v1647_v46 = vadd.f32 %v9428_v13, %v1446_v60  ;;  %v2403_v52 = vsel %vm228_vm2, %v7552_v41, 0.0 }
 0x21f   : > { %v2396_v0 = vadd.f32 %v2395_v8, %v2394_v50  ;;  %v6054_v57 = vpop.f32.mrf.mxu0 }
 0x220   : > { %v2399_v7 = vsel %vm228_vm2, %v7539_v45, 0.0  ;;  %v2347_v50 = vadd.f32 %v6054_v57, %v2146_v51  ;;  %v1947_v39 = vadd.f32 %v7330_v63, %v1647_v46  ;;  %v5291_v46 = vld [vmem:[%s9330_s2 + $0x6] sm:$0x3] }
 0x221   : > { %v2398_v22 = vadd.f32 %v2397_v40, %v2396_v0  ;;  %v2292_v19 = vpop.f32.mrf.mxu0  ;;  %6374 = vmatprep.subr.msk.bf16.mxu1 %vm415_vm1, %v5291_v46 }
 0x222   : > { %v7556_v44 = vadd.f32 %v2292_v19, %v2144_v25  ;;  %v2148_v0 = vadd.f32 %v2107_v31, %v1947_v39  ;;  %v2405_v18 = vsel %vm228_vm2, %v2347_v50, 0.0 }
 0x223   : > { %v2400_v28 = vadd.f32 %v2399_v7, %v2398_v22  ;;  %v6057_v29 = vpop.f32.mrf.mxu0 }
 0x224   : > { %v2401_v53 = vsel %vm228_vm2, %v7556_v44, 0.0  ;;  %v2350_v25 = vadd.f32 %v6057_v29, %v2149_v59 }
 0x225   : > { %v2402_v10 = vadd.f32 %v2401_v53, %v2400_v28  ;;  %v2305_v8 = vpop.f32.mrf.mxu0  ;;  %v2805_v53 = vsel %vm415_vm1, %v5291_v46, 0 }
 0x226   : > { %v2348_v56 = vadd.f32 %v2305_v8, %v2147_v61  ;;  %v2411_v22 = vsel %vm228_vm2, %v2350_v25, 0.0  ;;  %v2753_v61 = vld [vmem:[%s9330_s2] sm:$0x3]  ;;  %6060 = vmatpush3.bf16.msra.mxu1 %v2805_v53 }
 0x227   : > { %v2404_v11 = vadd.f32 %v2403_v52, %v2402_v10  ;;  %v6058_v55 = vpop.f32.mrf.mxu0  ;;  %6375 = vmatprep.subr.msk.bf16.mxu0 %vm415_vm1, %v2753_v61  ;;  %v2972_v31 = vsel %vm415_vm1, %v2753_v61, 0  ;;  %v7586_v10 = vld [vmem:[%s9330_s2 + $0xc] sm:$0x3] }
 0x228   : > { %v2407_v40 = vsel %vm228_vm2, %v2348_v56, 0.0  ;;  %v2351_v60 = vadd.f32 %v6058_v55, %v2150_v58  ;;  %6094 = vmatpush3.bf16.msra.mxu0 %v2972_v31  ;;  %6376 = vmatprep.subr.msk.bf16.mxu1 %vm415_vm1, %v7586_v10 }
 0x229   : > { %v2406_v57 = vadd.f32 %v2405_v18, %v2404_v11  ;;  %v2308_v49 = vpop.f32.mrf.mxu0 }
 0x22a   : > { %v2349_v9 = vadd.f32 %v2308_v49, %v2148_v0  ;;  %v2413_v15 = vsel %vm228_vm2, %v2351_v60, 0.0 }
 0x22b   : > { %v2408_v63 = vadd.f32 %v2407_v40, %v2406_v57 }
 0x22c   : > { %v2409_v21 = vsel %vm228_vm2, %v2349_v9, 0.0 }
 0x22d   : > { %v2410_v35 = vadd.f32 %v2409_v21, %v2408_v63 }
 0x22f   : > { %v2412_v19 = vadd.f32 %v2411_v22, %v2410_v35 }
 0x231   : > { %v2414_v38 = vadd.f32 %v2413_v15, %v2412_v19 }
 0x233   : > { %v2415_v51 = vrot.slane %v2414_v38, 4 }
 0x235   : > { %v2416_v7 = vadd.f32 %v2415_v51, %v2414_v38 }
 0x237   : > { %v2417_v28 = vrot.slane %v2416_v7, 2 }
 0x239   : > { %v2418_v13 = vadd.f32 %v2417_v28, %v2416_v7 }
 0x23b   : > { %v2419_v26 = vrot.slane %v2418_v13, 1 }
 0x23d   : > { %v2420_v33 = vadd.f32 %v2419_v26, %v2418_v13 }
 0x23f   : > { %v7571_v29 = vmul.f32 0.00390625, %v2420_v33 }
 0x241   : > { %v7590_v8 = vsub.f32 %v7424_v42, %v7571_v29  ;;  %v7596_v39 = vsub.f32 %v7440_v27, %v7571_v29  ;;  %v7600_v52 = vsub.f32 %v7460_v1, %v7571_v29  ;;  %v7604_v11 = vsub.f32 %v7456_v47, %v7571_v29 }
 0x242   : > { %v7608_v55 = vsub.f32 %v7466_v12, %v7571_v29  ;;  %v7612_v42 = vsub.f32 %v7474_v54, %v7571_v29  ;;  %v7616_v27 = vsub.f32 %v7494_v43, %v7571_v29  ;;  %v7620_v1 = vsub.f32 %v7490_v14, %v7571_v29 }
 0x243   : > { %v7624_v47 = vsub.f32 %v7500_v32, %v7571_v29  ;;  %v7628_v12 = vsub.f32 %v7508_v3, %v7571_v29  ;;  %v7632_v54 = vsub.f32 %v7526_v17, %v7571_v29  ;;  %v7636_v43 = vsub.f32 %v7522_v36, %v7571_v29 }
 0x244   : > { %v7640_v14 = vsub.f32 %v7531_v62, %v7571_v29  ;;  %v7644_v32 = vsub.f32 %v7539_v45, %v7571_v29  ;;  %v7648_v3 = vsub.f32 %v7556_v44, %v7571_v29  ;;  %v7652_v17 = vsub.f32 %v7552_v41, %v7571_v29 }
 0x245   : > { %v7655_v6 = vsub.f32 %v2347_v50, %v7571_v29  ;;  %v7658_v36 = vsub.f32 %v2348_v56, %v7571_v29  ;;  %v7661_v62 = vsub.f32 %v2349_v9, %v7571_v29  ;;  %v7664_v45 = vsub.f32 %v2350_v25, %v7571_v29 }
 0x246   : > { %v7667_v59 = vsub.f32 %v2351_v60, %v7571_v29  ;;  %v7671_v44 = vsub.f32 %v7344_v20, %v7571_v29  ;;  %v7675_v41 = vsub.f32 %v7354_v30, %v7571_v29  ;;  %v7679_v50 = vsub.f32 %v7352_v2, %v7571_v29 }
 0x247   : > { %v7683_v56 = vsub.f32 %v7360_v24, %v7571_v29  ;;  %v7691_v20 = vsub.f32 %v7369_v16, %v7571_v29  ;;  %v7697_v2 = vsub.f32 %v7390_v5, %v7571_v29  ;;  %v7705_v25 = vsub.f32 %v7386_v37, %v7571_v29 }
 0x248   : > { %v2455_v0 = vmul.f32 %v7671_v44, %v7671_v44  ;;  %v2456_v18 = vmul.f32 %v7675_v41, %v7675_v41  ;;  %v2457_v30 = vmul.f32 %v7679_v50, %v7679_v50  ;;  %v7712_v5 = vsub.f32 %v7394_v48, %v7571_v29 }
 0x249   : > { %v2458_v24 = vmul.f32 %v7683_v56, %v7683_v56  ;;  %v2459_v16 = vmul.f32 %v7691_v20, %v7691_v20  ;;  %v2460_v63 = vmul.f32 %v7697_v2, %v7697_v2  ;;  %v7719_v37 = vsub.f32 %v7403_v34, %v7571_v29 }
 0x24a   : > { %v2487_v57 = vsel %vm228_vm2, %v2455_v0, 0.0  ;;  %v2488_v49 = vsel %vm228_vm2, %v2456_v18, 0.0  ;;  %v2490_v40 = vsel %vm228_vm2, %v2457_v30, 0.0  ;;  %v2461_v35 = vmul.f32 %v7705_v25, %v7705_v25 }
 0x24b   : > { %v2489_v58 = vadd.f32 %v2488_v49, %v2487_v57  ;;  %v2492_v60 = vsel %vm228_vm2, %v2458_v24, 0.0  ;;  %v2494_v22 = vsel %vm228_vm2, %v2459_v16, 0.0  ;;  %v2462_v48 = vmul.f32 %v7712_v5, %v7712_v5 }
 0x24c   : > { %v2496_v15 = vsel %vm228_vm2, %v2460_v63, 0.0  ;;  %v7729_v51 = vsub.f32 %v7420_v23, %v7571_v29  ;;  %v2463_v34 = vmul.f32 %v7719_v37, %v7719_v37  ;;  %v2498_v7 = vsel %vm228_vm2, %v2461_v35, 0.0 }
 0x24d   : > { %v2491_v9 = vadd.f32 %v2490_v40, %v2489_v58  ;;  %v7736_v13 = vsub.f32 %v7430_v4, %v7571_v29  ;;  %v2464_v26 = vmul.f32 %v7590_v8, %v7590_v8  ;;  %v2500_v33 = vsel %vm228_vm2, %v2462_v48, 0.0 }
 0x24e   : > { %v2465_v23 = vmul.f32 %v7729_v51, %v7729_v51  ;;  %v2502_v61 = vsel %vm228_vm2, %v2463_v34, 0.0  ;;  %v2467_v4 = vmul.f32 %v7596_v39, %v7596_v39  ;;  %v2468_v24 = vmul.f32 %v7600_v52, %v7600_v52 }
 0x24f   : > { %v2493_v21 = vadd.f32 %v2492_v60, %v2491_v9  ;;  %v2466_v31 = vmul.f32 %v7736_v13, %v7736_v13  ;;  %v2504_v0 = vsel %vm228_vm2, %v2464_v26, 0.0  ;;  %v2469_v58 = vmul.f32 %v7604_v11, %v7604_v11 }
 0x250   : > { %v2506_v29 = vsel %vm228_vm2, %v2465_v23, 0.0  ;;  %v2510_v16 = vsel %vm228_vm2, %v2467_v4, 0.0  ;;  %v2470_v9 = vmul.f32 %v7608_v55, %v7608_v55  ;;  %v2512_v63 = vsel %vm228_vm2, %v2468_v24, 0.0 }
 0x251   : > { %v2495_v19 = vadd.f32 %v2494_v22, %v2493_v21  ;;  %v2508_v57 = vsel %vm228_vm2, %v2466_v31, 0.0  ;;  %v2471_v21 = vmul.f32 %v7612_v42, %v7612_v42  ;;  %v2514_v35 = vsel %vm228_vm2, %v2469_v58, 0.0 }
 0x252   : > { %v2516_v48 = vsel %vm228_vm2, %v2470_v9, 0.0 }
 0x253   : > { %v2497_v38 = vadd.f32 %v2496_v15, %v2495_v19  ;;  %v2472_v19 = vmul.f32 %v7616_v27, %v7616_v27  ;;  %v2518_v34 = vsel %vm228_vm2, %v2471_v21, 0.0  ;;  %v2481_v21 = vmul.f32 %v7652_v17, %v7652_v17 }
 0x255   : > { %v2499_v28 = vadd.f32 %v2498_v7, %v2497_v38  ;;  %v2473_v38 = vmul.f32 %v7620_v1, %v7620_v1  ;;  %v2520_v26 = vsel %vm228_vm2, %v2472_v19, 0.0  ;;  %v2482_v19 = vmul.f32 %v7655_v6, %v7655_v6 }
 0x257   : > { %v2501_v46 = vadd.f32 %v2500_v33, %v2499_v28  ;;  %v2474_v28 = vmul.f32 %v7624_v47, %v7624_v47  ;;  %v2522_v23 = vsel %vm228_vm2, %v2473_v38, 0.0  ;;  %v2483_v38 = vmul.f32 %v7658_v36, %v7658_v36 }
 0x259   : > { %v2503_v53 = vadd.f32 %v2502_v61, %v2501_v46  ;;  %v2475_v46 = vmul.f32 %v7628_v12, %v7628_v12  ;;  %v2524_v31 = vsel %vm228_vm2, %v2474_v28, 0.0  ;;  %v2484_v28 = vmul.f32 %v7661_v62, %v7661_v62 }
 0x25b   : > { %v2505_v18 = vadd.f32 %v2504_v0, %v2503_v53  ;;  %v2476_v53 = vmul.f32 %v7632_v54, %v7632_v54  ;;  %v2526_v4 = vsel %vm228_vm2, %v2475_v46, 0.0  ;;  %v2485_v46 = vmul.f32 %v7664_v45, %v7664_v45 }
 0x25d   : > { %v2507_v30 = vadd.f32 %v2506_v29, %v2505_v18  ;;  %v2477_v18 = vmul.f32 %v7636_v43, %v7636_v43  ;;  %v2528_v24 = vsel %vm228_vm2, %v2476_v53, 0.0  ;;  %v2486_v53 = vmul.f32 %v7667_v59, %v7667_v59 }
 0x25f   : > { %v2509_v49 = vadd.f32 %v2508_v57, %v2507_v30  ;;  %v2478_v30 = vmul.f32 %v7640_v14, %v7640_v14  ;;  %v2530_v58 = vsel %vm228_vm2, %v2477_v18, 0.0  ;;  %v2546_v18 = vsel %vm228_vm2, %v2485_v46, 0.0 }
 0x261   : > { %v2511_v40 = vadd.f32 %v2510_v16, %v2509_v49  ;;  %v2479_v49 = vmul.f32 %v7644_v32, %v7644_v32  ;;  %v2532_v9 = vsel %vm228_vm2, %v2478_v30, 0.0 }
 0x263   : > { %v2513_v60 = vadd.f32 %v2512_v63, %v2511_v40  ;;  %v2480_v40 = vmul.f32 %v7648_v3, %v7648_v3  ;;  %v7792_v63 = vld [vmem:[%s9330_s2 + $0x2] sm:$0x3] }
 0x264   : > { %6377 = vmatprep.subr.msk.bf16.mxu0 %vm415_vm1, %v7792_v63 }
 0x265   : > { %v2515_v22 = vadd.f32 %v2514_v35, %v2513_v60  ;;  %v2534_v35 = vsel %vm228_vm2, %v2479_v49, 0.0 }
 0x267   : > { %v2517_v15 = vadd.f32 %v2516_v48, %v2515_v22  ;;  %v2536_v48 = vsel %vm228_vm2, %v2480_v40, 0.0 }
 0x269   : > { %v2519_v7 = vadd.f32 %v2518_v34, %v2517_v15  ;;  %v2538_v34 = vsel %vm228_vm2, %v2481_v21, 0.0 }
 0x26b   : > { %v2521_v33 = vadd.f32 %v2520_v26, %v2519_v7  ;;  %v2540_v26 = vsel %vm228_vm2, %v2482_v19, 0.0 }
 0x26d   : > { %v2523_v61 = vadd.f32 %v2522_v23, %v2521_v33  ;;  %v2542_v23 = vsel %vm228_vm2, %v2483_v38, 0.0 }
 0x26f   : > { %v2525_v0 = vadd.f32 %v2524_v31, %v2523_v61  ;;  %v2544_v31 = vsel %vm228_vm2, %v2484_v28, 0.0 }
 0x271   : > { %v2527_v29 = vadd.f32 %v2526_v4, %v2525_v0 }
 0x273   : > { %v2529_v57 = vadd.f32 %v2528_v24, %v2527_v29  ;;  %v2548_v29 = vsel %vm228_vm2, %v2486_v53, 0.0 }
 0x275   : > { %v2531_v16 = vadd.f32 %v2530_v58, %v2529_v57 }
 0x277   : > { %v2533_v60 = vadd.f32 %v2532_v9, %v2531_v16 }
 0x279   : > { %v2535_v22 = vadd.f32 %v2534_v35, %v2533_v60 }
 0x27b   : > { %v2537_v15 = vadd.f32 %v2536_v48, %v2535_v22 }
 0x27d   : > { %v2539_v7 = vadd.f32 %v2538_v34, %v2537_v15 }
 0x27f   : > { %v2541_v33 = vadd.f32 %v2540_v26, %v2539_v7 }
 0x281   : > { %v2543_v61 = vadd.f32 %v2542_v23, %v2541_v33 }
 0x283   : > { %v2545_v0 = vadd.f32 %v2544_v31, %v2543_v61 }
 0x285   : > { %v2547_v4 = vadd.f32 %v2546_v18, %v2545_v0 }
 0x287   : > { %v2549_v30 = vadd.f32 %v2548_v29, %v2547_v4 }
 0x289   : > { %v2550_v24 = vrot.slane %v2549_v30, 4 }
 0x28b   : > { %v2551_v57 = vadd.f32 %v2550_v24, %v2549_v30 }
 0x28d   : > { %v2552_v49 = vrot.slane %v2551_v57, 2 }
 0x28f   : > { %v2553_v58 = vadd.f32 %v2552_v49, %v2551_v57 }
 0x291   : > { %v2554_v16 = vrot.slane %v2553_v58, 1 }
 0x293   : > { %v2555_v40 = vadd.f32 %v2554_v16, %v2553_v58 }
 0x295   : > { %v2556_v9 = vmul.f32 0.00390625, %v2555_v40 }
 0x297   : > { %v2557_v60 = vadd.f32 1e-05, %v2556_v9 }
 0x299   : > { %6392 = vrsqrt.f32 %v2557_v60 }
 0x2a6   : > { %v6393_v21 = vpop.eup %6392 }
 0x2a7   : > { %v2588_v35 = vmul.f32 %v6393_v21, %v7661_v62  ;;  %v2559_v22 = vmul.f32 %v6393_v21, %v7671_v44  ;;  %v2560_v19 = vmul.f32 %v6393_v21, %v7675_v41  ;;  %v2561_v48 = vmul.f32 %v6393_v21, %v7679_v50 }
 0x2a8   : > { %v2562_v15 = vmul.f32 %v6393_v21, %v7683_v56  ;;  %v2563_v38 = vmul.f32 %v6393_v21, %v7691_v20  ;;  %v2564_v34 = vmul.f32 %v6393_v21, %v7697_v2  ;;  %v2565_v7 = vmul.f32 %v6393_v21, %v7705_v25 }
 0x2a9   : > { %v2620_v28 = vmax.f32 %v2588_v35, 0.0  ;;  %v7825_v26 = vmul.f32 %v6393_v21, %v7712_v5  ;;  %v7828_v62 = vmul.f32 %v6393_v21, %v7719_v37  ;;  %v7831_v44 = vmul.f32 %v6393_v21, %v7590_v8 }
 0x2aa   : > { %v7834_v41 = vmul.f32 %v6393_v21, %v7729_v51  ;;  %v7837_v50 = vmul.f32 %v6393_v21, %v7736_v13  ;;  %v7840_v56 = vmul.f32 %v6393_v21, %v7596_v39  ;;  %v7843_v20 = vmul.f32 %v6393_v21, %v7600_v52 }
 0x2ab   : > { %2685 = vst.msk [vmem:[#allocation2 + $0x173] sm:$0x40] %vm278_vm4, %v2620_v28  ;;  %v7847_v2 = vmul.f32 %v6393_v21, %v7604_v11  ;;  %v7850_v8 = vmul.f32 %v6393_v21, %v7608_v55  ;;  %v7853_v25 = vmul.f32 %v6393_v21, %v7612_v42  ;;  %v7856_v5 = vmul.f32 %v6393_v21, %v7616_v27 }
 0x2ac   : > { %2652 = vst.msk [vmem:[#allocation2 + $0x171] sm:$0xff] %vm228_vm2, %v2620_v28  ;;  %v7860_v39 = vmul.f32 %v6393_v21, %v7620_v1  ;;  %v7863_v52 = vmul.f32 %v6393_v21, %v7624_v47  ;;  %v7866_v11 = vmul.f32 %v6393_v21, %v7628_v12  ;;  %v7869_v55 = vmul.f32 %v6393_v21, %v7632_v54 }
 0x2ad   : > { %v7872_v42 = vmul.f32 %v6393_v21, %v7636_v43  ;;  %v7875_v27 = vmul.f32 %v6393_v21, %v7640_v14  ;;  %v7878_v37 = vmul.f32 %v6393_v21, %v7644_v32  ;;  %v7881_v1 = vmul.f32 %v6393_v21, %v7648_v3 }
 0x2ae   : > { %v7884_v47 = vmul.f32 %v6393_v21, %v7652_v17  ;;  %v7887_v12 = vmul.f32 %v6393_v21, %v7655_v6  ;;  %v7890_v54 = vmul.f32 %v6393_v21, %v7658_v36  ;;  %v7893_v43 = vmul.f32 %v6393_v21, %v7664_v45 }
 0x2af   : > { %v7896_v14 = vmul.f32 %v6393_v21, %v7667_v59  ;;  %v2591_v32 = vmax.f32 %v2559_v22, 0.0  ;;  %v2592_v51 = vmax.f32 %v2560_v19, 0.0  ;;  %v2593_v13 = vmax.f32 %v2561_v48, 0.0 }
 0x2b0   : > { %v2594_v3 = vmax.f32 %v2562_v15, 0.0  ;;  %v2595_v33 = vmax.f32 %v2563_v38, 0.0  ;;  %v2596_v46 = vmax.f32 %v2564_v34, 0.0  ;;  %v2597_v17 = vmax.f32 %v2565_v7, 0.0 }
 0x2b1   : > { %v2598_v23 = vmax.f32 %v7825_v26, 0.0  ;;  %v2599_v6 = vmax.f32 %v7828_v62, 0.0  ;;  %v2600_v36 = vmax.f32 %v7831_v44, 0.0  ;;  %v2601_v61 = vmax.f32 %v7834_v41, 0.0  ;;  %2623 = vst.msk [vmem:[#allocation2 + $0x19] sm:$0xff] %vm228_vm2, %v2591_v32  ;;  %2624 = vst.msk [vmem:[#allocation2 + $0x21] sm:$0xff] %vm228_vm2, %v2592_v51 }
 0x2b2   : > { %2625 = vst.msk [vmem:[#allocation2 + $0x31] sm:$0xff] %vm228_vm2, %v2593_v13  ;;  %v2602_v45 = vmax.f32 %v7837_v50, 0.0  ;;  %v2603_v59 = vmax.f32 %v7840_v56, 0.0  ;;  %v2604_v53 = vmax.f32 %v7843_v20, 0.0  ;;  %v2605_v31 = vmax.f32 %v7847_v2, 0.0  ;;  %2626 = vst.msk [vmem:[#allocation2 + $0x39] sm:$0xff] %vm228_vm2, %v2594_v3 }
 0x2b3   : > { %2655 = vst.msk [vmem:[#allocation2 + $0x17] sm:$0x2] %vm261_vm3, %v2591_v32  ;;  %2656 = vst.msk [vmem:[#allocation2 + $0x2f] sm:$0x2] %vm261_vm3, %v2593_v13  ;;  %v2695_v0 = vld [vmem:[#allocation2 + $0x178] sm:$0xff]  ;;  %v2606_v18 = vmax.f32 %v7850_v8, 0.0 }
 0x2b4   : > { %2671 = vst.msk [vmem:[#allocation2 + $0x23] sm:$0x40] %vm278_vm4, %v2592_v51  ;;  %2672 = vst.msk [vmem:[#allocation2 + $0x3b] sm:$0x40] %vm278_vm4, %v2594_v3  ;;  %v2607_v4 = vmax.f32 %v7853_v25, 0.0  ;;  %v2608_v29 = vmax.f32 %v7856_v5, 0.0 }
 0x2b5   : > { %2627 = vst.msk [vmem:[#allocation2 + $0x49] sm:$0xff] %vm228_vm2, %v2595_v33  ;;  %2628 = vst.msk [vmem:[#allocation2 + $0x51] sm:$0xff] %vm228_vm2, %v2596_v46  ;;  %v2609_v30 = vmax.f32 %v7860_v39, 0.0  ;;  %v2610_v24 = vmax.f32 %v7863_v52, 0.0  ;;  %v2611_v57 = vmax.f32 %v7866_v11, 0.0  ;;  %v2612_v49 = vmax.f32 %v7869_v55, 0.0 }
 0x2b6   : > { %2629 = vst.msk [vmem:[#allocation2 + $0x61] sm:$0xff] %vm228_vm2, %v2597_v17  ;;  %2630 = vst.msk [vmem:[#allocation2 + $0x69] sm:$0xff] %vm228_vm2, %v2598_v23  ;;  %v2613_v58 = vmax.f32 %v7872_v42, 0.0  ;;  %v2614_v16 = vmax.f32 %v7875_v27, 0.0  ;;  %v2615_v40 = vmax.f32 %v7878_v37, 0.0  ;;  %v2616_v9 = vmax.f32 %v7881_v1, 0.0 }
 0x2b7   : > { %2657 = vst.msk [vmem:[#allocation2 + $0x47] sm:$0x2] %vm261_vm3, %v2595_v33  ;;  %2658 = vst.msk [vmem:[#allocation2 + $0x5f] sm:$0x2] %vm261_vm3, %v2597_v17  ;;  %v2617_v60 = vmax.f32 %v7884_v47, 0.0  ;;  %v2618_v21 = vmax.f32 %v7887_v12, 0.0 }
 0x2b8   : > { %2673 = vst.msk [vmem:[#allocation2 + $0x53] sm:$0x40] %vm278_vm4, %v2596_v46  ;;  %2674 = vst.msk [vmem:[#allocation2 + $0x6b] sm:$0x40] %vm278_vm4, %v2598_v23  ;;  %v2619_v35 = vmax.f32 %v7890_v54, 0.0  ;;  %v2621_v22 = vmax.f32 %v7893_v43, 0.0 }
 0x2b9   : > { %2631 = vst.msk [vmem:[#allocation2 + $0x79] sm:$0xff] %vm228_vm2, %v2599_v6  ;;  %2632 = vst.msk [vmem:[#allocation2 + $0x81] sm:$0xff] %vm228_vm2, %v2600_v36  ;;  %v2622_v19 = vmax.f32 %v7896_v14, 0.0  ;;  %v2702_v15 = vld [vmem:[#allocation2 + $0x20] sm:$0xff]  ;;  %v2704_v7 = vld [vmem:[#allocation2 + $0x38] sm:$0xff]  ;;  %v3141_v44 = vsel %vm415_vm1, %v7586_v10, 0 }
 0x2ba   : > { %2633 = vst.msk [vmem:[#allocation2 + $0x91] sm:$0xff] %vm228_vm2, %v2601_v61  ;;  %2698 = vst.msk [vmem:[#allocation2 + $0x1a8] sm:$0xff] %vm228_vm2, %v2695_v0  ;;  %v2701_v48 = vld [vmem:[#allocation2 + $0x18] sm:$0xff]  ;;  %v2703_v38 = vld [vmem:[#allocation2 + $0x30] sm:$0xff]  ;;  %v3441_v42 = vsel %vm415_vm1, %v7792_v63, 0 }
 0x2bb   : > { %2659 = vst.msk [vmem:[#allocation2 + $0x77] sm:$0x2] %vm261_vm3, %v2599_v6  ;;  %2660 = vst.msk [vmem:[#allocation2 + $0x8f] sm:$0x2] %vm261_vm3, %v2601_v61  ;;  %v2736_v34 = vpack.c.bf16 %v2702_v15, %v2701_v48  ;;  %v7986_v62 = vpack.c.bf16 %v2704_v7, %v2703_v38  ;;  %v7997_v50 = vld [vmem:[%s9330_s2 + $0x8] sm:$0x3] }
 0x2bc   : > { %2675 = vst.msk [vmem:[#allocation2 + $0x83] sm:$0x40] %vm278_vm4, %v2600_v36  ;;  %2676 = vst.msk [vmem:[#allocation2 + $0x9b] sm:$0x40] %vm278_vm4, %v2602_v45  ;;  %v2706_v26 = vld [vmem:[#allocation2 + $0x50] sm:$0xff]  ;;  %v2689_v27 = vld [vmem:[#allocation2 + $0x40] sm:$0xff] }
 0x2bd   : > { %2634 = vst.msk [vmem:[#allocation2 + $0x99] sm:$0xff] %vm228_vm2, %v2602_v45  ;;  %2635 = vst.msk [vmem:[#allocation2 + $0xa9] sm:$0xff] %vm228_vm2, %v2603_v59  ;;  %6061 = vmatprep.mubr.msk.bf16.mxu1 %vm228_vm2, %v2736_v34  ;;  %v2708_v56 = vld [vmem:[#allocation2 + $0x68] sm:$0xff]  ;;  %v3341_v48 = vld [vmem:[#allocation2 + $0x39] sm:$0xff] }
 0x2be   : > { %2636 = vst.msk [vmem:[#allocation2 + $0xb1] sm:$0xff] %vm228_vm2, %v2604_v53  ;;  %2637 = vst.msk [vmem:[#allocation2 + $0xc1] sm:$0xff] %vm228_vm2, %v2605_v31  ;;  %v2705_v28 = vld [vmem:[#allocation2 + $0x48] sm:$0xff]  ;;  %6062 = vmatmul.mubr.msk.bf16.vlgmr.msra.gmra.mxu1 %vm228_vm2, %v7986_v62  ;;  %v2707_v10 = vld [vmem:[#allocation2 + $0x60] sm:$0xff] }
 0x2bf   : > { %2661 = vst.msk [vmem:[#allocation2 + $0xa7] sm:$0x2] %vm261_vm3, %v2603_v59  ;;  %2662 = vst.msk [vmem:[#allocation2 + $0xbf] sm:$0x2] %vm261_vm3, %v2605_v31  ;;  %v7992_v41 = vpack.c.bf16 %v2706_v26, %v2705_v28  ;;  %6128 = vmatpush3.bf16.msra.mxu1 %v3141_v44  ;;  %v8005_v39 = vpack.c.bf16 %v2708_v56, %v2707_v10  ;;  %v8020_v37 = vld [vmem:[%s9330_s2 + $0xe] sm:$0x3] }
 0x2c0   : > { %2677 = vst.msk [vmem:[#allocation2 + $0xb3] sm:$0x40] %vm278_vm4, %v2604_v53  ;;  %2678 = vst.msk [vmem:[#allocation2 + $0xcb] sm:$0x40] %vm278_vm4, %v2606_v18  ;;  %6378 = vmatprep.subr.msk.bf16.mxu1 %vm415_vm1, %v7997_v50  ;;  %v2710_v8 = vld [vmem:[#allocation2 + $0x80] sm:$0xff]  ;;  %v3342_v28 = vld [vmem:[#allocation2 + $0x49] sm:$0xff] }
 0x2c1   : > { %2638 = vst.msk [vmem:[#allocation2 + $0xc9] sm:$0xff] %vm228_vm2, %v2606_v18  ;;  %2639 = vst.msk [vmem:[#allocation2 + $0xd9] sm:$0xff] %vm228_vm2, %v2607_v4  ;;  %6065 = vmatprep.mubr.msk.bf16.mxu1 %vm228_vm2, %v7992_v41  ;;  %v3343_v26 = vld [vmem:[#allocation2 + $0x51] sm:$0xff]  ;;  %v3345_v44 = vld [vmem:[#allocation2 + $0x69] sm:$0xff] }
 0x2c2   : > { %2640 = vst.msk [vmem:[#allocation2 + $0xe1] sm:$0xff] %vm228_vm2, %v2608_v29  ;;  %2641 = vst.msk [vmem:[#allocation2 + $0xf1] sm:$0xff] %vm228_vm2, %v2609_v30  ;;  %v2709_v2 = vld [vmem:[#allocation2 + $0x78] sm:$0xff]  ;;  %v2711_v63 = vld [vmem:[#allocation2 + $0x90] sm:$0xff] }
 0x2c3   : > { %2663 = vst.msk [vmem:[#allocation2 + $0xd7] sm:$0x2] %vm261_vm3, %v2607_v4  ;;  %2664 = vst.msk [vmem:[#allocation2 + $0xef] sm:$0x2] %vm261_vm3, %v2609_v30  ;;  %v8007_v55 = vpack.c.bf16 %v2710_v8, %v2709_v2  ;;  %v3346_v10 = vld [vmem:[#allocation2 + $0x79] sm:$0xff]  ;;  %v3347_v56 = vld [vmem:[#allocation2 + $0x81] sm:$0xff] }
 0x2c4   : > { %2679 = vst.msk [vmem:[#allocation2 + $0xe3] sm:$0x40] %vm278_vm4, %v2608_v29  ;;  %2680 = vst.msk [vmem:[#allocation2 + $0xfb] sm:$0x40] %vm278_vm4, %v2610_v24  ;;  %v2712_v1 = vld [vmem:[#allocation2 + $0x98] sm:$0xff]  ;;  %v8148_v8 = vpack.c.bf16 %v3347_v56, %v3346_v10 }
 0x2c5   : > { %2642 = vst.msk [vmem:[#allocation2 + $0xf9] sm:$0xff] %vm228_vm2, %v2610_v24  ;;  %2643 = vst.msk [vmem:[#allocation2 + $0x109] sm:$0xff] %vm228_vm2, %v2611_v57  ;;  %v2714_v12 = vld [vmem:[#allocation2 + $0xb0] sm:$0xff]  ;;  %v8029_v54 = vpack.c.bf16 %v2712_v1, %v2711_v63  ;;  %v3349_v2 = vld [vmem:[#allocation2 + $0x99] sm:$0xff] }
 0x2c6   : > { %2644 = vst.msk [vmem:[#allocation2 + $0x111] sm:$0xff] %vm228_vm2, %v2612_v49  ;;  %2645 = vst.msk [vmem:[#allocation2 + $0x121] sm:$0xff] %vm228_vm2, %v2613_v58  ;;  %6066 = vmatmul.mubr.msk.bf16.gmra.mxu1 %vm228_vm2, %v8005_v39  ;;  %v2713_v47 = vld [vmem:[#allocation2 + $0xa8] sm:$0xff]  ;;  %v2715_v14 = vld [vmem:[#allocation2 + $0xc0] sm:$0xff] }
 0x2c7   : > { %2665 = vst.msk [vmem:[#allocation2 + $0x107] sm:$0x2] %vm261_vm3, %v2611_v57  ;;  %2666 = vst.msk [vmem:[#allocation2 + $0x11f] sm:$0x2] %vm261_vm3, %v2613_v58  ;;  %6069 = vmatprep.mubr.msk.bf16.mxu1 %vm228_vm2, %v8007_v55  ;;  %v8031_v43 = vpack.c.bf16 %v2714_v12, %v2713_v47 }
 0x2c8   : > { %2681 = vst.msk [vmem:[#allocation2 + $0x113] sm:$0x40] %vm278_vm4, %v2612_v49  ;;  %2682 = vst.msk [vmem:[#allocation2 + $0x12b] sm:$0x40] %vm278_vm4, %v2614_v16  ;;  %v2716_v32 = vld [vmem:[#allocation2 + $0xc8] sm:$0xff] }
 0x2c9   : > { %2646 = vst.msk [vmem:[#allocation2 + $0x129] sm:$0xff] %vm228_vm2, %v2614_v16  ;;  %2647 = vst.msk [vmem:[#allocation2 + $0x139] sm:$0xff] %vm228_vm2, %v2615_v40  ;;  %v2718_v13 = vld [vmem:[#allocation2 + $0xe0] sm:$0xff]  ;;  %v8041_v3 = vpack.c.bf16 %v2716_v32, %v2715_v14  ;;  %v3356_v63 = vld [vmem:[#allocation2 + $0xf1] sm:$0xff] }
 0x2ca   : > { %2648 = vst.msk [vmem:[#allocation2 + $0x141] sm:$0xff] %vm228_vm2, %v2616_v9  ;;  %2649 = vst.msk [vmem:[#allocation2 + $0x151] sm:$0xff] %vm228_vm2, %v2617_v60  ;;  %v2717_v51 = vld [vmem:[#allocation2 + $0xd8] sm:$0xff]  ;;  %v2719_v46 = vld [vmem:[#allocation2 + $0xf0] sm:$0xff] }
 0x2cb   : > { %2667 = vst.msk [vmem:[#allocation2 + $0x137] sm:$0x2] %vm261_vm3, %v2615_v40  ;;  %2668 = vst.msk [vmem:[#allocation2 + $0x14f] sm:$0x2] %vm261_vm3, %v2617_v60  ;;  %v8043_v33 = vpack.c.bf16 %v2718_v13, %v2717_v51 }
 0x2cc   : > { %2683 = vst.msk [vmem:[#allocation2 + $0x143] sm:$0x40] %vm278_vm4, %v2616_v9  ;;  %2684 = vst.msk [vmem:[#allocation2 + $0x15b] sm:$0x40] %vm278_vm4, %v2618_v21  ;;  %v2720_v17 = vld [vmem:[#allocation2 + $0xf8] sm:$0xff]  ;;  %v3642_v9 = vsel %vm415_vm1, %v7997_v50, 0 }
 0x2cd   : > { %2650 = vst.msk [vmem:[#allocation2 + $0x159] sm:$0xff] %vm228_vm2, %v2618_v21  ;;  %2653 = vst.msk [vmem:[#allocation2 + $0x181] sm:$0xff] %vm228_vm2, %v2621_v22  ;;  %v2722_v6 = vld [vmem:[#allocation2 + $0x110] sm:$0xff]  ;;  %v8053_v36 = vpack.c.bf16 %v2720_v17, %v2719_v46  ;;  %v8106_v21 = vld [vmem:[%s9330_s2 + $0x4] sm:$0x3] }
 0x2ce   : > { %2654 = vst.msk [vmem:[#allocation2 + $0x189] sm:$0xff] %vm228_vm2, %v2622_v19  ;;  %2651 = vst.msk [vmem:[#allocation2 + $0x169] sm:$0xff] %vm228_vm2, %v2619_v35  ;;  %6070 = vmatmul.mubr.msk.bf16.gmra.mxu1 %vm228_vm2, %v8029_v54  ;;  %v2721_v23 = vld [vmem:[#allocation2 + $0x108] sm:$0xff]  ;;  %v2723_v45 = vld [vmem:[#allocation2 + $0x120] sm:$0xff] }
 0x2cf   : > { %2669 = vst.msk [vmem:[#allocation2 + $0x167] sm:$0x2] %vm261_vm3, %v2619_v35  ;;  %2670 = vst.msk [vmem:[#allocation2 + $0x17f] sm:$0x2] %vm261_vm3, %v2621_v22  ;;  %6073 = vmatprep.mubr.msk.bf16.mxu1 %vm228_vm2, %v8031_v43  ;;  %v8055_v61 = vpack.c.bf16 %v2722_v6, %v2721_v23  ;;  %v3338_v35 = vld [vmem:[#allocation2 + $0x19] sm:$0xff]  ;;  %v3339_v22 = vld [vmem:[#allocation2 + $0x21] sm:$0xff] }
 0x2d0   : > { %2686 = vst.msk [vmem:[#allocation2 + $0x18b] sm:$0x40] %vm278_vm4, %v2622_v19  ;;  %v2724_v59 = vld [vmem:[#allocation2 + $0x128] sm:$0xff]  ;;  %v3340_v19 = vld [vmem:[#allocation2 + $0x31] sm:$0xff]  ;;  %v8115_v15 = vpack.c.bf16 %v3339_v22, %v3338_v35  ;;  %v3357_v1 = vld [vmem:[#allocation2 + $0xf9] sm:$0xff] }
 0x2d1   : > { %2690 = vst.msk [vmem:[#allocation2] sm:$0xff] %vm228_vm2, %v2703_v38  ;;  %2691 = vst.msk [vmem:[#allocation2 + $0x8] sm:$0xff] %vm228_vm2, %v2704_v7  ;;  %v2726_v31 = vld [vmem:[#allocation2 + $0x140] sm:$0xff]  ;;  %v8065_v0 = vpack.c.bf16 %v2724_v59, %v2723_v45  ;;  %v3843_v38 = vsel %vm415_vm1, %v8020_v37, 0  ;;  %v8126_v7 = vld [vmem:[%s9330_s2 + $0xa] sm:$0x3]  ;;  %v3382_v12 = vpack.c.bf16 %v3357_v1, %v3356_v63 }
 0x2d2   : > { %2692 = vst.msk [vmem:[#allocation2 + $0x10] sm:$0xff] %vm228_vm2, %v2689_v27  ;;  %v2725_v53 = vld [vmem:[#allocation2 + $0x138] sm:$0xff]  ;;  %v2727_v4 = vld [vmem:[#allocation2 + $0x150] sm:$0xff]  ;;  %v3360_v14 = vld [vmem:[#allocation2 + $0x121] sm:$0xff] }
 0x2d3   : > { %v8067_v18 = vpack.c.bf16 %v2726_v31, %v2725_v53  ;;  %v3354_v27 = vld [vmem:[#allocation2 + $0xd9] sm:$0xff]  ;;  %v3361_v32 = vld [vmem:[#allocation2 + $0x129] sm:$0xff]  ;;  %v3363_v17 = vld [vmem:[#allocation2 + $0x141] sm:$0xff]  ;;  %v4143_v31 = vsel %vm415_vm1, %v8106_v21, 0 }
 0x2d4   : > { %v2728_v29 = vld [vmem:[#allocation2 + $0x158] sm:$0xff]  ;;  %v3384_v13 = vpack.c.bf16 %v3361_v32, %v3360_v14 }
 0x2d5   : > { %v2730_v11 = vld [vmem:[#allocation2 + $0x170] sm:$0xff]  ;;  %v8077_v30 = vpack.c.bf16 %v2728_v29, %v2727_v4  ;;  %v2732_v49 = vld [vmem:[#allocation2 + $0x188] sm:$0xff]  ;;  %v3362_v46 = vld [vmem:[#allocation2 + $0x139] sm:$0xff]  ;;  %v4344_v4 = vsel %vm415_vm1, %v8126_v7, 0 }
 0x2d6   : > { %v2729_v52 = vld [vmem:[#allocation2 + $0x168] sm:$0xff]  ;;  %2697 = vst.msk [vmem:[#allocation2 + $0x1a0] sm:$0xff] %vm228_vm2, %v2730_v11  ;;  %6074 = vmatmul.mubr.msk.bf16.gmra.mxu1 %vm228_vm2, %v8041_v3  ;;  %v2731_v57 = vld [vmem:[#allocation2 + $0x180] sm:$0xff]  ;;  %v3364_v23 = vld [vmem:[#allocation2 + $0x151] sm:$0xff] }
 0x2d7   : > { %2696 = vst.msk [vmem:[#allocation2 + $0x198] sm:$0xff] %vm228_vm2, %v2729_v52  ;;  %6077 = vmatprep.mubr.msk.bf16.mxu1 %vm228_vm2, %v8043_v33  ;;  %v8079_v24 = vpack.c.bf16 %v2730_v11, %v2729_v52  ;;  %v8089_v58 = vpack.c.bf16 %v2732_v49, %v2731_v57  ;;  %v3352_v52 = vld [vmem:[#allocation2 + $0xc1] sm:$0xff]  ;;  %v3353_v11 = vld [vmem:[#allocation2 + $0xc9] sm:$0xff]  ;;  %v3365_v6 = vld [vmem:[#allocation2 + $0x159] sm:$0xff] }
 0x2d8   : > { %v2699_v20 = vld [vmem:[#allocation2] sm:$0xff]  ;;  %v2700_v25 = vld [vmem:[#allocation2 + $0x8] sm:$0xff]  ;;  %v3386_v45 = vpack.c.bf16 %v3365_v6, %v3364_v23  ;;  %v3367_v53 = vld [vmem:[#allocation2 + $0x171] sm:$0xff] }
 0x2d9   : > { %v2735_v5 = vpack.c.bf16 %v2700_v25, %v2699_v20  ;;  %v3336_v16 = vld [vmem:[#allocation2 + $0x1] sm:$0xff]  ;;  %v3337_v40 = vld [vmem:[#allocation2 + $0x9] sm:$0xff]  ;;  %v3348_v20 = vld [vmem:[#allocation2 + $0x91] sm:$0xff] }
 0x2da   : > { %v3372_v60 = vpack.c.bf16 %v3337_v40, %v3336_v16  ;;  %v8152_v25 = vpack.c.bf16 %v3349_v2, %v3348_v20  ;;  %v3366_v59 = vld [vmem:[#allocation2 + $0x169] sm:$0xff]  ;;  %v3368_v29 = vld [vmem:[#allocation2 + $0x181] sm:$0xff] }
 0x2db   : > { %6095 = vmatprep.mubr.msk.bf16.mxu0 %vm228_vm2, %v2735_v5  ;;  %v3350_v5 = vld [vmem:[#allocation2 + $0xa9] sm:$0xff]  ;;  %v4040_v16 = vld [vmem:[#allocation2 + $0x1a] sm:$0xff] }
 0x2dc   : > { %6096 = vmatmul.mubr.msk.bf16.vlgmr.msra.gmra.mxu0 %vm228_vm2, %v2736_v34  ;;  %v8121_v34 = vpack.c.bf16 %v3341_v48, %v3340_v19  ;;  %v4039_v57 = vld [vmem:[#allocation2 + $0xa] sm:$0xff]  ;;  %v4041_v40 = vld [vmem:[#allocation2 + $0x22] sm:$0xff]  ;;  %v4043_v35 = vld [vmem:[#allocation2 + $0x3a] sm:$0xff] }
 0x2dd   : > { %6099 = vmatprep.mubr.msk.bf16.mxu0 %vm228_vm2, %v7986_v62  ;;  %6162 = vmatpush3.bf16.msra.mxu0 %v3441_v42  ;;  %v3380_v42 = vpack.c.bf16 %v3353_v11, %v3352_v52  ;;  %v4075_v22 = vpack.c.bf16 %v4041_v40, %v4040_v16  ;;  %v4054_v23 = vld [vmem:[#allocation2 + $0xc2] sm:$0xff]  ;;  %v4055_v6 = vld [vmem:[#allocation2 + $0xca] sm:$0xff]  ;;  %v4058_v40 = vld [vmem:[#allocation2 + $0xf2] sm:$0xff] }
 0x2de   : > { %6379 = vmatprep.subr.msk.bf16.mxu0 %vm415_vm1, %v8020_v37  ;;  %6078 = vmatmul.mubr.msk.bf16.gmra.mxu1 %vm228_vm2, %v8053_v36  ;;  %v3355_v37 = vld [vmem:[#allocation2 + $0xe1] sm:$0xff] }
 0x2df   : > { %6081 = vmatprep.mubr.msk.bf16.mxu1 %vm228_vm2, %v8055_v61  ;;  %v3381_v47 = vpack.c.bf16 %v3355_v37, %v3354_v27 }
 0x2e4   : > { %6100 = vmatmul.mubr.msk.bf16.gmra.mxu0 %vm228_vm2, %v7992_v41 }
 0x2e5   : > { %6103 = vmatprep.mubr.msk.bf16.mxu0 %vm228_vm2, %v8005_v39 }
 0x2e6   : > { %6082 = vmatmul.mubr.msk.bf16.gmra.mxu1 %vm228_vm2, %v8065_v0 }
 0x2e7   : > { %6085 = vmatprep.mubr.msk.bf16.mxu1 %vm228_vm2, %v8067_v18 }
 0x2ec   : > { %6104 = vmatmul.mubr.msk.bf16.gmra.mxu0 %vm228_vm2, %v8007_v55 }
 0x2ed   : > { %6107 = vmatprep.mubr.msk.bf16.mxu0 %vm228_vm2, %v8029_v54 }
 0x2ee   : > { %6086 = vmatmul.mubr.msk.bf16.gmra.mxu1 %vm228_vm2, %v8077_v30 }
 0x2ef   : > { %6089 = vmatprep.mubr.msk.bf16.mxu1 %vm228_vm2, %v8079_v24 }
 0x2f4   : > { %6108 = vmatmul.mubr.msk.bf16.gmra.mxu0 %vm228_vm2, %v8031_v43 }
 0x2f5   : > { %6111 = vmatprep.mubr.msk.bf16.mxu0 %vm228_vm2, %v8041_v3 }
 0x2f6   : > { %6090 = vmatmul.mubr.msk.bf16.gmra.mxu1 %vm228_vm2, %v8089_v58 }
 0x2f7   : > { %6129 = vmatprep.mubr.msk.bf16.mxu1 %vm228_vm2, %v7986_v62  ;;  %v3344_v62 = vld [vmem:[#allocation2 + $0x61] sm:$0xff] }
 0x2f8   : > { %v8140_v50 = vpack.c.bf16 %v3345_v44, %v3344_v62  ;;  %v4046_v62 = vld [vmem:[#allocation2 + $0x62] sm:$0xff]  ;;  %v4047_v44 = vld [vmem:[#allocation2 + $0x6a] sm:$0xff] }
 0x2f9   : > { %v8243_v10 = vpack.c.bf16 %v4047_v44, %v4046_v62  ;;  %v4060_v44 = vld [vmem:[#allocation2 + $0x10a] sm:$0xff] }
 0x2fc   : > { %6112 = vmatmul.mubr.msk.bf16.gmra.mxu0 %vm228_vm2, %v8043_v33 }
 0x2fd   : > { %6115 = vmatprep.mubr.msk.bf16.mxu0 %vm228_vm2, %v8053_v36 }
 0x2fe   : > { %6130 = vmatmul.mubr.msk.bf16.vlgmr.msra.gmra.mxu1 %vm228_vm2, %v7992_v41  ;;  %v8136_v41 = vpack.c.bf16 %v3343_v26, %v3342_v28  ;;  %v4045_v28 = vld [vmem:[#allocation2 + $0x52] sm:$0xff] }
 0x2ff   : > { %6196 = vmatpush3.bf16.msra.mxu1 %v3642_v9  ;;  %6133 = vmatprep.mubr.msk.bf16.mxu1 %vm228_vm2, %v8005_v39  ;;  %v3351_v39 = vld [vmem:[#allocation2 + $0xb1] sm:$0xff]  ;;  %v3370_v9 = vld [vmem:[#allocation2 + $0x199] sm:$0xff] }
 0x300   : > { %6380 = vmatprep.subr.msk.bf16.mxu1 %vm415_vm1, %v8106_v21  ;;  %v4042_v21 = vld [vmem:[#allocation2 + $0x32] sm:$0xff] }
 0x304   : > { %6116 = vmatmul.mubr.msk.bf16.gmra.mxu0 %vm228_vm2, %v8055_v61 }
 0x305   : > { %6119 = vmatprep.mubr.msk.bf16.mxu0 %vm228_vm2, %v8065_v0 }
 0x306   : > { %6134 = vmatmul.mubr.msk.bf16.gmra.mxu1 %vm228_vm2, %v8007_v55  ;;  %v3379_v55 = vpack.c.bf16 %v3351_v39, %v3350_v5  ;;  %v4048_v5 = vld [vmem:[#allocation2 + $0x7a] sm:$0xff]  ;;  %v4049_v39 = vld [vmem:[#allocation2 + $0x82] sm:$0xff] }
 0x307   : > { %6137 = vmatprep.mubr.msk.bf16.mxu1 %vm228_vm2, %v8029_v54  ;;  %v3358_v54 = vld [vmem:[#allocation2 + $0x109] sm:$0xff]  ;;  %v8259_v1 = vpack.c.bf16 %v4049_v39, %v4048_v5 }
 0x30c   : > { %6120 = vmatmul.mubr.msk.bf16.gmra.mxu0 %vm228_vm2, %v8067_v18 }
 0x30d   : > { %6123 = vmatprep.mubr.msk.bf16.mxu0 %vm228_vm2, %v8077_v30 }
 0x30e   : > { %6138 = vmatmul.mubr.msk.bf16.gmra.mxu1 %vm228_vm2, %v8031_v43  ;;  %v3359_v43 = vld [vmem:[#allocation2 + $0x111] sm:$0xff] }
 0x30f   : > { %6141 = vmatprep.mubr.msk.bf16.mxu1 %vm228_vm2, %v8041_v3  ;;  %v3383_v51 = vpack.c.bf16 %v3359_v43, %v3358_v54  ;;  %v2733_v3 = vld [vmem:[#allocation2 + $0x198] sm:$0xff] }
 0x314   : > { %6124 = vmatmul.mubr.msk.bf16.gmra.mxu0 %vm228_vm2, %v8079_v24 }
 0x315   : > { %6163 = vmatprep.mubr.msk.bf16.mxu0 %vm228_vm2, %v3372_v60  ;;  %v3371_v60 = vld [vmem:[#allocation2 + $0x1a1] sm:$0xff] }
 0x316   : > { %6142 = vmatmul.mubr.msk.bf16.gmra.mxu1 %vm228_vm2, %v8043_v33  ;;  %v2734_v33 = vld [vmem:[#allocation2 + $0x1a0] sm:$0xff]  ;;  %v3389_v48 = vpack.c.bf16 %v3371_v60, %v3370_v9 }
 0x317   : > { %6145 = vmatprep.mubr.msk.bf16.mxu1 %vm228_vm2, %v8053_v36  ;;  %v2752_v36 = vpack.c.bf16 %v2734_v33, %v2733_v3  ;;  %v4052_v3 = vld [vmem:[#allocation2 + $0xaa] sm:$0xff]  ;;  %v4053_v33 = vld [vmem:[#allocation2 + $0xb2] sm:$0xff]  ;;  %v4059_v9 = vld [vmem:[#allocation2 + $0xfa] sm:$0xff] }
 0x31c   : > { %6164 = vmatmul.mubr.msk.bf16.vlgmr.msra.gmra.mxu0 %vm228_vm2, %v8115_v15 }
 0x31d   : > { %6167 = vmatprep.mubr.msk.bf16.mxu0 %vm228_vm2, %v8121_v34  ;;  %6230 = vmatpush3.bf16.msra.mxu0 %v3843_v38  ;;  %v8235_v38 = vpack.c.bf16 %v4043_v35, %v4042_v21 }
 0x31e   : > { %6381 = vmatprep.subr.msk.bf16.mxu0 %vm415_vm1, %v8126_v7  ;;  %6146 = vmatmul.mubr.msk.bf16.gmra.mxu1 %vm228_vm2, %v8055_v61  ;;  %v3385_v61 = vpack.c.bf16 %v3363_v17, %v3362_v46  ;;  %v4044_v7 = vld [vmem:[#allocation2 + $0x4a] sm:$0xff] }
 0x31f   : > { %6149 = vmatprep.mubr.msk.bf16.mxu1 %vm228_vm2, %v8065_v0  ;;  %v3387_v0 = vpack.c.bf16 %v3367_v53, %v3366_v59  ;;  %v8279_v59 = vpack.c.bf16 %v4053_v33, %v4052_v3  ;;  %v4064_v3 = vld [vmem:[#allocation2 + $0x13a] sm:$0xff]  ;;  %v4065_v33 = vld [vmem:[#allocation2 + $0x142] sm:$0xff] }
 0x324   : > { %6168 = vmatmul.mubr.msk.bf16.gmra.mxu0 %vm228_vm2, %v8136_v41 }
 0x325   : > { %6171 = vmatprep.mubr.msk.bf16.mxu0 %vm228_vm2, %v8140_v50 }
 0x326   : > { %6150 = vmatmul.mubr.msk.bf16.gmra.mxu1 %vm228_vm2, %v8067_v18  ;;  %v5426_v18 = vld [vmem:[%s9330_s2 + $0x10] sm:$0x3] }
 0x327   : > { %6153 = vmatprep.mubr.msk.bf16.mxu1 %vm228_vm2, %v8077_v30  ;;  %v3369_v30 = vld [vmem:[#allocation2 + $0x189] sm:$0xff]  ;;  %v4545_v19 = vsel %vm415_vm1, %v5426_v18, 0 }
 0x328   : > { %v3388_v49 = vpack.c.bf16 %v3369_v30, %v3368_v29 }
 0x32c   : > { %6172 = vmatmul.mubr.msk.bf16.gmra.mxu0 %vm228_vm2, %v8148_v8 }
 0x32d   : > { %6175 = vmatprep.mubr.msk.bf16.mxu0 %vm228_vm2, %v8152_v25 }
 0x32e   : > { %6154 = vmatmul.mubr.msk.bf16.gmra.mxu1 %vm228_vm2, %v8079_v24  ;;  %v4038_v24 = vld [vmem:[#allocation2 + $0x2] sm:$0xff] }
 0x32f   : > { %6157 = vmatprep.mubr.msk.bf16.mxu1 %vm228_vm2, %v8089_v58  ;;  %v4074_v58 = vpack.c.bf16 %v4039_v57, %v4038_v24  ;;  %v4056_v57 = vld [vmem:[#allocation2 + $0xda] sm:$0xff] }
 0x334   : > { %6176 = vmatmul.mubr.msk.bf16.gmra.mxu0 %vm228_vm2, %v3379_v55 }
 0x335   : > { %6179 = vmatprep.mubr.msk.bf16.mxu0 %vm228_vm2, %v3380_v42 }
 0x336   : > { %6158 = vmatmul.mubr.msk.bf16.gmra.mxu1 %vm228_vm2, %v2752_v36 }
 0x337   : > { %6197 = vmatprep.mubr.msk.bf16.mxu1 %vm228_vm2, %v8115_v15 }
 0x33c   : > { %6180 = vmatmul.mubr.msk.bf16.gmra.mxu0 %vm228_vm2, %v3381_v47 }
 0x33d   : > { %6183 = vmatprep.mubr.msk.bf16.mxu0 %vm228_vm2, %v3382_v12 }
 0x33e   : > { %6198 = vmatmul.mubr.msk.bf16.vlgmr.msra.gmra.mxu1 %vm228_vm2, %v8121_v34 }
 0x33f   : > { %6264 = vmatpush3.bf16.msra.mxu1 %v4143_v31  ;;  %6201 = vmatprep.mubr.msk.bf16.mxu1 %vm228_vm2, %v8136_v41  ;;  %v8281_v31 = vpack.c.bf16 %v4055_v6, %v4054_v23  ;;  %v4066_v6 = vld [vmem:[#allocation2 + $0x152] sm:$0xff] }
 0x340   : > { %6382 = vmatprep.subr.msk.bf16.mxu1 %vm415_vm1, %v5426_v18 }
 0x344   : > { %6184 = vmatmul.mubr.msk.bf16.gmra.mxu0 %vm228_vm2, %v3383_v51 }
 0x345   : > { %6187 = vmatprep.mubr.msk.bf16.mxu0 %vm228_vm2, %v3384_v13 }
 0x346   : > { %6202 = vmatmul.mubr.msk.bf16.gmra.mxu1 %vm228_vm2, %v8140_v50 }
 0x347   : > { %6205 = vmatprep.mubr.msk.bf16.mxu1 %vm228_vm2, %v8148_v8 }
 0x34c   : > { %6188 = vmatmul.mubr.msk.bf16.gmra.mxu0 %vm228_vm2, %v3385_v61 }
 0x34d   : > { %6191 = vmatprep.mubr.msk.bf16.mxu0 %vm228_vm2, %v3386_v45 }
 0x34e   : > { %6206 = vmatmul.mubr.msk.bf16.gmra.mxu1 %vm228_vm2, %v8152_v25 }
 0x34f   : > { %6209 = vmatprep.mubr.msk.bf16.mxu1 %vm228_vm2, %v3379_v55 }
 0x354   : > { %6192 = vmatmul.mubr.msk.bf16.gmra.mxu0 %vm228_vm2, %v3387_v0 }
 0x355   : > { %6231 = vmatprep.mubr.msk.bf16.mxu0 %vm228_vm2, %v8121_v34 }
 0x356   : > { %6210 = vmatmul.mubr.msk.bf16.gmra.mxu1 %vm228_vm2, %v3380_v42 }
 0x357   : > { %6213 = vmatprep.mubr.msk.bf16.mxu1 %vm228_vm2, %v3381_v47 }
 0x35c   : > { %6232 = vmatmul.mubr.msk.bf16.vlgmr.msra.gmra.mxu0 %vm228_vm2, %v8136_v41 }
 0x35d   : > { %6235 = vmatprep.mubr.msk.bf16.mxu0 %vm228_vm2, %v8140_v50  ;;  %6298 = vmatpush3.bf16.msra.mxu0 %v4344_v4  ;;  %v8241_v50 = vpack.c.bf16 %v4045_v28, %v4044_v7 }
 0x35e   : > { %6214 = vmatmul.mubr.msk.bf16.gmra.mxu1 %vm228_vm2, %v3382_v12 }
 0x35f   : > { %6217 = vmatprep.mubr.msk.bf16.mxu1 %vm228_vm2, %v3383_v51 }
 0x364   : > { %6236 = vmatmul.mubr.msk.bf16.gmra.mxu0 %vm228_vm2, %v8148_v8 }
 0x365   : > { %6239 = vmatprep.mubr.msk.bf16.mxu0 %vm228_vm2, %v8152_v25 }
 0x366   : > { %6218 = vmatmul.mubr.msk.bf16.gmra.mxu1 %vm228_vm2, %v3384_v13 }
 0x367   : > { %6221 = vmatprep.mubr.msk.bf16.mxu1 %vm228_vm2, %v3385_v61 }
 0x36c   : > { %6240 = vmatmul.mubr.msk.bf16.gmra.mxu0 %vm228_vm2, %v3379_v55  ;;  %v4050_v55 = vld [vmem:[#allocation2 + $0x92] sm:$0xff] }
 0x36d   : > { %6243 = vmatprep.mubr.msk.bf16.mxu0 %vm228_vm2, %v3380_v42  ;;  %v4051_v42 = vld [vmem:[#allocation2 + $0x9a] sm:$0xff] }
 0x36e   : > { %6222 = vmatmul.mubr.msk.bf16.gmra.mxu1 %vm228_vm2, %v3386_v45 }
 0x36f   : > { %6225 = vmatprep.mubr.msk.bf16.mxu1 %vm228_vm2, %v3387_v0 }
 0x374   : > { %6244 = vmatmul.mubr.msk.bf16.gmra.mxu0 %vm228_vm2, %v3381_v47 }
 0x375   : > { %6247 = vmatprep.mubr.msk.bf16.mxu0 %vm228_vm2, %v3382_v12  ;;  %v8261_v12 = vpack.c.bf16 %v4051_v42, %v4050_v55 }
 0x376   : > { %6226 = vmatmul.mubr.msk.bf16.gmra.mxu1 %vm228_vm2, %v3388_v49 }
 0x377   : > { %6265 = vmatprep.mubr.msk.bf16.mxu1 %vm228_vm2, %v4074_v58 }
 0x37c   : > { %6248 = vmatmul.mubr.msk.bf16.gmra.mxu0 %vm228_vm2, %v3383_v51 }
 0x37d   : > { %6251 = vmatprep.mubr.msk.bf16.mxu0 %vm228_vm2, %v3384_v13 }
 0x37e   : > { %v6063_v15 = vpop.f32.mrf.mxu1  ;;  %6266 = vmatmul.mubr.msk.bf16.vlgmr.msra.gmra.mxu1 %vm228_vm2, %v4075_v22 }
 0x37f   : > { %6332 = vmatpush3.bf16.msra.mxu1 %v4545_v19  ;;  %6269 = vmatprep.mubr.msk.bf16.mxu1 %vm228_vm2, %v8235_v38 }
 0x380   : > { %v2841_v34 = vpop.f32.mrf.mxu1 }
 0x382   : > { %v6064_v26 = vpop.f32.mrf.mxu1 }
 0x384   : > { %6252 = vmatmul.mubr.msk.bf16.gmra.mxu0 %vm228_vm2, %v3385_v61  ;;  %v2844_v41 = vpop.f32.mrf.mxu1 }
 0x385   : > { %6255 = vmatprep.mubr.msk.bf16.mxu0 %vm228_vm2, %v3386_v45 }
 0x386   : > { %v6067_v56 = vpop.f32.mrf.mxu1  ;;  %6270 = vmatmul.mubr.msk.bf16.gmra.mxu1 %vm228_vm2, %v8241_v50 }
 0x387   : > { %6273 = vmatprep.mubr.msk.bf16.mxu1 %vm228_vm2, %v8243_v10 }
 0x388   : > { %v2857_v8 = vpop.f32.mrf.mxu1 }
 0x38a   : > { %v6068_v11 = vpop.f32.mrf.mxu1 }
 0x38c   : > { %6256 = vmatmul.mubr.msk.bf16.gmra.mxu0 %vm228_vm2, %v3387_v0  ;;  %v2860_v63 = vpop.f32.mrf.mxu1 }
 0x38d   : > { %6259 = vmatprep.mubr.msk.bf16.mxu0 %vm228_vm2, %v3388_v49  ;;  %v4057_v49 = vld [vmem:[#allocation2 + $0xe2] sm:$0xff] }
 0x38e   : > { %v6071_v43 = vpop.f32.mrf.mxu1  ;;  %6274 = vmatmul.mubr.msk.bf16.gmra.mxu1 %vm228_vm2, %v8259_v1 }
 0x38f   : > { %6277 = vmatprep.mubr.msk.bf16.mxu1 %vm228_vm2, %v8261_v12 }
 0x390   : > { %v2873_v51 = vpop.f32.mrf.mxu1 }
 0x392   : > { %v6072_v17 = vpop.f32.mrf.mxu1 }
 0x394   : > { %6260 = vmatmul.mubr.msk.bf16.gmra.mxu0 %vm228_vm2, %v3389_v48  ;;  %v2876_v45 = vpop.f32.mrf.mxu1  ;;  %v8301_v48 = vpack.c.bf16 %v4059_v9, %v4058_v40 }
 0x395   : > { %6299 = vmatprep.mubr.msk.bf16.mxu0 %vm228_vm2, %v4075_v22  ;;  %v8299_v22 = vpack.c.bf16 %v4057_v49, %v4056_v57 }
 0x396   : > { %v6075_v18 = vpop.f32.mrf.mxu1  ;;  %6278 = vmatmul.mubr.msk.bf16.gmra.mxu1 %vm228_vm2, %v8279_v59 }
 0x397   : > { %6281 = vmatprep.mubr.msk.bf16.mxu1 %vm228_vm2, %v8281_v31 }
 0x398   : > { %v2889_v30 = vpop.f32.mrf.mxu1 }
 0x39a   : > { %v6076_v16 = vpop.f32.mrf.mxu1 }
 0x39c   : > { %v6097_v20 = vpop.f32.mrf.mxu0  ;;  %6300 = vmatmul.mubr.msk.bf16.vlgmr.msra.gmra.mxu0 %vm228_vm2, %v8235_v38  ;;  %v2892_v35 = vpop.f32.mrf.mxu1 }
 0x39d   : > { %v8251_v2 = vadd.f32 %v6097_v20, %v6063_v15  ;;  %6303 = vmatprep.mubr.msk.bf16.mxu0 %vm228_vm2, %v8241_v50 }
 0x39e   : > { %v3008_v25 = vpop.f32.mrf.mxu0  ;;  %6282 = vmatmul.mubr.msk.bf16.gmra.mxu1 %vm228_vm2, %v8299_v22 }
 0x39f   : > { %v8255_v52 = vadd.f32 %v3008_v25, %v2841_v34  ;;  %v6079_v34 = vpop.f32.mrf.mxu1  ;;  %6285 = vmatprep.mubr.msk.bf16.mxu1 %vm228_vm2, %v8301_v48  ;;  %v4063_v25 = vld [vmem:[#allocation2 + $0x12a] sm:$0xff] }
 0x3a0   : > { %v6098_v27 = vpop.f32.mrf.mxu0 }
 0x3a1   : > { %v8257_v37 = vadd.f32 %v6098_v27, %v6064_v26  ;;  %v2905_v26 = vpop.f32.mrf.mxu1 }
 0x3a2   : > { %v3011_v47 = vpop.f32.mrf.mxu0 }
 0x3a3   : > { %v8263_v54 = vadd.f32 %v3011_v47, %v2844_v41  ;;  %v4061_v41 = vld [vmem:[#allocation2 + $0x112] sm:$0xff]  ;;  %v6080_v20 = vpop.f32.mrf.mxu1 }
 0x3a4   : > { %v6101_v14 = vpop.f32.mrf.mxu0  ;;  %6304 = vmatmul.mubr.msk.bf16.gmra.mxu0 %vm228_vm2, %v8243_v10  ;;  %v8319_v55 = vpack.c.bf16 %v4061_v41, %v4060_v44 }
 0x3a5   : > { %v8271_v32 = vadd.f32 %v6101_v14, %v6067_v56  ;;  %6307 = vmatprep.mubr.msk.bf16.mxu0 %vm228_vm2, %v8259_v1 }
 0x3a6   : > { %v3024_v13 = vpop.f32.mrf.mxu0  ;;  %6286 = vmatmul.mubr.msk.bf16.gmra.mxu1 %vm228_vm2, %v8319_v55 }
 0x3a7   : > { %v8275_v46 = vadd.f32 %v3024_v13, %v2857_v8  ;;  %v4062_v8 = vld [vmem:[#allocation2 + $0x122] sm:$0xff] }
 0x3a8   : > { %v6102_v36 = vpop.f32.mrf.mxu0  ;;  %v8321_v27 = vpack.c.bf16 %v4063_v25, %v4062_v8 }
 0x3a9   : > { %v8277_v61 = vadd.f32 %v6102_v36, %v6068_v11  ;;  %v2908_v11 = vpop.f32.mrf.mxu1  ;;  %v4067_v36 = vld [vmem:[#allocation2 + $0x15a] sm:$0xff] }
 0x3aa   : > { %v3027_v53 = vpop.f32.mrf.mxu0  ;;  %6289 = vmatprep.mubr.msk.bf16.mxu1 %vm228_vm2, %v8321_v27 }
 0x3ab   : > { %v8283_v0 = vadd.f32 %v3027_v53, %v2860_v63  ;;  %v6083_v47 = vpop.f32.mrf.mxu1 }
 0x3ac   : > { %v6105_v4 = vpop.f32.mrf.mxu0  ;;  %6308 = vmatmul.mubr.msk.bf16.gmra.mxu0 %vm228_vm2, %v8261_v12 }
 0x3ad   : > { %v8291_v29 = vadd.f32 %v6105_v4, %v6071_v43  ;;  %6311 = vmatprep.mubr.msk.bf16.mxu0 %vm228_vm2, %v8279_v59  ;;  %v8339_v4 = vpack.c.bf16 %v4065_v33, %v4064_v3  ;;  %v4071_v3 = vld [vmem:[#allocation2 + $0x18a] sm:$0xff] }
 0x3ae   : > { %v3040_v24 = vpop.f32.mrf.mxu0 }
 0x3af   : > { %v8295_v58 = vadd.f32 %v3040_v24, %v2873_v51  ;;  %v2921_v51 = vpop.f32.mrf.mxu1  ;;  %v8341_v24 = vpack.c.bf16 %v4067_v36, %v4066_v6  ;;  %6290 = vmatmul.mubr.msk.bf16.gmra.mxu1 %vm228_vm2, %v8339_v4 }
 0x3b0   : > { %v6106_v60 = vpop.f32.mrf.mxu0 }
 0x3b1   : > { %v8297_v21 = vadd.f32 %v6106_v60, %v6072_v17  ;;  %v6084_v23 = vpop.f32.mrf.mxu1  ;;  %6293 = vmatprep.mubr.msk.bf16.mxu1 %vm228_vm2, %v8341_v24 }
 0x3b2   : > { %v3043_v19 = vpop.f32.mrf.mxu0 }
 0x3b3   : > { %v8303_v15 = vadd.f32 %v3043_v19, %v2876_v45  ;;  %v4069_v19 = vld [vmem:[#allocation2 + $0x172] sm:$0xff] }
 0x3b4   : > { %v6109_v7 = vpop.f32.mrf.mxu0  ;;  %6312 = vmatmul.mubr.msk.bf16.gmra.mxu0 %vm228_vm2, %v8281_v31 }
 0x3b5   : > { %v8311_v28 = vadd.f32 %v6109_v7, %v6075_v18  ;;  %6315 = vmatprep.mubr.msk.bf16.mxu0 %vm228_vm2, %v8299_v22  ;;  %v2924_v18 = vpop.f32.mrf.mxu1 }
 0x3b6   : > { %v3056_v62 = vpop.f32.mrf.mxu0 }
 0x3b7   : > { %v8315_v56 = vadd.f32 %v3056_v62, %v2889_v30  ;;  %v6087_v49 = vpop.f32.mrf.mxu1 }
 0x3b8   : > { %v6110_v5 = vpop.f32.mrf.mxu0 }
 0x3b9   : > { %v8317_v39 = vadd.f32 %v6110_v5, %v6076_v16  ;;  %v2937_v9 = vpop.f32.mrf.mxu1 }
 0x3ba   : > { %v3059_v42 = vpop.f32.mrf.mxu0 }
 0x3bb   : > { %v8323_v63 = vadd.f32 %v3059_v42, %v2892_v35  ;;  %v4068_v35 = vld [vmem:[#allocation2 + $0x16a] sm:$0xff]  ;;  %v6088_v7 = vpop.f32.mrf.mxu1 }
 0x3bc   : > { %v6113_v43 = vpop.f32.mrf.mxu0  ;;  %6316 = vmatmul.mubr.msk.bf16.gmra.mxu0 %vm228_vm2, %v8301_v48  ;;  %v8359_v41 = vpack.c.bf16 %v4069_v19, %v4068_v35 }
 0x3bd   : > { %v8331_v14 = vadd.f32 %v6113_v43, %v6079_v34  ;;  %6319 = vmatprep.mubr.msk.bf16.mxu0 %vm228_vm2, %v8319_v55  ;;  %v2940_v44 = vpop.f32.mrf.mxu1 }
 0x3be   : > { %v3072_v13 = vpop.f32.mrf.mxu0  ;;  %6294 = vmatmul.mubr.msk.bf16.gmra.mxu1 %vm228_vm2, %v8359_v41 }
 0x3bf   : > { %v8335_v17 = vadd.f32 %v3072_v13, %v2905_v26  ;;  %v6091_v25 = vpop.f32.mrf.mxu1  ;;  %6333 = vmatprep.mubr.msk.bf16.mxu1 %vm228_vm2, %v8235_v38  ;;  %v4070_v13 = vld [vmem:[#allocation2 + $0x182] sm:$0xff] }
 0x3c0   : > { %v6114_v45 = vpop.f32.mrf.mxu0 }
 0x3c1   : > { %v8337_v53 = vadd.f32 %v6114_v45, %v6080_v20  ;;  %v2953_v42 = vpop.f32.mrf.mxu1  ;;  %v8377_v45 = vpack.c.bf16 %v4071_v3, %v4070_v13 }
 0x3c2   : > { %v3075_v30 = vpop.f32.mrf.mxu0 }
 0x3c3   : > { %v8343_v57 = vadd.f32 %v3075_v30, %v2908_v11 }
 0x3c4   : > { %v6117_v16 = vpop.f32.mrf.mxu0  ;;  %6320 = vmatmul.mubr.msk.bf16.gmra.mxu0 %vm228_vm2, %v8321_v27 }
 0x3c5   : > { %v8351_v40 = vadd.f32 %v6117_v16, %v6083_v47  ;;  %6323 = vmatprep.mubr.msk.bf16.mxu0 %vm228_vm2, %v8339_v4 }
 0x3c6   : > { %v3088_v60 = vpop.f32.mrf.mxu0  ;;  %6334 = vmatmul.mubr.msk.bf16.vlgmr.msra.gmra.mxu1 %vm228_vm2, %v8241_v50 }
 0x3c7   : > { %v8355_v34 = vadd.f32 %v3088_v60, %v2921_v51  ;;  %v6092_v51 = vpop.f32.mrf.mxu1  ;;  %6337 = vmatprep.mubr.msk.bf16.mxu1 %vm228_vm2, %v8243_v10 }
 0x3c8   : > { %v6118_v26 = vpop.f32.mrf.mxu0 }
 0x3c9   : > { %v8357_v62 = vadd.f32 %v6118_v26, %v6084_v23  ;;  %v2956_v6 = vpop.f32.mrf.mxu1 }
 0x3ca   : > { %v3091_v20 = vpop.f32.mrf.mxu0 }
 0x3cb   : > { %v8361_v8 = vadd.f32 %v3091_v20, %v2924_v18  ;;  %v6131_v18 = vpop.f32.mrf.mxu1 }
 0x3cc   : > { %v6121_v5 = vpop.f32.mrf.mxu0  ;;  %6324 = vmatmul.mubr.msk.bf16.gmra.mxu0 %vm228_vm2, %v8341_v24 }
 0x3cd   : > { %v8369_v11 = vadd.f32 %v6121_v5, %v6087_v49  ;;  %6327 = vmatprep.mubr.msk.bf16.mxu0 %vm228_vm2, %v8359_v41  ;;  %v3306_v49 = vadd.f32 %v6131_v18, %v8251_v2 }
 0x3ce   : > { %v3104_v47 = vpop.f32.mrf.mxu0  ;;  %6338 = vmatmul.mubr.msk.bf16.gmra.mxu1 %vm228_vm2, %v8259_v1 }
 0x3cf   : > { %v8373_v43 = vadd.f32 %v3104_v47, %v2937_v9  ;;  %v3177_v9 = vpop.f32.mrf.mxu1  ;;  %6341 = vmatprep.mubr.msk.bf16.mxu1 %vm228_vm2, %v8261_v12 }
 0x3d0   : > { %v6122_v33 = vpop.f32.mrf.mxu0  ;;  %v3304_v35 = vadd.f32 %v3177_v9, %v8255_v52 }
 0x3d1   : > { %v8375_v23 = vadd.f32 %v6122_v33, %v6088_v7  ;;  %v6132_v7 = vpop.f32.mrf.mxu1 }
 0x3d2   : > { %v3107_v36 = vpop.f32.mrf.mxu0  ;;  %v3307_v50 = vadd.f32 %v6132_v7, %v8257_v37 }
 0x3d3   : > { %v8379_v38 = vadd.f32 %v3107_v36, %v2940_v44  ;;  %v3180_v2 = vpop.f32.mrf.mxu1 }
 0x3d4   : > { %v6125_v30 = vpop.f32.mrf.mxu0  ;;  %6328 = vmatmul.mubr.msk.bf16.gmra.mxu0 %vm228_vm2, %v8377_v45  ;;  %v3305_v5 = vadd.f32 %v3180_v2, %v8263_v54 }
 0x3d5   : > { %v8388_v16 = vadd.f32 %v6125_v30, %v6091_v25  ;;  %v6135_v10 = vpop.f32.mrf.mxu1 }
 0x3d6   : > { %v3120_v60 = vpop.f32.mrf.mxu0  ;;  %v3310_v52 = vadd.f32 %v6135_v10, %v8271_v32  ;;  %6342 = vmatmul.mubr.msk.bf16.gmra.mxu1 %vm228_vm2, %v8279_v59 }
 0x3d7   : > { %v8391_v19 = vadd.f32 %v3120_v60, %v2953_v42  ;;  %v3193_v37 = vpop.f32.mrf.mxu1  ;;  %6345 = vmatprep.mubr.msk.bf16.mxu1 %vm228_vm2, %v8281_v31 }
 0x3d8   : > { %v6126_v26 = vpop.f32.mrf.mxu0 }
 0x3d9   : > { %v8394_v44 = vadd.f32 %v6126_v26, %v6092_v51  ;;  %v3308_v51 = vadd.f32 %v3193_v37, %v8275_v46  ;;  %v6136_v54 = vpop.f32.mrf.mxu1 }
 0x3da   : > { %v3123_v20 = vpop.f32.mrf.mxu0  ;;  %v3311_v33 = vadd.f32 %v6136_v54, %v8277_v61 }
 0x3db   : > { %v8397_v47 = vadd.f32 %v3123_v20, %v2956_v6  ;;  %v3196_v1 = vpop.f32.mrf.mxu1 }
 0x3dc   : > { %v6165_v25 = vpop.f32.mrf.mxu0  ;;  %v3309_v32 = vadd.f32 %v3196_v1, %v8283_v0 }
 0x3dd   : > { %v8404_v42 = vadd.f32 %v6165_v25, %v3306_v49  ;;  %v6139_v12 = vpop.f32.mrf.mxu1 }
 0x3de   : > { %v3477_v13 = vpop.f32.mrf.mxu0  ;;  %v3314_v46 = vadd.f32 %v6139_v12, %v8291_v29  ;;  %6346 = vmatmul.mubr.msk.bf16.gmra.mxu1 %vm228_vm2, %v8299_v22 }
 0x3df   : > { %v8407_v3 = vadd.f32 %v3477_v13, %v3304_v35  ;;  %v3209_v9 = vpop.f32.mrf.mxu1  ;;  %6349 = vmatprep.mubr.msk.bf16.mxu1 %vm228_vm2, %v8301_v48 }
 0x3e0   : > { %v6166_v6 = vpop.f32.mrf.mxu0  ;;  %v3312_v60 = vadd.f32 %v3209_v9, %v8295_v58 }
 0x3e1   : > { %v8410_v36 = vadd.f32 %v6166_v6, %v3307_v50  ;;  %v6140_v7 = vpop.f32.mrf.mxu1 }
 0x3e2   : > { %v3480_v18 = vpop.f32.mrf.mxu0  ;;  %v3315_v26 = vadd.f32 %v6140_v7, %v8297_v21 }
 0x3e3   : > { %v8413_v30 = vadd.f32 %v3480_v18, %v3305_v5  ;;  %v3212_v59 = vpop.f32.mrf.mxu1 }
 0x3e4   : > { %v6169_v49 = vpop.f32.mrf.mxu0  ;;  %v3313_v29 = vadd.f32 %v3212_v59, %v8303_v15 }
 0x3e5   : > { %v8420_v61 = vadd.f32 %v6169_v49, %v3310_v52  ;;  %v6143_v31 = vpop.f32.mrf.mxu1 }
 0x3e6   : > { %v3493_v35 = vpop.f32.mrf.mxu0  ;;  %v3318_v58 = vadd.f32 %v6143_v31, %v8311_v28  ;;  %6350 = vmatmul.mubr.msk.bf16.gmra.mxu1 %vm228_vm2, %v8319_v55 }
 0x3e7   : > { %v8423_v0 = vadd.f32 %v3493_v35, %v3308_v51  ;;  %v3225_v52 = vpop.f32.mrf.mxu1  ;;  %6353 = vmatprep.mubr.msk.bf16.mxu1 %vm228_vm2, %v8321_v27 }
 0x3e8   : > { %v6170_v50 = vpop.f32.mrf.mxu0  ;;  %v3316_v25 = vadd.f32 %v3225_v52, %v8315_v56 }
 0x3e9   : > { %v8426_v2 = vadd.f32 %v6170_v50, %v3311_v33  ;;  %v6144_v51 = vpop.f32.mrf.mxu1 }
 0x3ea   : > { %v3496_v20 = vpop.f32.mrf.mxu0  ;;  %v3319_v13 = vadd.f32 %v6144_v51, %v8317_v39 }
 0x3eb   : > { %v8429_v5 = vadd.f32 %v3496_v20, %v3309_v32  ;;  %v3228_v22 = vpop.f32.mrf.mxu1 }
 0x3ec   : > { %v6173_v10 = vpop.f32.mrf.mxu0  ;;  %v3317_v28 = vadd.f32 %v3228_v22, %v8323_v63 }
 0x3ed   : > { %v8436_v21 = vadd.f32 %v6173_v10, %v3314_v46  ;;  %v6147_v48 = vpop.f32.mrf.mxu1 }
 0x3ee   : > { %v3509_v37 = vpop.f32.mrf.mxu0  ;;  %v3322_v56 = vadd.f32 %v6147_v48, %v8331_v14  ;;  %6354 = vmatmul.mubr.msk.bf16.gmra.mxu1 %vm228_vm2, %v8339_v4 }
 0x3ef   : > { %v8439_v15 = vadd.f32 %v3509_v37, %v3312_v60  ;;  %v3241_v18 = vpop.f32.mrf.mxu1  ;;  %6357 = vmatprep.mubr.msk.bf16.mxu1 %vm228_vm2, %v8341_v24 }
 0x3f0   : > { %v6174_v54 = vpop.f32.mrf.mxu0  ;;  %v3320_v12 = vadd.f32 %v3241_v18, %v8335_v17 }
 0x3f1   : > { %v8442_v33 = vadd.f32 %v6174_v54, %v3315_v26  ;;  %v6148_v49 = vpop.f32.mrf.mxu1 }
 0x3f2   : > { %v3512_v6 = vpop.f32.mrf.mxu0  ;;  %v3323_v9 = vadd.f32 %v6148_v49, %v8337_v53 }
 0x3f3   : > { %v8445_v1 = vadd.f32 %v3512_v6, %v3313_v29  ;;  %v3244_v55 = vpop.f32.mrf.mxu1 }
 0x3f4   : > { %v6177_v32 = vpop.f32.mrf.mxu0  ;;  %v3321_v14 = vadd.f32 %v3244_v55, %v8343_v57 }
 0x3f5   : > { %v8452_v39 = vadd.f32 %v6177_v32, %v3318_v58  ;;  %v6151_v27 = vpop.f32.mrf.mxu1 }
 0x3f6   : > { %v3525_v46 = vpop.f32.mrf.mxu0  ;;  %v3326_v17 = vadd.f32 %v6151_v27, %v8351_v40  ;;  %6358 = vmatmul.mubr.msk.bf16.gmra.mxu1 %vm228_vm2, %v8359_v41 }
 0x3f7   : > { %v8455_v63 = vadd.f32 %v3525_v46, %v3316_v25  ;;  %v3257_v59 = vpop.f32.mrf.mxu1  ;;  %6361 = vmatprep.mubr.msk.bf16.mxu1 %vm228_vm2, %v8377_v45 }
 0x3f8   : > { %v6178_v60 = vpop.f32.mrf.mxu0  ;;  %v3324_v29 = vadd.f32 %v3257_v59, %v8355_v34 }
 0x3f9   : > { %v8458_v35 = vadd.f32 %v6178_v60, %v3319_v13  ;;  %v6152_v31 = vpop.f32.mrf.mxu1 }
 0x3fa   : > { %v3528_v7 = vpop.f32.mrf.mxu0  ;;  %v3327_v58 = vadd.f32 %v6152_v31, %v8357_v62 }
 0x3fb   : > { %v8461_v26 = vadd.f32 %v3528_v7, %v3317_v28  ;;  %v3260_v4 = vpop.f32.mrf.mxu1  ;;  %v4073_v28 = vld [vmem:[#allocation2 + $0x1a2] sm:$0xff] }
 0x3fc   : > { %v6181_v50 = vpop.f32.mrf.mxu0  ;;  %v3325_v40 = vadd.f32 %v3260_v4, %v8361_v8  ;;  %v4072_v8 = vld [vmem:[#allocation2 + $0x19a] sm:$0xff] }
 0x3fd   : > { %v8468_v53 = vadd.f32 %v6181_v50, %v3322_v56  ;;  %v6155_v24 = vpop.f32.mrf.mxu1  ;;  %v4091_v18 = vpack.c.bf16 %v4073_v28, %v4072_v8 }
 0x3fe   : > { %v3541_v20 = vpop.f32.mrf.mxu0  ;;  %v3330_v34 = vadd.f32 %v6155_v24, %v8369_v11 }
 0x3ff   : > { %v8471_v57 = vadd.f32 %v3541_v20, %v3320_v12  ;;  %v3273_v13 = vpop.f32.mrf.mxu1  ;;  %6362 = vmatmul.mubr.msk.bf16.gmra.mxu1 %vm228_vm2, %v4091_v18 }
 0x400   : > { %v6182_v10 = vpop.f32.mrf.mxu0  ;;  %v3328_v54 = vadd.f32 %v3273_v13, %v8373_v43 }
 0x401   : > { %v8474_v52 = vadd.f32 %v6182_v10, %v3323_v9  ;;  %v6156_v48 = vpop.f32.mrf.mxu1 }
 0x402   : > { %v3544_v25 = vpop.f32.mrf.mxu0  ;;  %v3331_v56 = vadd.f32 %v6156_v48, %v8375_v23 }
 0x403   : > { %v8477_v37 = vadd.f32 %v3544_v25, %v3321_v14  ;;  %v3276_v11 = vpop.f32.mrf.mxu1 }
 0x404   : > { %v6185_v51 = vpop.f32.mrf.mxu0  ;;  %v3329_v45 = vadd.f32 %v3276_v11, %v8379_v38 }
 0x405   : > { %v8484_v62 = vadd.f32 %v6185_v51, %v3326_v17  ;;  %v6159_v49 = vpop.f32.mrf.mxu1 }
 0x406   : > { %v3557_v22 = vpop.f32.mrf.mxu0  ;;  %v3334_v43 = vadd.f32 %v6159_v49, %v8388_v16 }
 0x407   : > { %v8487_v6 = vadd.f32 %v3557_v22, %v3324_v29  ;;  %v3289_v55 = vpop.f32.mrf.mxu1 }
 0x408   : > { %v6186_v41 = vpop.f32.mrf.mxu0  ;;  %v3332_v23 = vadd.f32 %v3289_v55, %v8391_v19 }
 0x409   : > { %v8490_v32 = vadd.f32 %v6186_v41, %v3327_v58  ;;  %v6160_v27 = vpop.f32.mrf.mxu1 }
 0x40a   : > { %v3560_v12 = vpop.f32.mrf.mxu0  ;;  %v3335_v38 = vadd.f32 %v6160_v27, %v8394_v44 }
 0x40b   : > { %v8493_v46 = vadd.f32 %v3560_v12, %v3325_v40  ;;  %v3292_v59 = vpop.f32.mrf.mxu1 }
 0x40c   : > { %v6189_v9 = vpop.f32.mrf.mxu0  ;;  %v3333_v29 = vadd.f32 %v3292_v59, %v8397_v47 }
 0x40d   : > { %v8497_v60 = vadd.f32 %v6189_v9, %v3330_v34  ;;  %v6199_v31 = vpop.f32.mrf.mxu1 }
 0x40e   : > { %v3573_v14 = vpop.f32.mrf.mxu0  ;;  %v3807_v10 = vadd.f32 %v6199_v31, %v8404_v42 }
 0x40f   : > { %v8500_v7 = vadd.f32 %v3573_v14, %v3328_v54  ;;  %v3678_v4 = vpop.f32.mrf.mxu1 }
 0x410   : > { %v6190_v17 = vpop.f32.mrf.mxu0  ;;  %v3805_v25 = vadd.f32 %v3678_v4, %v8407_v3 }
 0x411   : > { %v8503_v50 = vadd.f32 %v6190_v17, %v3331_v56  ;;  %v6200_v24 = vpop.f32.mrf.mxu1 }
 0x412   : > { %v3576_v20 = vpop.f32.mrf.mxu0  ;;  %v3808_v51 = vadd.f32 %v6200_v24, %v8410_v36 }
 0x413   : > { %v8506_v16 = vadd.f32 %v3576_v20, %v3329_v45  ;;  %v3681_v13 = vpop.f32.mrf.mxu1 }
 0x414   : > { %v6193_v58 = vpop.f32.mrf.mxu0  ;;  %v8518_v22 = vadd.f32 %v3681_v13, %v8413_v30 }
 0x415   : > { %v8509_v19 = vadd.f32 %v6193_v58, %v3334_v43  ;;  %v6203_v8 = vpop.f32.mrf.mxu1 }
 0x416   : > { %v3589_v40 = vpop.f32.mrf.mxu0  ;;  %v3811_v28 = vadd.f32 %v6203_v8, %v8420_v61 }
 0x417   : > { %v8512_v44 = vadd.f32 %v3589_v40, %v3332_v23  ;;  %v3694_v56 = vpop.f32.mrf.mxu1 }
 0x418   : > { %v6194_v34 = vpop.f32.mrf.mxu0  ;;  %v8526_v41 = vadd.f32 %v3694_v56, %v8423_v0 }
 0x419   : > { %v8515_v47 = vadd.f32 %v6194_v34, %v3335_v38  ;;  %v6204_v18 = vpop.f32.mrf.mxu1 }
 0x41a   : > { %v3592_v54 = vpop.f32.mrf.mxu0  ;;  %v3812_v45 = vadd.f32 %v6204_v18, %v8426_v2 }
 0x41b   : > { %v8520_v42 = vadd.f32 %v3592_v54, %v3333_v29  ;;  %v3697_v49 = vpop.f32.mrf.mxu1 }
 0x41c   : > { %v6233_v48 = vpop.f32.mrf.mxu0  ;;  %v8534_v43 = vadd.f32 %v3697_v49, %v8429_v5 }
 0x41d   : > { %v8523_v3 = vadd.f32 %v6233_v48, %v3807_v10  ;;  %v6207_v9 = vpop.f32.mrf.mxu1 }
 0x41e   : > { %v3879_v36 = vpop.f32.mrf.mxu0  ;;  %v3815_v55 = vadd.f32 %v6207_v9, %v8436_v21 }
 0x41f   : > { %v8528_v11 = vadd.f32 %v3879_v36, %v3805_v25  ;;  %v3710_v14 = vpop.f32.mrf.mxu1 }
 0x420   : > { %v6234_v30 = vpop.f32.mrf.mxu0  ;;  %v8542_v27 = vadd.f32 %v3710_v14, %v8439_v15 }
 0x421   : > { %v8531_v12 = vadd.f32 %v6234_v30, %v3808_v51  ;;  %v6208_v38 = vpop.f32.mrf.mxu1 }
 0x422   : > { %v8536_v61 = vpop.f32.mrf.mxu0  ;;  %v3816_v17 = vadd.f32 %v6208_v38, %v8442_v33 }
 0x423   : > { %v3713_v29 = vpop.f32.mrf.mxu1 }
 0x424   : > { %v6237_v0 = vpop.f32.mrf.mxu0  ;;  %v8550_v20 = vadd.f32 %v3713_v29, %v8445_v1 }
 0x425   : > { %v8539_v23 = vadd.f32 %v6237_v0, %v3811_v28  ;;  %v6211_v31 = vpop.f32.mrf.mxu1 }
 0x426   : > { %v8544_v2 = vpop.f32.mrf.mxu0  ;;  %v3819_v58 = vadd.f32 %v6211_v31, %v8452_v39 }
 0x427   : > { %v3726_v4 = vpop.f32.mrf.mxu1 }
 0x428   : > { %v6238_v59 = vpop.f32.mrf.mxu0  ;;  %v8558_v40 = vadd.f32 %v3726_v4, %v8455_v63 }
 0x429   : > { %v8547_v5 = vadd.f32 %v6238_v59, %v3812_v45  ;;  %v6212_v25 = vpop.f32.mrf.mxu1 }
 0x42a   : > { %v8552_v21 = vpop.f32.mrf.mxu0  ;;  %v3820_v24 = vadd.f32 %v6212_v25, %v8458_v35 }
 0x42b   : > { %v3729_v51 = vpop.f32.mrf.mxu1 }
 0x42c   : > { %v6241_v10 = vpop.f32.mrf.mxu0  ;;  %v8566_v13 = vadd.f32 %v3729_v51, %v8461_v26 }
 0x42d   : > { %v8555_v15 = vadd.f32 %v6241_v10, %v3815_v55  ;;  %v6215_v54 = vpop.f32.mrf.mxu1 }
 0x42e   : > { %v8560_v33 = vpop.f32.mrf.mxu0  ;;  %v3823_v8 = vadd.f32 %v6215_v54, %v8468_v53 }
 0x42f   : > { %v3742_v48 = vpop.f32.mrf.mxu1 }
 0x430   : > { %v6242_v34 = vpop.f32.mrf.mxu0  ;;  %v8574_v56 = vadd.f32 %v3742_v48, %v8471_v57 }
 0x431   : > { %v8563_v1 = vadd.f32 %v6242_v34, %v3816_v17  ;;  %v6216_v36 = vpop.f32.mrf.mxu1 }
 0x432   : > { %v8568_v39 = vpop.f32.mrf.mxu0  ;;  %v3824_v18 = vadd.f32 %v6216_v36, %v8474_v52 }
 0x433   : > { %v3745_v30 = vpop.f32.mrf.mxu1 }
 0x434   : > { %v6245_v28 = vpop.f32.mrf.mxu0  ;;  %v8582_v49 = vadd.f32 %v3745_v30, %v8477_v37 }
 0x435   : > { %v8571_v63 = vadd.f32 %v6245_v28, %v3819_v58  ;;  %v6219_v9 = vpop.f32.mrf.mxu1 }
 0x436   : > { %v8576_v35 = vpop.f32.mrf.mxu0  ;;  %v3827_v55 = vadd.f32 %v6219_v9, %v8484_v62 }
 0x437   : > { %v3758_v14 = vpop.f32.mrf.mxu1 }
 0x438   : > { %v6246_v45 = vpop.f32.mrf.mxu0  ;;  %v8590_v38 = vadd.f32 %v3758_v14, %v8487_v6 }
 0x439   : > { %v8579_v26 = vadd.f32 %v6246_v45, %v3820_v24  ;;  %v6220_v17 = vpop.f32.mrf.mxu1 }
 0x43a   : > { %v8584_v53 = vpop.f32.mrf.mxu0  ;;  %9430 = vst [vmem:[#allocation19_spill] sm:$0xff] %v8590_v38  ;;  %v3828_v59 = vadd.f32 %v6220_v17, %v8490_v32 }
 0x43b   : > { %v3761_v31 = vpop.f32.mrf.mxu1 }
 0x43c   : > { %v6249_v0 = vpop.f32.mrf.mxu0  ;;  %v8598_v58 = vadd.f32 %v3761_v31, %v8493_v46 }
 0x43d   : > { %v8587_v57 = vadd.f32 %v6249_v0, %v3823_v8  ;;  %v6223_v10 = vpop.f32.mrf.mxu1 }
 0x43e   : > { %v8592_v52 = vpop.f32.mrf.mxu0  ;;  %9431 = vst [vmem:[#allocation9_spill] sm:$0xff] %v8598_v58  ;;  %v3831_v4 = vadd.f32 %v6223_v10, %v8497_v60 }
 0x43f   : > { %v3774_v24 = vpop.f32.mrf.mxu1 }
 0x440   : > { %v6250_v29 = vpop.f32.mrf.mxu0  ;;  %v8606_v34 = vadd.f32 %v3774_v24, %v8500_v7 }
 0x441   : > { %v8595_v37 = vadd.f32 %v6250_v29, %v3824_v18  ;;  %v6224_v51 = vpop.f32.mrf.mxu1 }
 0x442   : > { %v8600_v62 = vpop.f32.mrf.mxu0  ;;  %9432 = vst [vmem:[#allocation36_spill] sm:$0xff] %v8606_v34  ;;  %v3832_v54 = vadd.f32 %v6224_v51, %v8503_v50 }
 0x443   : > { %v3777_v28 = vpop.f32.mrf.mxu1 }
 0x444   : > { %v6253_v25 = vpop.f32.mrf.mxu0  ;;  %v8614_v48 = vadd.f32 %v3777_v28, %v8506_v16 }
 0x445   : > { %v8603_v6 = vadd.f32 %v6253_v25, %v3827_v55  ;;  %v6227_v36 = vpop.f32.mrf.mxu1 }
 0x446   : > { %v8608_v32 = vpop.f32.mrf.mxu0  ;;  %9434 = vst [vmem:[#allocation17_spill] sm:$0xff] %v8614_v48  ;;  %v3835_v18 = vadd.f32 %v6227_v36, %v8509_v19 }
 0x447   : > { %9433 = vst [vmem:[#allocation11_spill] sm:$0xff] %v8608_v32  ;;  %v3790_v30 = vpop.f32.mrf.mxu1 }
 0x448   : > { %v6254_v8 = vpop.f32.mrf.mxu0  ;;  %v8622_v9 = vadd.f32 %v3790_v30, %v8512_v44 }
 0x449   : > { %v8611_v46 = vadd.f32 %v6254_v8, %v3828_v59  ;;  %v6228_v55 = vpop.f32.mrf.mxu1 }
 0x44a   : > { %v8616_v60 = vpop.f32.mrf.mxu0  ;;  %9436 = vst [vmem:[#allocation34_spill] sm:$0xff] %v8622_v9  ;;  %v3836_v0 = vadd.f32 %v6228_v55, %v8515_v47 }
 0x44b   : > { %9435 = vst [vmem:[#allocation21_spill] sm:$0xff] %v8616_v60  ;;  %v3793_v17 = vpop.f32.mrf.mxu1 }
 0x44c   : > { %v6257_v45 = vpop.f32.mrf.mxu0  ;;  %v8630_v59 = vadd.f32 %v3793_v17, %v8520_v42 }
 0x44d   : > { %v8619_v7 = vadd.f32 %v6257_v45, %v3831_v4  ;;  %v6267_v29 = vpop.f32.mrf.mxu1 }
 0x44e   : > { %v8624_v50 = vpop.f32.mrf.mxu0  ;;  %9438 = vst [vmem:[#allocation18_spill] sm:$0xff] %v8630_v59  ;;  %v8635_v10 = vadd.f32 %v6267_v29, %v8523_v3 }
 0x44f   : > { %9437 = vst [vmem:[#allocation44_spill] sm:$0xff] %v8624_v50  ;;  %v4179_v4 = vpop.f32.mrf.mxu1 }
 0x450   : > { %v6258_v14 = vpop.f32.mrf.mxu0  ;;  %v8640_v47 = vadd.f32 %v4179_v4, %v8528_v11 }
 0x451   : > { %v8627_v16 = vadd.f32 %v6258_v14, %v3832_v54  ;;  %v6268_v24 = vpop.f32.mrf.mxu1 }
 0x452   : > { %v8632_v19 = vpop.f32.mrf.mxu0  ;;  %v8643_v54 = vadd.f32 %v6268_v24, %v8531_v12 }
 0x453   : > { %9439 = vst [vmem:[#allocation38_spill] sm:$0xff] %v8632_v19  ;;  %v8645_v8 = vpop.f32.mrf.mxu1 }
 0x454   : > { %v6261_v31 = vpop.f32.mrf.mxu0 }
 0x455   : > { %v4036_v44 = vadd.f32 %v6261_v31, %v3835_v18  ;;  %v6271_v36 = vpop.f32.mrf.mxu1 }
 0x456   : > { %v8637_v25 = vpop.f32.mrf.mxu0  ;;  %v8650_v3 = vadd.f32 %v6271_v36, %v8539_v23 }
 0x457   : > { %9440 = vst [vmem:[#allocation35_spill] sm:$0xff] %v8637_v25  ;;  %v8654_v45 = vpop.f32.mrf.mxu1 }
 0x458   : > { %v6262_v51 = vpop.f32.mrf.mxu0 }
 0x459   : > { %v4037_v42 = vadd.f32 %v6262_v51, %v3836_v0  ;;  %v6272_v30 = vpop.f32.mrf.mxu1 }
 0x45a   : > { %v8647_v28 = vpop.f32.mrf.mxu0  ;;  %v8657_v55 = vadd.f32 %v6272_v30, %v8547_v5 }
 0x45b   : > { %9441 = vst [vmem:[#allocation3_spill] sm:$0xff] %v8647_v28  ;;  %v8661_v0 = vpop.f32.mrf.mxu1 }
 0x45c   : > { %v8652_v18 = vpop.f32.mrf.mxu0 }
 0x45d   : > { %v6275_v17 = vpop.f32.mrf.mxu1 }
 0x45e   : > { %v4380_v11 = vpop.f32.mrf.mxu0  ;;  %v8664_v29 = vadd.f32 %v6275_v17, %v8555_v15 }
 0x45f   : > { %v8668_v31 = vpop.f32.mrf.mxu1 }
 0x460   : > { %v8659_v12 = vpop.f32.mrf.mxu0 }
 0x461   : > { %v6276_v24 = vpop.f32.mrf.mxu1 }
 0x462   : > { %v4383_v14 = vpop.f32.mrf.mxu0  ;;  %v8673_v51 = vadd.f32 %v6276_v24, %v8563_v1 }
 0x463   : > { %v8677_v36 = vpop.f32.mrf.mxu1 }
 0x464   : > { %v8666_v23 = vpop.f32.mrf.mxu0 }
 0x465   : > { %v6279_v30 = vpop.f32.mrf.mxu1 }
 0x466   : > { %v8670_v4 = vpop.f32.mrf.mxu0  ;;  %v8680_v28 = vadd.f32 %v6279_v30, %v8571_v63 }
 0x467   : > { %v8684_v17 = vpop.f32.mrf.mxu1 }
 0x468   : > { %v8675_v5 = vpop.f32.mrf.mxu0 }
 0x469   : > { %v6280_v59 = vpop.f32.mrf.mxu1 }
 0x46a   : > { %v8682_v15 = vpop.f32.mrf.mxu0  ;;  %v8687_v25 = vadd.f32 %v6280_v59, %v8579_v26 }
 0x46b   : > { %v8691_v1 = vpop.f32.mrf.mxu1 }
 0x46c   : > { %v8689_v9 = vpop.f32.mrf.mxu0 }
 0x46d   : > { %v6283_v24 = vpop.f32.mrf.mxu1 }
 0x46e   : > { %v8694_v19 = vadd.f32 %v6283_v24, %v8587_v57  ;;  %v8696_v48 = vpop.f32.mrf.mxu0 }
 0x46f   : > { %v8698_v63 = vpop.f32.mrf.mxu1 }
 0x470   : > { %9442 = vst [vmem:[#allocation5_spill] sm:$0xff] %v8694_v19  ;;  %v8703_v34 = vpop.f32.mrf.mxu0 }
 0x471   : > { %v6284_v30 = vpop.f32.mrf.mxu1 }
 0x472   : > { %v8701_v50 = vadd.f32 %v6284_v30, %v8595_v37  ;;  %v8710_v58 = vpop.f32.mrf.mxu0 }
 0x473   : > { %v8705_v26 = vpop.f32.mrf.mxu1 }
 0x474   : > { %9443 = vst [vmem:[#allocation23_spill] sm:$0xff] %v8701_v50  ;;  %9444 = vst [vmem:[#allocation10_spill] sm:$0xff] %v8705_v26  ;;  %v8717_v32 = vpop.f32.mrf.mxu0 }
 0x475   : > { %v6287_v59 = vpop.f32.mrf.mxu1 }
 0x476   : > { %v8708_v60 = vadd.f32 %v6287_v59, %v8603_v6  ;;  %v8724_v38 = vpop.f32.mrf.mxu0 }
 0x477   : > { %v8712_v57 = vpop.f32.mrf.mxu1 }
 0x478   : > { %9445 = vst [vmem:[#allocation40_spill] sm:$0xff] %v8708_v60  ;;  %9446 = vst [vmem:[#allocation13_spill] sm:$0xff] %v8712_v57  ;;  %v8731_v57 = vpop.f32.mrf.mxu0 }
 0x479   : > { %v6288_v24 = vpop.f32.mrf.mxu1 }
 0x47a   : > { %v8715_v19 = vadd.f32 %v6288_v24, %v8611_v46 }
 0x47b   : > { %v8719_v37 = vpop.f32.mrf.mxu1 }
 0x47c   : > { %9447 = vst [vmem:[#allocation20_spill] sm:$0xff] %v8715_v19  ;;  %9448 = vst [vmem:[#allocation25_spill] sm:$0xff] %v8719_v37  ;;  %v8737_v37 = vpop.f32.mrf.mxu0 }
 0x47d   : > { %v6291_v30 = vpop.f32.mrf.mxu1 }
 0x47e   : > { %v8722_v50 = vadd.f32 %v6291_v30, %v8619_v7 }
 0x47f   : > { %v8726_v6 = vpop.f32.mrf.mxu1 }
 0x480   : > { %9449 = vst [vmem:[#allocation37_spill] sm:$0xff] %v8722_v50  ;;  %9450 = vst [vmem:[#allocation22_spill] sm:$0xff] %v8726_v6  ;;  %v8743_v50 = vpop.f32.mrf.mxu0 }
 0x481   : > { %v6292_v59 = vpop.f32.mrf.mxu1 }
 0x482   : > { %v8729_v60 = vadd.f32 %v6292_v59, %v8627_v16  ;;  %v4007_v59 = vadd.f32 %v8536_v61, %v8518_v22 }
 0x483   : > { %v8733_v46 = vpop.f32.mrf.mxu1 }
 0x484   : > { %9451 = vst [vmem:[#allocation42_spill] sm:$0xff] %v8729_v60  ;;  %9452 = vst [vmem:[#allocation39_spill] sm:$0xff] %v8733_v46  ;;  %v8749_v60 = vpop.f32.mrf.mxu0 }
 0x485   : > { %v6295_v24 = vpop.f32.mrf.mxu1 }
 0x486   : > { %v8735_v19 = vadd.f32 %v6295_v24, %v4036_v44  ;;  %v4307_v44 = vadd.f32 %v8645_v8, %v4007_v59  ;;  %v4507_v24 = vadd.f32 %v4380_v11, %v8640_v47  ;;  %v4510_v8 = vadd.f32 %v8659_v12, %v8643_v54 }
 0x487   : > { %v8739_v26 = vpop.f32.mrf.mxu1 }
 0x488   : > { %9453 = vst [vmem:[#allocation4_spill] sm:$0xff] %v8735_v19  ;;  %9454 = vst [vmem:[#allocation7_spill] sm:$0xff] %v8739_v26  ;;  %v8759_v26 = vpop.f32.mrf.mxu0 }
 0x489   : > { %v6296_v7 = vpop.f32.mrf.mxu1 }
 0x48a   : > { %v8741_v30 = vadd.f32 %v6296_v7, %v4037_v42  ;;  %v4010_v42 = vadd.f32 %v8544_v2, %v8526_v41  ;;  %v4509_v7 = vadd.f32 %v8652_v18, %v8635_v10  ;;  %v4011_v41 = vadd.f32 %v8552_v21, %v8534_v43 }
 0x48b   : > { %v8745_v6 = vpop.f32.mrf.mxu1 }
 0x48c   : > { %9455 = vst [vmem:[#allocation27_spill] sm:$0xff] %v8741_v30  ;;  %9456 = vst [vmem:[#allocation12_spill] sm:$0xff] %v8745_v6  ;;  %v4508_v30 = vadd.f32 %v4383_v14, %v4307_v44  ;;  %v4310_v61 = vadd.f32 %v8654_v45, %v4010_v42  ;;  %v8777_v14 = vpop.f32.mrf.mxu0 }
 0x48d   : > { %v6335_v16 = vpop.f32.mrf.mxu1 }
 0x48e   : > { %v8764_v59 = vadd.f32 %v6335_v16, %v4509_v7  ;;  %v4511_v10 = vadd.f32 %v8670_v4, %v4310_v61  ;;  %v4014_v4 = vadd.f32 %v8560_v33, %v8542_v27  ;;  %v4513_v16 = vadd.f32 %v8666_v23, %v8650_v3  ;;  %v8792_v42 = vpop.f32.mrf.mxu0 }
 0x48f   : > { %v4581_v46 = vpop.f32.mrf.mxu1  ;;  %v4514_v61 = vadd.f32 %v8675_v5, %v8657_v55 }
 0x490   : > { %v8757_v6 = vadd.f32 %v4581_v46, %v4507_v24  ;;  %v4311_v46 = vadd.f32 %v8661_v0, %v4011_v41  ;;  %v4743_v43 = vsel %vm228_vm2, %v8764_v59, 0.0  ;;  %v4314_v0 = vadd.f32 %v8668_v31, %v4014_v4  ;;  %v8809_v55 = vpop.f32.mrf.mxu0 }
 0x491   : > { %v6336_v19 = vpop.f32.mrf.mxu1 }
 0x492   : > { %v4740_v18 = vsel %vm228_vm2, %v8757_v6, 0.0  ;;  %v8773_v11 = vadd.f32 %v6336_v19, %v4510_v8  ;;  %v4512_v44 = vadd.f32 %v8682_v15, %v4311_v46  ;;  %v4015_v8 = vadd.f32 %v8568_v39, %v8550_v20  ;;  %v8824_v4 = vpop.f32.mrf.mxu0 }
 0x493   : > { %v4584_v22 = vpop.f32.mrf.mxu1  ;;  %v4515_v31 = vadd.f32 %v8696_v48, %v4314_v0  ;;  %v4018_v20 = vadd.f32 %v8576_v35, %v8558_v40 }
 0x494   : > { %v8766_v47 = vadd.f32 %v4584_v22, %v4508_v30  ;;  %v4745_v24 = vsel %vm228_vm2, %v8773_v11, 0.0 }
 0x495   : > { %v6339_v2 = vpop.f32.mrf.mxu1 }
 0x496   : > { %v4741_v45 = vsel %vm228_vm2, %v8766_v47, 0.0  ;;  %v8796_v27 = vadd.f32 %v6339_v2, %v4513_v16  ;;  %v4518_v16 = vadd.f32 %v8703_v34, %v8673_v51  ;;  %v4463_v34 = vpop.f32.mrf.mxu0 }
 0x497   : > { %v4742_v54 = vadd.f32 %v4741_v45, %v4740_v18  ;;  %v4597_v12 = vpop.f32.mrf.mxu1  ;;  %v4315_v18 = vadd.f32 %v8677_v36, %v4015_v8  ;;  %v4318_v36 = vadd.f32 %v8684_v17, %v4018_v20 }
 0x498   : > { %v8782_v21 = vadd.f32 %v4597_v12, %v4511_v10  ;;  %v4751_v45 = vsel %vm228_vm2, %v8796_v27, 0.0  ;;  %v4517_v12 = vadd.f32 %v8689_v9, %v8664_v29 }
 0x499   : > { %v4744_v30 = vadd.f32 %v4743_v43, %v4742_v54  ;;  %v6340_v19 = vpop.f32.mrf.mxu1  ;;  %v4516_v46 = vadd.f32 %v8710_v58, %v4315_v18  ;;  %v4519_v17 = vadd.f32 %v8724_v38, %v4318_v36  ;;  %v4023_v18 = vadd.f32 %v8600_v62, %v8582_v49  ;;  %v9458_v36 = vld [vmem:[#allocation19_spill] sm:$0xff] }
 0x49a   : > { %v4747_v33 = vsel %vm228_vm2, %v8782_v21, 0.0  ;;  %v8805_v41 = vadd.f32 %v6340_v19, %v4514_v61 }
 0x49b   : > { %v4746_v7 = vadd.f32 %v4745_v24, %v4744_v30  ;;  %v4600_v22 = vpop.f32.mrf.mxu1 }
 0x49c   : > { %v8800_v3 = vadd.f32 %v4600_v22, %v4512_v44  ;;  %v4753_v43 = vsel %vm228_vm2, %v8805_v41, 0.0  ;;  %v4019_v44 = vadd.f32 %v8584_v53, %v8566_v13  ;;  %v4022_v13 = vadd.f32 %v8592_v52, %v8574_v56 }
 0x49d   : > { %v4748_v23 = vadd.f32 %v4747_v33, %v4746_v7  ;;  %v6343_v15 = vpop.f32.mrf.mxu1 }
 0x49e   : > { %v4749_v10 = vsel %vm228_vm2, %v8800_v3, 0.0  ;;  %v8828_v40 = vadd.f32 %v6343_v15, %v4517_v12  ;;  %v4319_v22 = vadd.f32 %v8691_v1, %v4019_v44  ;;  %v4322_v1 = vadd.f32 %v8698_v63, %v4022_v13 }
 0x49f   : > { %v4750_v5 = vadd.f32 %v4749_v10, %v4748_v23  ;;  %v4613_v2 = vpop.f32.mrf.mxu1  ;;  %v4521_v23 = vadd.f32 %v8717_v32, %v8680_v28 }
 0x4a0   : > { %v8814_v54 = vadd.f32 %v4613_v2, %v4515_v31  ;;  %v4759_v61 = vsel %vm228_vm2, %v8828_v40, 0.0  ;;  %v4520_v15 = vadd.f32 %v8737_v37, %v4319_v22  ;;  %v8854_v31 = vpop.f32.mrf.mxu0  ;;  %v4522_v2 = vadd.f32 %v8731_v57, %v8687_v25 }
 0x4a1   : > { %v4752_v39 = vadd.f32 %v4751_v45, %v4750_v5  ;;  %v6344_v48 = vpop.f32.mrf.mxu1  ;;  %v4523_v63 = vadd.f32 %v8749_v60, %v4322_v1 }
 0x4a2   : > { %v4755_v35 = vsel %vm228_vm2, %v8814_v54, 0.0  ;;  %v8837_v24 = vadd.f32 %v6344_v48, %v4518_v16  ;;  %v4476_v25 = vpop.f32.mrf.mxu0  ;;  %v9457_v48 = vld [vmem:[#allocation10_spill] sm:$0xff] }
 0x4a3   : > { %v4754_v30 = vadd.f32 %v4753_v43, %v4752_v39  ;;  %v4616_v19 = vpop.f32.mrf.mxu1  ;;  %v4323_v12 = vadd.f32 %v9457_v48, %v4023_v18  ;;  %v9468_v48 = vld [vmem:[#allocation40_spill] sm:$0xff] }
 0x4a4   : > { %v8832_v9 = vadd.f32 %v4616_v19, %v4516_v46  ;;  %v4761_v8 = vsel %vm228_vm2, %v8837_v24, 0.0  ;;  %v9460_v19 = vld [vmem:[#allocation5_spill] sm:$0xff] }
 0x4a5   : > { %v4756_v58 = vadd.f32 %v4755_v35, %v4754_v30  ;;  %v6347_v29 = vpop.f32.mrf.mxu1  ;;  %v9459_v30 = vld [vmem:[#allocation11_spill] sm:$0xff]  ;;  %v4525_v16 = vadd.f32 %v8743_v50, %v9460_v19  ;;  %v4524_v35 = vadd.f32 %v8777_v14, %v4323_v12  ;;  %v4529_v12 = vadd.f32 %v8792_v42, %v9468_v48 }
 0x4a6   : > { %v4757_v0 = vsel %vm228_vm2, %v8832_v9, 0.0  ;;  %v8858_v56 = vadd.f32 %v6347_v29, %v4521_v23  ;;  %v4026_v49 = vadd.f32 %v9459_v30, %v9458_v36  ;;  %v9461_v29 = vld [vmem:[#allocation13_spill] sm:$0xff]  ;;  %v9469_v30 = vld [vmem:[#allocation22_spill] sm:$0xff] }
 0x4a7   : > { %v4758_v51 = vadd.f32 %v4757_v0, %v4756_v58  ;;  %v4629_v7 = vpop.f32.mrf.mxu1  ;;  %v9464_v23 = vld [vmem:[#allocation21_spill] sm:$0xff] }
 0x4a8   : > { %v8844_v33 = vadd.f32 %v4629_v7, %v4519_v17  ;;  %v4767_v46 = vsel %vm228_vm2, %v8858_v56, 0.0  ;;  %v4326_v44 = vadd.f32 %v9461_v29, %v4026_v49  ;;  %v6326_v17 = vpop.f32.mrf.mxu0  ;;  %v9462_v7 = vld [vmem:[#allocation23_spill] sm:$0xff] }
 0x4a9   : > { %v4760_v53 = vadd.f32 %v4759_v61, %v4758_v51  ;;  %v6348_v38 = vpop.f32.mrf.mxu1  ;;  %v4526_v22 = vadd.f32 %v8759_v26, %v9462_v7 }
 0x4aa   : > { %v4763_v52 = vsel %vm228_vm2, %v8844_v33, 0.0  ;;  %v8867_v45 = vadd.f32 %v6348_v38, %v4522_v2  ;;  %v9463_v38 = vld [vmem:[#allocation9_spill] sm:$0xff]  ;;  %v4479_v26 = vpop.f32.mrf.mxu0 }
 0x4ab   : > { %v4762_v10 = vadd.f32 %v4761_v8, %v4760_v53  ;;  %v4632_v5 = vpop.f32.mrf.mxu1  ;;  %v4527_v8 = vadd.f32 %v8809_v55, %v4326_v44 }
 0x4ac   : > { %v8862_v32 = vadd.f32 %v4632_v5, %v4520_v15  ;;  %v4769_v58 = vsel %vm228_vm2, %v8867_v45, 0.0  ;;  %v4027_v15 = vadd.f32 %v9464_v23, %v9463_v38  ;;  %v9473_v23 = vld [vmem:[#allocation39_spill] sm:$0xff] }
 0x4ad   : > { %v4764_v28 = vadd.f32 %v4763_v52, %v4762_v10  ;;  %v6351_v37 = vpop.f32.mrf.mxu1  ;;  %v9465_v52 = vld [vmem:[#allocation25_spill] sm:$0xff] }
 0x4ae   : > { %v4765_v20 = vsel %vm228_vm2, %v8862_v32, 0.0  ;;  %v8886_v61 = vadd.f32 %v6351_v37, %v4525_v16  ;;  %v9470_v16 = vld [vmem:[#allocation20_spill] sm:$0xff] }
 0x4af   : > { %v4766_v57 = vadd.f32 %v4765_v20, %v4764_v28  ;;  %v4645_v39 = vpop.f32.mrf.mxu1  ;;  %v4327_v28 = vadd.f32 %v9465_v52, %v4027_v15  ;;  %v9467_v20 = vld [vmem:[#allocation44_spill] sm:$0xff] }
 0x4b0   : > { %v8874_v43 = vadd.f32 %v4645_v39, %v4523_v63  ;;  %v4775_v37 = vsel %vm228_vm2, %v8886_v61, 0.0  ;;  %v9466_v63 = vld [vmem:[#allocation36_spill] sm:$0xff] }
 0x4b1   : > { %v4768_v62 = vadd.f32 %v4767_v46, %v4766_v57  ;;  %v6352_v60 = vpop.f32.mrf.mxu1  ;;  %v4030_v57 = vadd.f32 %v9467_v20, %v9466_v63  ;;  %v4528_v46 = vadd.f32 %v4463_v34, %v4327_v28 }
 0x4b2   : > { %v4771_v13 = vsel %vm228_vm2, %v8874_v43, 0.0  ;;  %v8895_v1 = vadd.f32 %v6352_v60, %v4526_v22 }
 0x4b3   : > { %v4770_v0 = vadd.f32 %v4769_v58, %v4768_v62  ;;  %v4648_v51 = vpop.f32.mrf.mxu1  ;;  %v4330_v49 = vadd.f32 %v9469_v30, %v4030_v57  ;;  %v6329_v62 = vpop.f32.mrf.mxu0 }
 0x4b4   : > { %v8890_v53 = vadd.f32 %v4648_v51, %v4524_v35  ;;  %v4777_v36 = vsel %vm228_vm2, %v8895_v1, 0.0  ;;  %v4530_v35 = vadd.f32 %v8824_v4, %v9470_v16  ;;  %v9472_v51 = vld [vmem:[#allocation38_spill] sm:$0xff] }
 0x4b5   : > { %v4772_v50 = vadd.f32 %v4771_v13, %v4770_v0  ;;  %v6355_v14 = vpop.f32.mrf.mxu1  ;;  %v9471_v0 = vld [vmem:[#allocation17_spill] sm:$0xff]  ;;  %v4531_v22 = vadd.f32 %v4476_v25, %v4330_v49  ;;  %v4492_v38 = vpop.f32.mrf.mxu0 }
 0x4b6   : > { %v4773_v10 = vsel %vm228_vm2, %v8890_v53, 0.0  ;;  %v8913_v58 = vadd.f32 %v6355_v14, %v4529_v12  ;;  %v4031_v7 = vadd.f32 %v9472_v51, %v9471_v0 }
 0x4b7   : > { %v4774_v5 = vadd.f32 %v4773_v10, %v4772_v50  ;;  %v4661_v2 = vpop.f32.mrf.mxu1  ;;  %v6330_v48 = vpop.f32.mrf.mxu0 }
 0x4b8   : > { %v8902_v18 = vadd.f32 %v4661_v2, %v4527_v8  ;;  %v4331_v15 = vadd.f32 %v9473_v23, %v4031_v7  ;;  %v4783_v8 = vsel %vm228_vm2, %v8913_v58, 0.0  ;;  %v9475_v2 = vld [vmem:[#allocation35_spill] sm:$0xff] }
 0x4b9   : > { %v4776_v39 = vadd.f32 %v4775_v37, %v4774_v5  ;;  %v6356_v55 = vpop.f32.mrf.mxu1  ;;  %v9474_v5 = vld [vmem:[#allocation34_spill] sm:$0xff]  ;;  %v9476_v37 = vld [vmem:[#allocation37_spill] sm:$0xff]  ;;  %v4495_v7 = vpop.f32.mrf.mxu0 }
 0x4ba   : > { %v4779_v29 = vsel %vm228_vm2, %v8902_v18, 0.0  ;;  %v8921_v13 = vadd.f32 %v6356_v55, %v4530_v35  ;;  %v4034_v52 = vadd.f32 %v9475_v2, %v9474_v5  ;;  %v4533_v63 = vadd.f32 %v8854_v31, %v9476_v37  ;;  %v9480_v31 = vld [vmem:[#allocation3_spill] sm:$0xff] }
 0x4bb   : > { %v4778_v60 = vadd.f32 %v4777_v36, %v4776_v39  ;;  %v4664_v19 = vpop.f32.mrf.mxu1  ;;  %v4532_v20 = vadd.f32 %v4479_v26, %v4331_v15  ;;  %v9477_v39 = vld [vmem:[#allocation7_spill] sm:$0xff]  ;;  %v9478_v36 = vld [vmem:[#allocation42_spill] sm:$0xff] }
 0x4bc   : > { %v8917_v44 = vadd.f32 %v4664_v19, %v4528_v46  ;;  %v4785_v57 = vsel %vm228_vm2, %v8921_v13, 0.0  ;;  %v4334_v55 = vadd.f32 %v9477_v39, %v4034_v52  ;;  %v4534_v30 = vadd.f32 %v6326_v17, %v9478_v36 }
 0x4bd   : > { %v4780_v42 = vadd.f32 %v4779_v29, %v4778_v60  ;;  %v6359_v34 = vpop.f32.mrf.mxu1  ;;  %v9479_v29 = vld [vmem:[#allocation18_spill] sm:$0xff] }
 0x4be   : > { %v4781_v50 = vsel %vm228_vm2, %v8917_v44, 0.0  ;;  %v4734_v49 = vadd.f32 %v6359_v34, %v4533_v63  ;;  %v4035_v26 = vadd.f32 %v9480_v31, %v9479_v29 }
 0x4bf   : > { %v4782_v4 = vadd.f32 %v4781_v50, %v4780_v42  ;;  %v4677_v14 = vpop.f32.mrf.mxu1  ;;  %v4535_v42 = vadd.f32 %v4492_v38, %v4334_v55 }
 0x4c0   : > { %v8928_v10 = vadd.f32 %v4677_v14, %v4531_v22  ;;  %v4791_v17 = vsel %vm228_vm2, %v4734_v49, 0.0 }
 0x4c1   : > { %v4784_v28 = vadd.f32 %v4783_v8, %v4782_v4  ;;  %v6360_v25 = vpop.f32.mrf.mxu1  ;;  %v9481_v4 = vld [vmem:[#allocation12_spill] sm:$0xff] }
 0x4c2   : > { %v4787_v60 = vsel %vm228_vm2, %v8928_v10, 0.0  ;;  %v4735_v0 = vadd.f32 %v6360_v25, %v4534_v30  ;;  %v4335_v14 = vadd.f32 %v9481_v4, %v4035_v26  ;;  %v9482_v8 = vld [vmem:[#allocation4_spill] sm:$0xff]  ;;  %v9483_v25 = vld [vmem:[#allocation27_spill] sm:$0xff] }
 0x4c3   : > { %v4786_v12 = vadd.f32 %v4785_v57, %v4784_v28  ;;  %v4680_v46 = vpop.f32.mrf.mxu1  ;;  %v4537_v5 = vadd.f32 %v6329_v62, %v9482_v8  ;;  %v4538_v37 = vadd.f32 %v6330_v48, %v9483_v25 }
 0x4c4   : > { %v4733_v19 = vadd.f32 %v4680_v46, %v4532_v20  ;;  %v4536_v2 = vadd.f32 %v4495_v7, %v4335_v14  ;;  %v4793_v52 = vsel %vm228_vm2, %v4735_v0, 0.0 }
 0x4c5   : > { %v4788_v16 = vadd.f32 %v4787_v60, %v4786_v12  ;;  %v6363_v35 = vpop.f32.mrf.mxu1 }
 0x4c6   : > { %v4789_v51 = vsel %vm228_vm2, %v4733_v19, 0.0  ;;  %v4738_v63 = vadd.f32 %v6363_v35, %v4537_v5 }
 0x4c7   : > { %v4790_v22 = vadd.f32 %v4789_v51, %v4788_v16  ;;  %v4693_v50 = vpop.f32.mrf.mxu1 }
 0x4c8   : > { %v4736_v34 = vadd.f32 %v4693_v50, %v4535_v42  ;;  %v4799_v36 = vsel %vm228_vm2, %v4738_v63, 0.0 }
 0x4c9   : > { %v4792_v23 = vadd.f32 %v4791_v17, %v4790_v22  ;;  %v6364_v15 = vpop.f32.mrf.mxu1 }
 0x4ca   : > { %v4795_v20 = vsel %vm228_vm2, %v4736_v34, 0.0  ;;  %v4739_v55 = vadd.f32 %v6364_v15, %v4538_v37 }
 0x4cb   : > { %v4794_v28 = vadd.f32 %v4793_v52, %v4792_v23  ;;  %v4696_v38 = vpop.f32.mrf.mxu1 }
 0x4cc   : > { %v4737_v57 = vadd.f32 %v4696_v38, %v4536_v2  ;;  %v4801_v62 = vsel %vm228_vm2, %v4739_v55, 0.0 }
 0x4cd   : > { %v4796_v39 = vadd.f32 %v4795_v20, %v4794_v28 }
 0x4ce   : > { %v4797_v12 = vsel %vm228_vm2, %v4737_v57, 0.0 }
 0x4cf   : > { %v4798_v46 = vadd.f32 %v4797_v12, %v4796_v39 }
 0x4d1   : > { %v4800_v30 = vadd.f32 %v4799_v36, %v4798_v46 }
 0x4d3   : > { %v4802_v60 = vadd.f32 %v4801_v62, %v4800_v30 }
 0x4d5   : > { %v4803_v16 = vrot.slane %v4802_v60, 4 }
 0x4d7   : > { %v4804_v29 = vadd.f32 %v4803_v16, %v4802_v60 }
 0x4d9   : > { %v4805_v31 = vrot.slane %v4804_v29, 2 }
 0x4db   : > { %v4806_v26 = vadd.f32 %v4805_v31, %v4804_v29 }
 0x4dd   : > { %v4807_v48 = vrot.slane %v4806_v26, 1 }
 0x4df   : > { %v4808_v35 = vadd.f32 %v4807_v48, %v4806_v26 }
 0x4e1   : > { %v4809_v42 = vmul.f32 0.00390625, %v4808_v35 }
 0x4e3   : > { %v8953_v51 = vsub.f32 %v8832_v9, %v4809_v42  ;;  %v8956_v7 = vsub.f32 %v8844_v33, %v4809_v42  ;;  %v8959_v22 = vsub.f32 %v8862_v32, %v4809_v42  ;;  %v8962_v50 = vsub.f32 %v8858_v56, %v4809_v42 }
 0x4e4   : > { %v8965_v4 = vsub.f32 %v8867_v45, %v4809_v42  ;;  %v8968_v14 = vsub.f32 %v8874_v43, %v4809_v42  ;;  %v8971_v17 = vsub.f32 %v8890_v53, %v4809_v42  ;;  %v8974_v9 = vsub.f32 %v8886_v61, %v4809_v42 }
 0x4e5   : > { %v8977_v33 = vsub.f32 %v8895_v1, %v4809_v42  ;;  %v8980_v32 = vsub.f32 %v8902_v18, %v4809_v42  ;;  %v8983_v56 = vsub.f32 %v8917_v44, %v4809_v42  ;;  %v8986_v45 = vsub.f32 %v8913_v58, %v4809_v42 }
 0x4e6   : > { %v8989_v43 = vsub.f32 %v8921_v13, %v4809_v42  ;;  %v8992_v53 = vsub.f32 %v8928_v10, %v4809_v42  ;;  %v8994_v61 = vsub.f32 %v4733_v19, %v4809_v42  ;;  %v8996_v23 = vsub.f32 %v4734_v49, %v4809_v42 }
 0x4e7   : > { %v8998_v1 = vsub.f32 %v4735_v0, %v4809_v42  ;;  %v9000_v18 = vsub.f32 %v4736_v34, %v4809_v42  ;;  %v9002_v15 = vsub.f32 %v4737_v57, %v4809_v42  ;;  %v9004_v44 = vsub.f32 %v4738_v63, %v4809_v42 }
 0x4e8   : > { %v9006_v58 = vsub.f32 %v4739_v55, %v4809_v42  ;;  %v9009_v13 = vsub.f32 %v8757_v6, %v4809_v42  ;;  %v9012_v10 = vsub.f32 %v8766_v47, %v4809_v42  ;;  %v9015_v19 = vsub.f32 %v8764_v59, %v4809_v42 }
 0x4e9   : > { %v9018_v49 = vsub.f32 %v8773_v11, %v4809_v42  ;;  %v9025_v8 = vsub.f32 %v8782_v21, %v4809_v42  ;;  %v9030_v47 = vsub.f32 %v8800_v3, %v4809_v42  ;;  %v9037_v52 = vsub.f32 %v8796_v27, %v4809_v42 }
 0x4ea   : > { %v4842_v0 = vmul.f32 %v9009_v13, %v9009_v13  ;;  %v4843_v34 = vmul.f32 %v9012_v10, %v9012_v10  ;;  %v4844_v6 = vmul.f32 %v9015_v19, %v9015_v19  ;;  %v9043_v3 = vsub.f32 %v8805_v41, %v4809_v42 }
 0x4eb   : > { %v4845_v59 = vmul.f32 %v9018_v49, %v9018_v49  ;;  %v4846_v21 = vmul.f32 %v9025_v8, %v9025_v8  ;;  %v4847_v25 = vmul.f32 %v9030_v47, %v9030_v47  ;;  %v9049_v20 = vsub.f32 %v8814_v54, %v4809_v42 }
 0x4ec   : > { %v4874_v11 = vsel %vm228_vm2, %v4842_v0, 0.0  ;;  %v4875_v5 = vsel %vm228_vm2, %v4843_v34, 0.0  ;;  %v4877_v28 = vsel %vm228_vm2, %v4844_v6, 0.0  ;;  %v4848_v27 = vmul.f32 %v9037_v52, %v9037_v52 }
 0x4ed   : > { %v4876_v2 = vadd.f32 %v4875_v5, %v4874_v11  ;;  %v4879_v37 = vsel %vm228_vm2, %v4845_v59, 0.0  ;;  %v4881_v57 = vsel %vm228_vm2, %v4846_v21, 0.0  ;;  %v4849_v55 = vmul.f32 %v9043_v3, %v9043_v3 }
 0x4ee   : > { %v4883_v41 = vsel %vm228_vm2, %v4847_v25, 0.0  ;;  %v9058_v46 = vsub.f32 %v8828_v40, %v4809_v42  ;;  %v4850_v36 = vmul.f32 %v9049_v20, %v9049_v20  ;;  %v4885_v54 = vsel %vm228_vm2, %v4848_v27, 0.0 }
 0x4ef   : > { %v4878_v38 = vadd.f32 %v4877_v28, %v4876_v2  ;;  %v9064_v62 = vsub.f32 %v8837_v24, %v4809_v42  ;;  %v4851_v60 = vmul.f32 %v8953_v51, %v8953_v51  ;;  %v4887_v16 = vsel %vm228_vm2, %v4849_v55, 0.0 }
 0x4f0   : > { %v4852_v31 = vmul.f32 %v9058_v46, %v9058_v46  ;;  %v4889_v40 = vsel %vm228_vm2, %v4850_v36, 0.0  ;;  %v4854_v24 = vmul.f32 %v8956_v7, %v8956_v7  ;;  %v4855_v6 = vmul.f32 %v8959_v22, %v8959_v22 }
 0x4f1   : > { %v4880_v63 = vadd.f32 %v4879_v37, %v4878_v38  ;;  %v4853_v48 = vmul.f32 %v9064_v62, %v9064_v62  ;;  %v4891_v35 = vsel %vm228_vm2, %v4851_v60, 0.0  ;;  %v4856_v5 = vmul.f32 %v8962_v50, %v8962_v50 }
 0x4f2   : > { %v4893_v42 = vsel %vm228_vm2, %v4852_v31, 0.0  ;;  %v4897_v2 = vsel %vm228_vm2, %v4854_v24, 0.0  ;;  %v4857_v28 = vmul.f32 %v8965_v4, %v8965_v4  ;;  %v4899_v38 = vsel %vm228_vm2, %v4855_v6, 0.0 }
 0x4f3   : > { %v4882_v39 = vadd.f32 %v4881_v57, %v4880_v63  ;;  %v4895_v59 = vsel %vm228_vm2, %v4853_v48, 0.0  ;;  %v4858_v37 = vmul.f32 %v8968_v14, %v8968_v14  ;;  %v4901_v63 = vsel %vm228_vm2, %v4856_v5, 0.0 }
 0x4f4   : > { %v4859_v57 = vmul.f32 %v8971_v17, %v8971_v17 }
 0x4f5   : > { %v4884_v12 = vadd.f32 %v4883_v41, %v4882_v39  ;;  %v4903_v39 = vsel %vm228_vm2, %v4857_v28, 0.0  ;;  %v4860_v41 = vmul.f32 %v8974_v9, %v8974_v9 }
 0x4f7   : > { %v4886_v30 = vadd.f32 %v4885_v54, %v4884_v12  ;;  %v4905_v12 = vsel %vm228_vm2, %v4858_v37, 0.0  ;;  %v4861_v54 = vmul.f32 %v8977_v33, %v8977_v33 }
 0x4f9   : > { %v4888_v29 = vadd.f32 %v4887_v16, %v4886_v30  ;;  %v4907_v30 = vsel %vm228_vm2, %v4859_v57, 0.0  ;;  %v4862_v16 = vmul.f32 %v8980_v32, %v8980_v32 }
 0x4fb   : > { %v4890_v26 = vadd.f32 %v4889_v40, %v4888_v29  ;;  %v4909_v29 = vsel %vm228_vm2, %v4860_v41, 0.0  ;;  %v4863_v40 = vmul.f32 %v8983_v56, %v8983_v56 }
 0x4fd   : > { %v4892_v0 = vadd.f32 %v4891_v35, %v4890_v26  ;;  %v4911_v26 = vsel %vm228_vm2, %v4861_v54, 0.0  ;;  %v4864_v35 = vmul.f32 %v8986_v45, %v8986_v45 }
 0x4ff   : > { %v4894_v34 = vadd.f32 %v4893_v42, %v4892_v0  ;;  %v4913_v0 = vsel %vm228_vm2, %v4862_v16, 0.0  ;;  %v4865_v42 = vmul.f32 %v8989_v43, %v8989_v43 }
 0x501   : > { %v4896_v11 = vadd.f32 %v4895_v59, %v4894_v34  ;;  %v4915_v34 = vsel %vm228_vm2, %v4863_v40, 0.0  ;;  %v4866_v59 = vmul.f32 %v8992_v53, %v8992_v53 }
 0x503   : > { %v4898_v21 = vadd.f32 %v4897_v2, %v4896_v11  ;;  %v4917_v11 = vsel %vm228_vm2, %v4864_v35, 0.0  ;;  %v4867_v2 = vmul.f32 %v8994_v61, %v8994_v61 }
 0x505   : > { %v4900_v25 = vadd.f32 %v4899_v38, %v4898_v21  ;;  %v4919_v21 = vsel %vm228_vm2, %v4865_v42, 0.0  ;;  %v4868_v38 = vmul.f32 %v8996_v23, %v8996_v23 }
 0x507   : > { %v4902_v27 = vadd.f32 %v4901_v63, %v4900_v25  ;;  %v4921_v25 = vsel %vm228_vm2, %v4866_v59, 0.0  ;;  %v4869_v63 = vmul.f32 %v8998_v1, %v8998_v1 }
 0x509   : > { %v4904_v55 = vadd.f32 %v4903_v39, %v4902_v27  ;;  %v4923_v27 = vsel %vm228_vm2, %v4867_v2, 0.0  ;;  %v4870_v39 = vmul.f32 %v9000_v18, %v9000_v18 }
 0x50b   : > { %v4906_v36 = vadd.f32 %v4905_v12, %v4904_v55  ;;  %v4925_v55 = vsel %vm228_vm2, %v4868_v38, 0.0  ;;  %v4871_v12 = vmul.f32 %v9002_v15, %v9002_v15 }
 0x50d   : > { %v4908_v60 = vadd.f32 %v4907_v30, %v4906_v36  ;;  %v4927_v36 = vsel %vm228_vm2, %v4869_v63, 0.0  ;;  %v4872_v30 = vmul.f32 %v9004_v44, %v9004_v44 }
 0x50f   : > { %v4910_v31 = vadd.f32 %v4909_v29, %v4908_v60  ;;  %v4929_v60 = vsel %vm228_vm2, %v4870_v39, 0.0  ;;  %v4873_v29 = vmul.f32 %v9006_v58, %v9006_v58 }
 0x511   : > { %v4912_v48 = vadd.f32 %v4911_v26, %v4910_v31  ;;  %v4931_v31 = vsel %vm228_vm2, %v4871_v12, 0.0  ;;  %v4933_v26 = vsel %vm228_vm2, %v4872_v30, 0.0  ;;  %v4935_v35 = vsel %vm228_vm2, %v4873_v29, 0.0  ;;  %v4984_v12 = vld [vmem:[%s6436_s18 + $0x30] sm:$0xff]  ;;  %v4987_v30 = vld [vmem:[%s6436_s18 + $0x48] sm:$0xff]  ;;  %v4990_v29 = vld [vmem:[%s6436_s18 + $0x60] sm:$0xff] }
 0x513   : > { %v4914_v24 = vadd.f32 %v4913_v0, %v4912_v48 }
 0x515   : > { %v4916_v6 = vadd.f32 %v4915_v34, %v4914_v24 }
 0x517   : > { %v4918_v5 = vadd.f32 %v4917_v11, %v4916_v6 }
 0x519   : > { %v4920_v28 = vadd.f32 %v4919_v21, %v4918_v5 }
 0x51b   : > { %v4922_v37 = vadd.f32 %v4921_v25, %v4920_v28 }
 0x51d   : > { %v4924_v57 = vadd.f32 %v4923_v27, %v4922_v37 }
 0x51f   : > { %v4926_v41 = vadd.f32 %v4925_v55, %v4924_v57 }
 0x521   : > { %v4928_v54 = vadd.f32 %v4927_v36, %v4926_v41  ;;  %v4983_v41 = vld [vmem:[%s6436_s18 + $0x28] sm:$0xff]  ;;  %v4985_v36 = vld [vmem:[%s6436_s18 + $0x38] sm:$0xff] }
 0x523   : > { %v4930_v16 = vadd.f32 %v4929_v60, %v4928_v54  ;;  %v4988_v60 = vld [vmem:[%s6436_s18 + $0x50] sm:$0xff] }
 0x525   : > { %v4932_v40 = vadd.f32 %v4931_v31, %v4930_v16  ;;  %v4989_v16 = vld [vmem:[%s6436_s18 + $0x58] sm:$0xff]  ;;  %v4991_v31 = vld [vmem:[%s6436_s18 + $0x68] sm:$0xff] }
 0x527   : > { %v4934_v48 = vadd.f32 %v4933_v26, %v4932_v40  ;;  %v4993_v26 = vld [vmem:[%s6436_s18 + $0x78] sm:$0xff] }
 0x529   : > { %v4936_v0 = vadd.f32 %v4935_v35, %v4934_v48  ;;  %v4994_v48 = vld [vmem:[%s6436_s18 + $0x80] sm:$0xff]  ;;  %v4995_v35 = vld [vmem:[%s6436_s18 + $0x88] sm:$0xff] }
 0x52b   : > { %v4937_v24 = vrot.slane %v4936_v0, 4 }
 0x52d   : > { %v4938_v42 = vadd.f32 %v4937_v24, %v4936_v0  ;;  %v4996_v0 = vld [vmem:[%s6436_s18 + $0x90] sm:$0xff] }
 0x52f   : > { %v4939_v34 = vrot.slane %v4938_v42, 2 }
 0x531   : > { %v4940_v6 = vadd.f32 %v4939_v34, %v4938_v42 }
 0x533   : > { %v4941_v59 = vrot.slane %v4940_v6, 1 }
 0x535   : > { %v4942_v11 = vadd.f32 %v4941_v59, %v4940_v6  ;;  %v4999_v6 = vld [vmem:[%s6436_s18 + $0xa8] sm:$0xff] }
 0x537   : > { %v4943_v5 = vmul.f32 0.00390625, %v4942_v11 }
 0x539   : > { %v4944_v2 = vadd.f32 1e-05, %v4943_v5 }
 0x53b   : > { %6394 = vrsqrt.f32 %v4944_v2 }
 0x548   : > { %v6395_v21 = vpop.eup %6394 }
 0x549   : > { %v4946_v28 = vmul.f32 %v6395_v21, %v9009_v13  ;;  %v4947_v38 = vmul.f32 %v6395_v21, %v9012_v10  ;;  %v4948_v25 = vmul.f32 %v6395_v21, %v9015_v19  ;;  %v4949_v37 = vmul.f32 %v6395_v21, %v9018_v49 }
 0x54a   : > { %v4950_v63 = vmul.f32 %v6395_v21, %v9025_v8  ;;  %v4951_v27 = vmul.f32 %v6395_v21, %v9030_v47  ;;  %v4952_v57 = vmul.f32 %v6395_v21, %v9037_v52  ;;  %v4953_v39 = vmul.f32 %v6395_v21, %v9043_v3 }
 0x54b   : > { %v4954_v13 = vmul.f32 %v6395_v21, %v9049_v20  ;;  %v4955_v10 = vmul.f32 %v6395_v21, %v8953_v51  ;;  %v4956_v19 = vmul.f32 %v6395_v21, %v9058_v46  ;;  %v4957_v49 = vmul.f32 %v6395_v21, %v9064_v62  ;;  %v4978_v51 = vld [vmem:[%s6436_s18] sm:$0xff]  ;;  %v4979_v20 = vld [vmem:[%s6436_s18 + $0x8] sm:$0xff]  ;;  %v4980_v46 = vld [vmem:[%s6436_s18 + $0x10] sm:$0xff] }
 0x54c   : > { %v9150_v8 = vmul.f32 %v6395_v21, %v8956_v7  ;;  %v9153_v47 = vmul.f32 %v6395_v21, %v8959_v22  ;;  %v9156_v52 = vmul.f32 %v6395_v21, %v8962_v50  ;;  %v9159_v3 = vmul.f32 %v6395_v21, %v8965_v4  ;;  %v4981_v62 = vld [vmem:[%s6436_s18 + $0x18] sm:$0xff]  ;;  %v4982_v4 = vld [vmem:[%s6436_s18 + $0x20] sm:$0xff] }
 0x54d   : > { %v9166_v55 = vmul.f32 %v6395_v21, %v8968_v14  ;;  %v9169_v7 = vmul.f32 %v6395_v21, %v8971_v17  ;;  %v9172_v22 = vmul.f32 %v6395_v21, %v8974_v9  ;;  %v9175_v50 = vmul.f32 %v6395_v21, %v8977_v33  ;;  %v4986_v33 = vld [vmem:[%s6436_s18 + $0x40] sm:$0xff] }
 0x54e   : > { %v9182_v54 = vmul.f32 %v6395_v21, %v8980_v32  ;;  %v9185_v14 = vmul.f32 %v6395_v21, %v8983_v56  ;;  %v9188_v17 = vmul.f32 %v6395_v21, %v8986_v45  ;;  %v9191_v9 = vmul.f32 %v6395_v21, %v8989_v43 }
 0x54f   : > { %v9197_v32 = vmul.f32 %v6395_v21, %v8992_v53  ;;  %v9200_v56 = vmul.f32 %v6395_v21, %v8994_v61  ;;  %v9203_v45 = vmul.f32 %v6395_v21, %v8996_v23  ;;  %v9206_v43 = vmul.f32 %v6395_v21, %v8998_v1  ;;  %v4992_v1 = vld [vmem:[%s6436_s18 + $0x70] sm:$0xff] }
 0x550   : > { %v9212_v40 = vmul.f32 %v6395_v21, %v9000_v18  ;;  %v9215_v53 = vmul.f32 %v6395_v21, %v9002_v15  ;;  %v9218_v61 = vmul.f32 %v6395_v21, %v9004_v44  ;;  %v9221_v23 = vmul.f32 %v6395_v21, %v9006_v58  ;;  %v4997_v18 = vld [vmem:[%s6436_s18 + $0x98] sm:$0xff]  ;;  %v4998_v44 = vld [vmem:[%s6436_s18 + $0xa0] sm:$0xff]  ;;  %v5000_v58 = vld [vmem:[%s6436_s18 + $0xb0] sm:$0xff] }
 0x551   : > { %v5010_v24 = vadd.f32 %v4978_v51, %v4946_v28  ;;  %v5011_v42 = vadd.f32 %v4979_v20, %v4947_v38  ;;  %v5012_v34 = vadd.f32 %v4980_v46, %v4948_v25  ;;  %v5013_v15 = vadd.f32 %v4981_v62, %v4949_v37  ;;  %v5001_v21 = vld [vmem:[%s6436_s18 + $0xb8] sm:$0xff]  ;;  %v5003_v28 = vld [vmem:[%s6436_s18 + $0xc8] sm:$0xff] }
 0x552   : > { %9484 = vst [vmem:[#allocation45_spill] sm:$0xff] %v9221_v23  ;;  %v5014_v59 = vadd.f32 %v4982_v4, %v4950_v63  ;;  %v5015_v11 = vadd.f32 %v4983_v41, %v4951_v27  ;;  %v5016_v5 = vadd.f32 %v4984_v12, %v4952_v57  ;;  %v5017_v2 = vadd.f32 %v4985_v36, %v4953_v39  ;;  %v5002_v23 = vld [vmem:[%s6436_s18 + $0xc0] sm:$0xff]  ;;  %v5004_v63 = vld [vmem:[%s6436_s18 + $0xd0] sm:$0xff]  ;;  %v5005_v27 = vld [vmem:[%s6436_s18 + $0xd8] sm:$0xff] }
 0x553   : > { %v5018_v38 = vadd.f32 %v4986_v33, %v4954_v13  ;;  %v5019_v25 = vadd.f32 %v4987_v30, %v4955_v10  ;;  %v5020_v37 = vadd.f32 %v4988_v60, %v4956_v19  ;;  %v5021_v51 = vadd.f32 %v4989_v16, %v4957_v49  ;;  %5042 = vst.msk [vmem:[%s6441_s21] sm:$0xff] %vm228_vm2, %v5010_v24  ;;  %v5006_v57 = vld [vmem:[%s6436_s18 + $0xe0] sm:$0xff]  ;;  %v5007_v49 = vld [vmem:[%s6436_s18 + $0xe8] sm:$0xff] }
 0x554   : > { %5043 = vst.msk [vmem:[%s6441_s21 + $0x8] sm:$0xff] %vm228_vm2, %v5011_v42  ;;  %5044 = vst.msk [vmem:[%s6441_s21 + $0x10] sm:$0xff] %vm228_vm2, %v5012_v34  ;;  %v5022_v39 = vadd.f32 %v4990_v29, %v9150_v8  ;;  %v5023_v13 = vadd.f32 %v4991_v31, %v9153_v47  ;;  %v5024_v10 = vadd.f32 %v4992_v1, %v9156_v52  ;;  %v5008_v8 = vld [vmem:[%s6436_s18 + $0xf0] sm:$0xff]  ;;  %v5009_v47 = vld [vmem:[%s6436_s18 + $0xf8] sm:$0xff] }
 0x555   : > { %5045 = vst.msk [vmem:[%s6441_s21 + $0x18] sm:$0xff] %vm228_vm2, %v5013_v15  ;;  %v5025_v19 = vadd.f32 %v4993_v26, %v9159_v3  ;;  %5046 = vst.msk [vmem:[%s6441_s21 + $0x20] sm:$0xff] %vm228_vm2, %v5014_v59  ;;  %v5026_v52 = vadd.f32 %v4994_v48, %v9166_v55  ;;  %v5027_v20 = vadd.f32 %v4995_v35, %v9169_v7 }
 0x556   : > { %5047 = vst.msk [vmem:[%s6441_s21 + $0x28] sm:$0xff] %vm228_vm2, %v5015_v11  ;;  %5048 = vst.msk [vmem:[%s6441_s21 + $0x30] sm:$0xff] %vm228_vm2, %v5016_v5  ;;  %v5028_v3 = vadd.f32 %v4996_v0, %v9172_v22  ;;  %v5029_v46 = vadd.f32 %v4997_v18, %v9175_v50  ;;  %v5030_v62 = vadd.f32 %v4998_v44, %v9182_v54 }
 0x557   : > { %5049 = vst.msk [vmem:[%s6441_s21 + $0x38] sm:$0xff] %vm228_vm2, %v5017_v2  ;;  %5050 = vst.msk [vmem:[%s6441_s21 + $0x40] sm:$0xff] %vm228_vm2, %v5018_v38  ;;  %v5031_v55 = vadd.f32 %v4999_v6, %v9185_v14  ;;  %v5032_v7 = vadd.f32 %v5000_v58, %v9188_v17  ;;  %v5033_v22 = vadd.f32 %v5001_v21, %v9191_v9 }
 0x558   : > { %5051 = vst.msk [vmem:[%s6441_s21 + $0x48] sm:$0xff] %vm228_vm2, %v5019_v25  ;;  %5052 = vst.msk [vmem:[%s6441_s21 + $0x50] sm:$0xff] %vm228_vm2, %v5020_v37  ;;  %v5034_v50 = vadd.f32 %v5002_v23, %v9197_v32  ;;  %v5035_v4 = vadd.f32 %v5003_v28, %v9200_v56  ;;  %v5036_v41 = vadd.f32 %v5004_v63, %v9203_v45 }
 0x559   : > { %5053 = vst.msk [vmem:[%s6441_s21 + $0x58] sm:$0xff] %vm228_vm2, %v5021_v51  ;;  %5054 = vst.msk [vmem:[%s6441_s21 + $0x60] sm:$0xff] %vm228_vm2, %v5022_v39  ;;  %v5037_v12 = vadd.f32 %v5005_v27, %v9206_v43  ;;  %v5038_v36 = vadd.f32 %v5006_v57, %v9212_v40  ;;  %v5039_v54 = vadd.f32 %v5007_v49, %v9215_v53  ;;  %v9485_v17 = vld [vmem:[#allocation45_spill] sm:$0xff] }
 0x55a   : > { %5055 = vst.msk [vmem:[%s6441_s21 + $0x68] sm:$0xff] %vm228_vm2, %v5023_v13  ;;  %5056 = vst.msk [vmem:[%s6441_s21 + $0x70] sm:$0xff] %vm228_vm2, %v5024_v10  ;;  %v5040_v14 = vadd.f32 %v5008_v8, %v9218_v61  ;;  %v5041_v9 = vadd.f32 %v5009_v47, %v9485_v17 }
 0x55b   : > { %5057 = vst.msk [vmem:[%s6441_s21 + $0x78] sm:$0xff] %vm228_vm2, %v5025_v19  ;;  %5058 = vst.msk [vmem:[%s6441_s21 + $0x80] sm:$0xff] %vm228_vm2, %v5026_v52 }
 0x55c   : > { %5059 = vst.msk [vmem:[%s6441_s21 + $0x88] sm:$0xff] %vm228_vm2, %v5027_v20  ;;  %5060 = vst.msk [vmem:[%s6441_s21 + $0x90] sm:$0xff] %vm228_vm2, %v5028_v3 }
 0x55d   : > { %5061 = vst.msk [vmem:[%s6441_s21 + $0x98] sm:$0xff] %vm228_vm2, %v5029_v46  ;;  %5062 = vst.msk [vmem:[%s6441_s21 + $0xa0] sm:$0xff] %vm228_vm2, %v5030_v62 }
 0x55e   : > { %5063 = vst.msk [vmem:[%s6441_s21 + $0xa8] sm:$0xff] %vm228_vm2, %v5031_v55  ;;  %5064 = vst.msk [vmem:[%s6441_s21 + $0xb0] sm:$0xff] %vm228_vm2, %v5032_v7 }
 0x55f   : > { %5065 = vst.msk [vmem:[%s6441_s21 + $0xb8] sm:$0xff] %vm228_vm2, %v5033_v22  ;;  %5066 = vst.msk [vmem:[%s6441_s21 + $0xc0] sm:$0xff] %vm228_vm2, %v5034_v50 }
 0x560   : > { %5067 = vst.msk [vmem:[%s6441_s21 + $0xc8] sm:$0xff] %vm228_vm2, %v5035_v4  ;;  %5068 = vst.msk [vmem:[%s6441_s21 + $0xd0] sm:$0xff] %vm228_vm2, %v5036_v41 }
 0x561   : > { %5069 = vst.msk [vmem:[%s6441_s21 + $0xd8] sm:$0xff] %vm228_vm2, %v5037_v12  ;;  %5070 = vst.msk [vmem:[%s6441_s21 + $0xe0] sm:$0xff] %vm228_vm2, %v5038_v36 }
 0x562   : > { %5071 = vst.msk [vmem:[%s6441_s21 + $0xe8] sm:$0xff] %vm228_vm2, %v5039_v54  ;;  %5072 = vst.msk [vmem:[%s6441_s21 + $0xf0] sm:$0xff] %vm228_vm2, %v5040_v14 }
 0x563   : > { %5073 = vst.msk [vmem:[%s6441_s21 + $0xf8] sm:$0xff] %vm228_vm2, %v5041_v9 }
 0x564 PF: > { %s13_s12 = sadd.s32 1, %s6402_s12  }
 0x565   : > { %p10_p5 = scmp.ge.s32.totalorder %s13_s12, 4  }
 0x567   :  { %12 = sbr.rel (!%p10_p5) target bundleno = 1 (0x1), region = 86 }

</bundles_post_ra>
